<compile_context>
chip_gen: v7x
topology: tpu7x:2x2x1
jax: 0.10.0
libtpu: 0.0.40
codegen_flags: <defaults>
</compile_context>

<pallas_src>
import functools

import jax
import jax.numpy as jnp
from jax.experimental import pallas as pl
from jax.experimental.pallas import tpu as pltpu

OUT_LANES = 128  # lane-dense output slab width


def _round_up(x, m):
    return ((x + m - 1) // m) * m


# ----------------------------------------------------------------------------
# Fused Pallas kernel: whole HGNN_DSD eval forward
# ----------------------------------------------------------------------------
def hgnn_fused_kernel(idx_ref, par_ref, out_ref, *, B, D, H1, H2, VP):
    """Whole eval forward in one kernel.

    idx_ref: (R, NC) int32 index slab, rows stacked as
             [label(+Vs) | dsd_1 | usu_1 (i-major) | usu_2 (i-major) |
              usu_3 (j-major, then i, then batch)], each section B rows,
             zero-padded to NC columns.
    par_ref: (VP + 6D, D) f32 parameter slab:
             [combined emb table | W_dsd_1_1 | W_dsd_1_2 | W_usu_2_1 |
              W_usu_2_2 | W_usu_1 | W_usu_3].
    out_ref: (B, OUT_LANES) f32, score broadcast along lanes.
    """
    f32 = jnp.float32
    HB = H1 * B
    r_label, r_dsd1, r_usu1, r_usu2, r_usu3 = 0, B, 2 * B, 2 * B + HB, 2 * B + 2 * HB

    idx = idx_ref[...]                                    # (R, NC) int32
    table = par_ref[0:VP, :]                              # (VP, D) combined table
    w_dsd_pair = par_ref[VP:VP + 2 * D, :]                # [W_dsd_1_1; W_dsd_1_2]
    w_u2_pair = par_ref[VP + 2 * D:VP + 4 * D, :]         # [W_usu_2_1; W_usu_2_2]
    w_u1 = par_ref[VP + 4 * D:VP + 5 * D, :]
    w_u3 = par_ref[VP + 5 * D:VP + 6 * D, :]

    # ---- ONE fused embedding gather: per-row vocab counts @ combined table --
    # (index 0 / padded rows hit the all-zero padding rows of the table)
    iota = jax.lax.broadcasted_iota(jnp.int32, idx.shape + (VP,), 2)
    counts = jnp.sum((idx[:, :, None] == iota).astype(f32), axis=1)   # (R, VP)
    gathered = jnp.dot(counts, table, preferred_element_type=f32)     # (R, D)

    # per-row non-zero neighbor counts in one pass over the whole slab
    nz = jnp.sum((idx != 0).astype(f32), axis=1, keepdims=True)       # (R, 1)

    def nbw(cnt):
        # _avg_on_real_neighbor weight: 1/(cnt+1e-8), >=1e8 -> 0.  Exact divide
        # on purpose: the zero-neighbor mask depends on this rounding; do NOT
        # swap in an approx reciprocal here.
        w = 1.0 / (cnt + 1e-8)
        return jnp.where(w >= 1e8, 0.0, w)

    def l2norm(x):
        # F.normalize(x, p=2, dim=1) via rsqrt -> EUP slot (idle except tanh).
        ss = jnp.sum(x * x, axis=1, keepdims=True)
        return x * jax.lax.rsqrt(jnp.maximum(ss, 1e-24))

    t_d = gathered[r_label:r_label + B]                   # (B, D) dise embedding
    xs_dsd = gathered[r_dsd1:r_dsd1 + B]                  # (B, D) sum_n symp emb
    s1_all = gathered[r_usu1:r_usu1 + HB]                 # (HB, D)
    xs_u3 = gathered[r_usu3:r_usu3 + H2 * HB]             # (H2*HB, D)

    # ------------------------------ forward_dsd ------------------------------
    nw_d = nbw(nz[r_dsd1:r_dsd1 + B])                     # (B, 1)
    lhs_d = jnp.concatenate([t_d + xs_dsd * nw_d,
                             xs_dsd * t_d * nw_d], axis=-1)           # (B, 2D)
    emb_dise = jnp.tanh(jnp.dot(lhs_d, w_dsd_pair,
                                preferred_element_type=f32))          # (B, D)

    # ------------------------------ forward_usu ------------------------------
    # 3-hop messages, all H1*H2 groups batched (dropout = identity in eval).
    nw3 = nbw(nz[r_usu3:r_usu3 + H2 * HB])                # (H2*HB, 1)
    u2_all = l2norm(jnp.tanh(
        jnp.dot(xs_u3, w_u3, preferred_element_type=f32) * nw3))      # (H2*HB, D)

    # sum over the H2 2-hop children (rows j-major then i then b; every offset
    # is a multiple of 8 sublanes -> aligned slices, no relayout/copy)
    su2 = u2_all[0:HB]
    for j in range(1, H2):
        su2 = su2 + u2_all[j * HB:(j + 1) * HB]                       # (HB, D)

    # 2-hop ego messages, all H1 hops batched, merged pair weight
    nw2 = nbw(nz[r_usu2:r_usu2 + HB])                     # (HB, 1)
    lhs_u = jnp.concatenate([s1_all + su2 * nw2,
                             su2 * s1_all * nw2], axis=-1)            # (HB, 2D)
    ego = l2norm(jnp.tanh(jnp.dot(lhs_u, w_u2_pair,
                                  preferred_element_type=f32)))       # (HB, D)

    # 1-hop aggregation (neighbor sum commutes with the bias-free linear)
    nz1 = nz[r_usu1:r_usu1 + HB]                          # (HB, 1)
    sego = ego[0:B]
    cnt1 = nz1[0:B]
    for i in range(1, H1):
        sego = sego + ego[i * B:(i + 1) * B]                          # (B, D)
        cnt1 = cnt1 + nz1[i * B:(i + 1) * B]                          # (B, 1)
    nw1 = nbw(cnt1)
    emb_user = jnp.tanh(
        jnp.dot(sego, w_u1, preferred_element_type=f32) * nw1)        # (B, D)

    # --------------------------------- score ---------------------------------
    score = jnp.sum(emb_dise * emb_user, axis=1, keepdims=True)       # (B, 1)
    out_ref[...] = jnp.broadcast_to(score, (B, OUT_LANES))            # lane-dense


# ----------------------------------------------------------------------------
# Host wrapper: build the two slabs and launch ONE pallas_call
# ----------------------------------------------------------------------------
def hgnn_dsd_forward(params, data, label, cfg):
    """Eval-mode forward: returns pred_score (B,).
    Caller contract: row 0 of both embedding tables must be zero
    (padding_idx=0); padded batch rows / padded slab columns rely on it.
    TODO(synk): training branch (negative sampling + dsd_sampler.sampling) is
    host-side random index generation, not kernel compute; not implemented."""
    B = label.shape[0]
    D = cfg["symp_embedding_dim"]
    H1, H2 = cfg["num_usu_1_hop"], cfg["num_usu_2_hop"]
    N1, N3 = cfg["num_dsd_1_hop"], cfg["num_usu_3_hop"]
    N2 = H2
    Vs, Vd = cfg["num_symp"] + 1, cfg["num_dise"] + 1
    VP = _round_up(Vs + Vd, 8)     # combined-table rows, sublane aligned

    BP = _round_up(B, 8)           # batch rows padded to a sublane multiple
    NC = max(1, N1, N2, N3)        # index-slab column width

    def pad_block(x):
        x = x.astype(jnp.int32)
        return jnp.pad(x, ((0, BP - B), (0, NC - x.shape[1])))

    # --- single int32 index slab (all section offsets are multiples of 8) ----
    label_off = label.astype(jnp.int32)[:, None] + Vs     # gather from dise part
    blocks = [pad_block(label_off), pad_block(data["dsd_1"])]
    blocks += [pad_block(data["usu_1"][:, i:i + 1]) for i in range(H1)]
    blocks += [pad_block(data["usu_2_{}".format(i)]) for i in range(H1)]
    # usu_3_{i*H1+j} stacked j-major then i then b (matches the PyTorch module
    # naming 'usu_3_{}'.format(i * num_usu_1_hop + j))
    blocks += [pad_block(data["usu_3_{}".format(i * H1 + j)])
               for j in range(H2) for i in range(H1)]
    idx_slab = jnp.concatenate(blocks, axis=0)            # (R, NC)
    R = idx_slab.shape[0]

    # --- single f32 parameter slab: combined table + six weight matrices -----
    table = jnp.concatenate([params["symp_embeds"], params["dise_embeds"]], axis=0)
    table = jnp.pad(table, ((0, VP - table.shape[0]), (0, 0)))
    par_slab = jnp.concatenate(
        [table,
         params["w_dsd_1_1"], params["w_dsd_1_2"],
         params["w_usu_2_1"], params["w_usu_2_2"],
         params["w_usu_1"], params["w_usu_3"]], axis=0)   # (VP + 6D, D)

    kern = functools.partial(hgnn_fused_kernel, B=BP, D=D, H1=H1, H2=H2, VP=VP)
    # TODO(synk): once Vs*D or R*NC*VP stops fitting in VMEM (realistic vocab
    # sizes / large B), switch the gather to PrefetchScalarGridSpec or a
    # memory_space=pl.ANY DMA row-gather against an HBM-resident table, add a
    # "parallel" batch-tile grid axis so v7x's second TensorCore gets work,
    # and cast the table/weights to bf16 with f32 accumulation.
    out = pl.pallas_call(
        kern,
        out_shape=jax.ShapeDtypeStruct((BP, OUT_LANES), jnp.float32),
        grid=(1,),
        in_specs=[
            pl.BlockSpec((R, NC), lambda i: (0, 0)),             # index slab
            pl.BlockSpec((VP + 6 * D, D), lambda i: (0, 0)),     # param slab
        ],
        out_specs=pl.BlockSpec((BP, OUT_LANES), lambda i: (0, 0)),
        compiler_params=pltpu.CompilerParams(
            dimension_semantics=("arbitrary",)),
    )(idx_slab, par_slab)
    return out[:B, 0]


# ----------------------------------------------------------------------------
# Pure-JAX reference (mirrors the PyTorch op order) for a correctness check
# ----------------------------------------------------------------------------
def neighbor_weight(idx):
    cnt = jnp.sum(idx != 0, axis=1).astype(jnp.float32)[:, None]
    w = 1.0 / (cnt + 1e-8)
    return jnp.where(w >= 1e8, 0.0, w)


def l2_normalize(x, eps=1e-12):
    n = jnp.sqrt(jnp.sum(x * x, axis=1, keepdims=True))
    return x / jnp.maximum(n, eps)


def reference_forward(params, data, label, cfg):
    symp_tab, dise_tab = params["symp_embeds"], params["dise_embeds"]
    lin = lambda x, w: jnp.einsum("...d,de->...e", x, w)

    def avg(msg, idx):
        return jnp.sum(msg, axis=1) * neighbor_weight(idx)

    t = dise_tab[label]
    es = symp_tab[data["dsd_1"]]
    m = lin(es, params["w_dsd_1_1"]) + lin(es * t[:, None, :], params["w_dsd_1_2"])
    emb_dise = jnp.tanh(lin(t, params["w_dsd_1_1"]) + avg(m, data["dsd_1"]))

    es1 = symp_tab[data["usu_1"]]
    egos = []
    for i in range(cfg["num_usu_1_hop"]):
        s1 = es1[:, i]
        u2 = []
        for j in range(cfg["num_usu_2_hop"]):
            s3 = data["usu_3_{}".format(i * cfg["num_usu_1_hop"] + j)]
            mu = jnp.tanh(avg(lin(symp_tab[s3], params["w_usu_3"]), s3))
            u2.append(l2_normalize(mu)[:, None, :])
        eu2 = jnp.concatenate(u2, axis=1)
        idx2 = data["usu_2_{}".format(i)]
        msu = avg(lin(eu2, params["w_usu_2_1"])
                  + lin(eu2 * s1[:, None, :], params["w_usu_2_2"]), idx2)
        mss = lin(s1, params["w_usu_2_1"])
        egos.append(l2_normalize(jnp.tanh(mss + msu))[:, None, :])
    last = jnp.concatenate(egos, axis=1)
    emb_user = jnp.tanh(avg(lin(last, params["w_usu_1"]), data["usu_1"]))
    return jnp.sum(emb_dise * emb_user, axis=1)


# ----------------------------------------------------------------------------
# main
# ----------------------------------------------------------------------------
if __name__ == "__main__":
    cfg = dict(
        num_symp=50,
        num_dise=12,
        symp_embedding_dim=32,
        num_dsd_1_hop=6,
        num_usu_1_hop=3,
        num_usu_2_hop=2,
        num_usu_3_hop=5,
    )
    B, D = 4, cfg["symp_embedding_dim"]

    key = jax.random.PRNGKey(0)
    ks = jax.random.split(key, 16)

    # Parameters (deterministic). Linear weights stored pre-transposed (in, out).
    symp_embeds = 0.1 * jax.random.normal(ks[0], (cfg["num_symp"] + 1, D), jnp.float32)
    symp_embeds = symp_embeds.at[0].set(0.0)   # padding_idx=0
    dise_embeds = 0.1 * jax.random.normal(ks[1], (cfg["num_dise"] + 1, D), jnp.float32)
    dise_embeds = dise_embeds.at[0].set(0.0)   # padding_idx=0
    params = {
        "symp_embeds": symp_embeds,
        "dise_embeds": dise_embeds,
        "w_dsd_1_1": 0.1 * jax.random.normal(ks[2], (D, D), jnp.float32),
        "w_dsd_1_2": 0.1 * jax.random.normal(ks[3], (D, D), jnp.float32),
        "w_usu_1":   0.1 * jax.random.normal(ks[4], (D, D), jnp.float32),
        "w_usu_2_1": 0.1 * jax.random.normal(ks[5], (D, D), jnp.float32),
        "w_usu_2_2": 0.1 * jax.random.normal(ks[6], (D, D), jnp.float32),
        "w_usu_3":   0.1 * jax.random.normal(ks[7], (D, D), jnp.float32),
    }

    # Synthetic index data (what _array2dict / the samplers would produce).
    data = {
        "dsd_1": jax.random.randint(ks[8], (B, cfg["num_dsd_1_hop"]), 0,
                                    cfg["num_symp"] + 1, dtype=jnp.int32),
        "usu_1": jax.random.randint(ks[9], (B, cfg["num_usu_1_hop"]), 0,
                                    cfg["num_symp"] + 1, dtype=jnp.int32),
    }
    # exercise the zero-neighbor path (weight -> 0)
    data["dsd_1"] = data["dsd_1"].at[0].set(0)
    for i in range(cfg["num_usu_1_hop"]):
        data["usu_2_{}".format(i)] = jax.random.randint(
            jax.random.fold_in(ks[10], i), (B, cfg["num_usu_2_hop"]), 0,
            cfg["num_symp"] + 1, dtype=jnp.int32)
        for j in range(cfg["num_usu_2_hop"]):
            name = "usu_3_{}".format(i * cfg["num_usu_1_hop"] + j)
            data[name] = jax.random.randint(
                jax.random.fold_in(ks[11], i * 10 + j), (B, cfg["num_usu_3_hop"]),
                0, cfg["num_symp"] + 1, dtype=jnp.int32)
    label = jax.random.randint(ks[12], (B,), 1, cfg["num_dise"] + 1, dtype=jnp.int32)

    fwd = jax.jit(functools.partial(hgnn_dsd_forward, cfg=cfg))
    pred = fwd(params, data, label)
    pred = jax.block_until_ready(pred)

    ref = reference_forward(params, data, label, cfg)
    assert pred.shape == (B,)
    assert jnp.allclose(pred, ref, atol=1e-4, rtol=1e-4), (pred, ref)

    print("KERNEL_OK")
</pallas_src>

<mosaic_0001>
module attributes {stable_mosaic.version = 11 : i64} {
  func.func @hgnn_fused_kernel(%arg0: i32, %arg1: memref<112x6xi32, #tpu.memory_space<vmem>>, %arg2: memref<256x32xf32, #tpu.memory_space<vmem>>, %arg3: memref<8x128xf32, #tpu.memory_space<vmem>>) attributes {dimension_semantics = [#tpu.dimension_semantics<arbitrary>], iteration_bounds = array<i64: 1>, scalar_prefetch = 0 : i64, scratch_operands = 0 : i64, tpu.core_type = #tpu.core_type<tc>, window_params = [{pipeline_mode = #tpu.pipeline_mode<synchronous>, transform_indices = @transform_0, window_bounds = array<i64: 112, 6>}, {pipeline_mode = #tpu.pipeline_mode<synchronous>, transform_indices = @transform_1, window_bounds = array<i64: 256, 32>}, {pipeline_mode = #tpu.pipeline_mode<synchronous>, transform_indices = @transform_2, window_bounds = array<i64: 8, 128>}]} {
    %c0 = arith.constant 0 : index
    %c0_0 = arith.constant 0 : index
    %0 = vector.load %arg1[%c0, %c0_0] : memref<112x6xi32, #tpu.memory_space<vmem>>, vector<112x6xi32>
    %c0_1 = arith.constant 0 : index
    %c0_2 = arith.constant 0 : index
    %1 = vector.load %arg2[%c0_1, %c0_2] : memref<256x32xf32, #tpu.memory_space<vmem>>, vector<64x32xf32>
    %c64 = arith.constant 64 : index
    %c0_3 = arith.constant 0 : index
    %2 = vector.load %arg2[%c64, %c0_3] : memref<256x32xf32, #tpu.memory_space<vmem>>, vector<64x32xf32>
    %c128 = arith.constant 128 : index
    %c0_4 = arith.constant 0 : index
    %3 = vector.load %arg2[%c128, %c0_4] : memref<256x32xf32, #tpu.memory_space<vmem>>, vector<64x32xf32>
    %c192 = arith.constant 192 : index
    %c0_5 = arith.constant 0 : index
    %4 = vector.load %arg2[%c192, %c0_5] : memref<256x32xf32, #tpu.memory_space<vmem>>, vector<32x32xf32>
    %c224 = arith.constant 224 : index
    %c0_6 = arith.constant 0 : index
    %5 = vector.load %arg2[%c224, %c0_6] : memref<256x32xf32, #tpu.memory_space<vmem>>, vector<32x32xf32>
    %6 = tpu.iota {dimensions = array<i32: 2>} : vector<112x6x64xi32>
    %7 = vector.shape_cast %0 : vector<112x6xi32> to vector<112x6x1xi32>
    %8 = vector.broadcast %7 : vector<112x6x1xi32> to vector<112x6x64xi32>
    %9 = arith.cmpi eq, %8, %6 : vector<112x6x64xi32>
    %10 = arith.extui %9 : vector<112x6x64xi1> to vector<112x6x64xi32>
    %11 = arith.sitofp %10 : vector<112x6x64xi32> to vector<112x6x64xf32>
    %cst = arith.constant dense<0.000000e+00> : vector<112x64xf32>
    %12 = vector.multi_reduction <add>, %11, %cst [1] : vector<112x6x64xf32> to vector<112x64xf32>
    %cst_7 = arith.constant dense<0.000000e+00> : vector<112x32xf32>
    %13 = tpu.matmul %12, %1, %cst_7 {dimension_numbers = #tpu.dot_dimension_numbers<[1], [0], [0], [1], [0, 0, 1, 1], [], []>} : vector<112x64xf32>, vector<64x32xf32>, vector<112x32xf32> -> vector<112x32xf32>
    %c0_i32 = arith.constant 0 : i32
    %14 = vector.broadcast %c0_i32 : i32 to vector<112x6xi32>
    %15 = arith.cmpi ne, %0, %14 : vector<112x6xi32>
    %16 = arith.extui %15 : vector<112x6xi1> to vector<112x6xi32>
    %17 = arith.sitofp %16 : vector<112x6xi32> to vector<112x6xf32>
    %cst_8 = arith.constant dense<0.000000e+00> : vector<112xf32>
    %18 = vector.multi_reduction <add>, %17, %cst_8 [1] : vector<112x6xf32> to vector<112xf32>
    %19 = vector.shape_cast %18 : vector<112xf32> to vector<112x1xf32>
    %20 = vector.extract_strided_slice %13 {offsets = [0, 0], sizes = [8, 32], strides = [1, 1]} : vector<112x32xf32> to vector<8x32xf32>
    %21 = vector.extract_strided_slice %13 {offsets = [8, 0], sizes = [8, 32], strides = [1, 1]} : vector<112x32xf32> to vector<8x32xf32>
    %22 = vector.extract_strided_slice %13 {offsets = [16, 0], sizes = [24, 32], strides = [1, 1]} : vector<112x32xf32> to vector<24x32xf32>
    %23 = vector.extract_strided_slice %13 {offsets = [64, 0], sizes = [48, 32], strides = [1, 1]} : vector<112x32xf32> to vector<48x32xf32>
    %24 = vector.extract_strided_slice %19 {offsets = [8, 0], sizes = [8, 1], strides = [1, 1]} : vector<112x1xf32> to vector<8x1xf32>
    %cst_9 = arith.constant 9.99999993E-9 : f32
    %25 = vector.broadcast %cst_9 : f32 to vector<8x1xf32>
    %26 = arith.addf %24, %25 : vector<8x1xf32>
    %cst_10 = arith.constant 1.000000e+00 : f32
    %27 = vector.broadcast %cst_10 : f32 to vector<8x1xf32>
    %28 = arith.divf %27, %26 : vector<8x1xf32>
    %cst_11 = arith.constant 1.000000e+08 : f32
    %29 = vector.broadcast %cst_11 : f32 to vector<8x1xf32>
    %30 = arith.cmpf oge, %28, %29 : vector<8x1xf32>
    %cst_12 = arith.constant 0.000000e+00 : f32
    %31 = vector.broadcast %cst_12 : f32 to vector<8x1xf32>
    %32 = arith.select %30, %31, %28 : vector<8x1xi1>, vector<8x1xf32>
    %33 = vector.broadcast %32 : vector<8x1xf32> to vector<8x32xf32>
    %34 = arith.mulf %21, %33 : vector<8x32xf32>
    %35 = arith.addf %20, %34 : vector<8x32xf32>
    %36 = arith.mulf %21, %20 : vector<8x32xf32>
    %37 = vector.broadcast %32 : vector<8x1xf32> to vector<8x32xf32>
    %38 = arith.mulf %36, %37 : vector<8x32xf32>
    %39 = tpu.concatenate %35, %38 in 1 : vector<8x32xf32>, vector<8x32xf32> -> vector<8x64xf32>
    %cst_13 = arith.constant dense<0.000000e+00> : vector<8x32xf32>
    %40 = tpu.matmul %39, %2, %cst_13 {dimension_numbers = #tpu.dot_dimension_numbers<[1], [0], [0], [1], [0, 0, 1, 1], [], []>} : vector<8x64xf32>, vector<64x32xf32>, vector<8x32xf32> -> vector<8x32xf32>
    %41 = math.tanh %40 : vector<8x32xf32>
    %42 = vector.extract_strided_slice %19 {offsets = [64, 0], sizes = [48, 1], strides = [1, 1]} : vector<112x1xf32> to vector<48x1xf32>
    %cst_14 = arith.constant 9.99999993E-9 : f32
    %43 = vector.broadcast %cst_14 : f32 to vector<48x1xf32>
    %44 = arith.addf %42, %43 : vector<48x1xf32>
    %cst_15 = arith.constant 1.000000e+00 : f32
    %45 = vector.broadcast %cst_15 : f32 to vector<48x1xf32>
    %46 = arith.divf %45, %44 : vector<48x1xf32>
    %cst_16 = arith.constant 1.000000e+08 : f32
    %47 = vector.broadcast %cst_16 : f32 to vector<48x1xf32>
    %48 = arith.cmpf oge, %46, %47 : vector<48x1xf32>
    %cst_17 = arith.constant 0.000000e+00 : f32
    %49 = vector.broadcast %cst_17 : f32 to vector<48x1xf32>
    %50 = arith.select %48, %49, %46 : vector<48x1xi1>, vector<48x1xf32>
    %cst_18 = arith.constant dense<0.000000e+00> : vector<48x32xf32>
    %51 = tpu.matmul %23, %5, %cst_18 {dimension_numbers = #tpu.dot_dimension_numbers<[1], [0], [0], [1], [0, 0, 1, 1], [], []>} : vector<48x32xf32>, vector<32x32xf32>, vector<48x32xf32> -> vector<48x32xf32>
    %52 = vector.broadcast %50 : vector<48x1xf32> to vector<48x32xf32>
    %53 = arith.mulf %51, %52 : vector<48x32xf32>
    %54 = math.tanh %53 : vector<48x32xf32>
    %55 = arith.mulf %54, %54 : vector<48x32xf32>
    %cst_19 = arith.constant dense<0.000000e+00> : vector<48xf32>
    %56 = vector.multi_reduction <add>, %55, %cst_19 [1] : vector<48x32xf32> to vector<48xf32>
    %57 = vector.shape_cast %56 : vector<48xf32> to vector<48x1xf32>
    %cst_20 = arith.constant 1.000000e-24 : f32
    %58 = vector.broadcast %cst_20 : f32 to vector<48x1xf32>
    %59 = arith.maximumf %57, %58 : vector<48x1xf32>
    %60 = math.rsqrt %59 : vector<48x1xf32>
    %61 = vector.broadcast %60 : vector<48x1xf32> to vector<48x32xf32>
    %62 = arith.mulf %54, %61 : vector<48x32xf32>
    %63 = vector.extract_strided_slice %62 {offsets = [0, 0], sizes = [24, 32], strides = [1, 1]} : vector<48x32xf32> to vector<24x32xf32>
    %64 = vector.extract_strided_slice %62 {offsets = [24, 0], sizes = [24, 32], strides = [1, 1]} : vector<48x32xf32> to vector<24x32xf32>
    %65 = arith.addf %63, %64 : vector<24x32xf32>
    %66 = vector.extract_strided_slice %19 {offsets = [40, 0], sizes = [24, 1], strides = [1, 1]} : vector<112x1xf32> to vector<24x1xf32>
    %cst_21 = arith.constant 9.99999993E-9 : f32
    %67 = vector.broadcast %cst_21 : f32 to vector<24x1xf32>
    %68 = arith.addf %66, %67 : vector<24x1xf32>
    %cst_22 = arith.constant 1.000000e+00 : f32
    %69 = vector.broadcast %cst_22 : f32 to vector<24x1xf32>
    %70 = arith.divf %69, %68 : vector<24x1xf32>
    %cst_23 = arith.constant 1.000000e+08 : f32
    %71 = vector.broadcast %cst_23 : f32 to vector<24x1xf32>
    %72 = arith.cmpf oge, %70, %71 : vector<24x1xf32>
    %cst_24 = arith.constant 0.000000e+00 : f32
    %73 = vector.broadcast %cst_24 : f32 to vector<24x1xf32>
    %74 = arith.select %72, %73, %70 : vector<24x1xi1>, vector<24x1xf32>
    %75 = vector.broadcast %74 : vector<24x1xf32> to vector<24x32xf32>
    %76 = arith.mulf %65, %75 : vector<24x32xf32>
    %77 = arith.addf %22, %76 : vector<24x32xf32>
    %78 = arith.mulf %65, %22 : vector<24x32xf32>
    %79 = vector.broadcast %74 : vector<24x1xf32> to vector<24x32xf32>
    %80 = arith.mulf %78, %79 : vector<24x32xf32>
    %81 = tpu.concatenate %77, %80 in 1 : vector<24x32xf32>, vector<24x32xf32> -> vector<24x64xf32>
    %cst_25 = arith.constant dense<0.000000e+00> : vector<24x32xf32>
    %82 = tpu.matmul %81, %3, %cst_25 {dimension_numbers = #tpu.dot_dimension_numbers<[1], [0], [0], [1], [0, 0, 1, 1], [], []>} : vector<24x64xf32>, vector<64x32xf32>, vector<24x32xf32> -> vector<24x32xf32>
    %83 = math.tanh %82 : vector<24x32xf32>
    %84 = arith.mulf %83, %83 : vector<24x32xf32>
    %cst_26 = arith.constant dense<0.000000e+00> : vector<24xf32>
    %85 = vector.multi_reduction <add>, %84, %cst_26 [1] : vector<24x32xf32> to vector<24xf32>
    %86 = vector.shape_cast %85 : vector<24xf32> to vector<24x1xf32>
    %cst_27 = arith.constant 1.000000e-24 : f32
    %87 = vector.broadcast %cst_27 : f32 to vector<24x1xf32>
    %88 = arith.maximumf %86, %87 : vector<24x1xf32>
    %89 = math.rsqrt %88 : vector<24x1xf32>
    %90 = vector.broadcast %89 : vector<24x1xf32> to vector<24x32xf32>
    %91 = arith.mulf %83, %90 : vector<24x32xf32>
    %92 = vector.extract_strided_slice %19 {offsets = [16, 0], sizes = [24, 1], strides = [1, 1]} : vector<112x1xf32> to vector<24x1xf32>
    %93 = vector.extract_strided_slice %91 {offsets = [0, 0], sizes = [8, 32], strides = [1, 1]} : vector<24x32xf32> to vector<8x32xf32>
    %94 = vector.extract_strided_slice %92 {offsets = [0, 0], sizes = [8, 1], strides = [1, 1]} : vector<24x1xf32> to vector<8x1xf32>
    %95 = vector.extract_strided_slice %91 {offsets = [8, 0], sizes = [8, 32], strides = [1, 1]} : vector<24x32xf32> to vector<8x32xf32>
    %96 = arith.addf %93, %95 : vector<8x32xf32>
    %97 = vector.extract_strided_slice %92 {offsets = [8, 0], sizes = [8, 1], strides = [1, 1]} : vector<24x1xf32> to vector<8x1xf32>
    %98 = arith.addf %94, %97 : vector<8x1xf32>
    %99 = vector.extract_strided_slice %91 {offsets = [16, 0], sizes = [8, 32], strides = [1, 1]} : vector<24x32xf32> to vector<8x32xf32>
    %100 = arith.addf %96, %99 : vector<8x32xf32>
    %101 = vector.extract_strided_slice %92 {offsets = [16, 0], sizes = [8, 1], strides = [1, 1]} : vector<24x1xf32> to vector<8x1xf32>
    %102 = arith.addf %98, %101 : vector<8x1xf32>
    %cst_28 = arith.constant 9.99999993E-9 : f32
    %103 = vector.broadcast %cst_28 : f32 to vector<8x1xf32>
    %104 = arith.addf %102, %103 : vector<8x1xf32>
    %cst_29 = arith.constant 1.000000e+00 : f32
    %105 = vector.broadcast %cst_29 : f32 to vector<8x1xf32>
    %106 = arith.divf %105, %104 : vector<8x1xf32>
    %cst_30 = arith.constant 1.000000e+08 : f32
    %107 = vector.broadcast %cst_30 : f32 to vector<8x1xf32>
    %108 = arith.cmpf oge, %106, %107 : vector<8x1xf32>
    %cst_31 = arith.constant 0.000000e+00 : f32
    %109 = vector.broadcast %cst_31 : f32 to vector<8x1xf32>
    %110 = arith.select %108, %109, %106 : vector<8x1xi1>, vector<8x1xf32>
    %cst_32 = arith.constant dense<0.000000e+00> : vector<8x32xf32>
    %111 = tpu.matmul %100, %4, %cst_32 {dimension_numbers = #tpu.dot_dimension_numbers<[1], [0], [0], [1], [0, 0, 1, 1], [], []>} : vector<8x32xf32>, vector<32x32xf32>, vector<8x32xf32> -> vector<8x32xf32>
    %112 = vector.broadcast %110 : vector<8x1xf32> to vector<8x32xf32>
    %113 = arith.mulf %111, %112 : vector<8x32xf32>
    %114 = math.tanh %113 : vector<8x32xf32>
    %115 = arith.mulf %41, %114 : vector<8x32xf32>
    %cst_33 = arith.constant dense<0.000000e+00> : vector<8xf32>
    %116 = vector.multi_reduction <add>, %115, %cst_33 [1] : vector<8x32xf32> to vector<8xf32>
    %117 = vector.shape_cast %116 : vector<8xf32> to vector<8x1xf32>
    %118 = vector.shape_cast %117 : vector<8x1xf32> to vector<8x1xf32>
    %119 = vector.broadcast %118 : vector<8x1xf32> to vector<8x128xf32>
    %c0_34 = arith.constant 0 : index
    %c0_35 = arith.constant 0 : index
    %120 = vector.load %arg3[%c0_34, %c0_35] : memref<8x128xf32, #tpu.memory_space<vmem>>, vector<8x128xf32>
    tpu.vector_store %arg3[%c0_34, %c0_35], %119 {strides = array<i32>} : memref<8x128xf32, #tpu.memory_space<vmem>>, vector<8x128xf32>,
    return
  }
  func.func @transform_0(%arg0: i32) -> (i32, i32) {
    %c0_i32 = arith.constant 0 : i32
    %c0_i32_0 = arith.constant 0 : i32
    %c0_i32_1 = arith.constant 0 : i32
    return %c0_i32, %c0_i32_0 : i32, i32
  }
  func.func @transform_1(%arg0: i32) -> (i32, i32) {
    %c0_i32 = arith.constant 0 : i32
    %c0_i32_0 = arith.constant 0 : i32
    %c0_i32_1 = arith.constant 0 : i32
    return %c0_i32, %c0_i32_0 : i32, i32
  }
  func.func @transform_2(%arg0: i32) -> (i32, i32) {
    %c0_i32 = arith.constant 0 : i32
    %c0_i32_0 = arith.constant 0 : i32
    %c0_i32_1 = arith.constant 0 : i32
    return %c0_i32, %c0_i32_0 : i32, i32
  }
}

</mosaic_0001>

<bundles_post_ra>
// kernel: hgnn_dsd_forward.1
= control target key start
LH: loop header
LB: loop body
LE: loop exit
PB: predicated region body
PF: predicated region fallthrough
CT: control target
= control target key end

     0   :  { %v57_v0 = vlaneseq  ;;  %vm1179_vm0 = vcmask 521216   ;;  %vm2076_vm11 = vcmask 1041409   ;;  %s3411_s21 = smov 32   ;;  %s4959_s0 = inlined_call_operand.vmem [shape: s32[112,6], index: 0, kind: input, shape index: {}]   ;;  %s4960_s1 = inlined_call_operand.vmem [shape: f32[256,32], index: 1, kind: input, shape index: {}]   ;;  %s4961_s2 = inlined_call_operand.vmem [shape: f32[8,128], index: 2, kind: output, shape index: {}]  }
   0x1   :  { %v11_v2 = vld [vmem:[%s4959_s0] sm:$0xff]  ;;  %v12_v6 = vld [vmem:[%s4959_s0 + $0x8] sm:$0xff]  ;;  %v27_v31 = vld [vmem:[%s4960_s1 + $0x10] sm:$0xff] }
   0x2   :  { %v60_v1 = vshrl.u32 %v57_v0, 7  ;;  %v25_v26 = vld [vmem:[%s4960_s1] sm:$0xff]  ;;  %v26_v27 = vld [vmem:[%s4960_s1 + $0x8] sm:$0xff]  ;;  %v28_v32 = vld [vmem:[%s4960_s1 + $0x18] sm:$0xff] }
   0x3   :  { %v3274_v28 = vpack.c.bf16 %v26_v27, %v25_v26  ;;  %v13_v33 = vld [vmem:[%s4959_s0 + $0x10] sm:$0xff]  ;;  %v3278_v34 = vpack.c.bf16 %v28_v32, %v27_v31  ;;  %v29_v37 = vld [vmem:[%s4960_s1 + $0x20] sm:$0xff]  ;;  %v30_v38 = vld [vmem:[%s4960_s1 + $0x28] sm:$0xff] }
   0x4   :  { %v3431_v3 = vsub.s32 2, %v60_v1  ;;  %v3433_v4 = vsub.s32 0, %v60_v1  ;;  %v3435_v5 = vsub.s32 1, %v60_v1  ;;  %v3444_v11 = vsub.s32 3, %v60_v1  ;;  %v14_v39 = vld [vmem:[%s4959_s0 + $0x18] sm:$0xff]  ;;  %v15_v49 = vld [vmem:[%s4959_s0 + $0x20] sm:$0xff] }
   0x5   :  { %v3448_v14 = vsub.s32 4, %v60_v1  ;;  %v3452_v17 = vsub.s32 5, %v60_v1  ;;  %v3456_v20 = vsub.s32 6, %v60_v1  ;;  %v3460_v23 = vsub.s32 7, %v60_v1  ;;  %3275 = vmatprep.subr.bf16.mxu0 %v3274_v28  ;;  %v31_v52 = vld [vmem:[%s4960_s1 + $0x30] sm:$0xff]  ;;  %v32_v53 = vld [vmem:[%s4960_s1 + $0x38] sm:$0xff] }
   0x6   :  { %v76_v7 = vrot.slane %v11_v2, %v3431_v3  ;;  %v62_v8 = vrot.slane %v11_v2, %v3433_v4  ;;  %v118_v9 = vrot.slane %v12_v6, %v3433_v4  ;;  %v69_v10 = vrot.slane %v11_v2, %v3435_v5  ;;  %3277 = vmatpush3.bf16.msra.mxu0 %v3274_v28  ;;  %v16_v59 = vld [vmem:[%s4959_s0 + $0x28] sm:$0xff]  ;;  %v3563_v31 = vld [vmem:[%s4959_s0 + $0x40] sm:$0xff] }
   0x7   :  { %v83_v12 = vrot.slane %v11_v2, %v3444_v11  ;;  %v125_v13 = vrot.slane %v12_v6, %v3435_v5  ;;  %v90_v15 = vrot.slane %v11_v2, %v3448_v14  ;;  %v132_v16 = vrot.slane %v12_v6, %v3431_v3  ;;  %3279 = vmatprep.subr.bf16.mxu0 %v3278_v34  ;;  %v3568_v32 = vld [vmem:[%s4959_s0 + $0x48] sm:$0xff] }
   0x8   :  { %78 = vbcast.lane.b32.xlu1 %v76_v7, 256  ;;  %64 = vbcast.lane.b32.xlu0 %v62_v8, 256  ;;  %v97_v18 = vrot.slane %v11_v2, %v3452_v17  ;;  %v139_v19 = vrot.slane %v12_v6, %v3444_v11  ;;  %v104_v21 = vrot.slane %v11_v2, %v3456_v20 }
   0x9   :  { %v146_v22 = vrot.slane %v12_v6, %v3448_v14  ;;  %v111_v24 = vrot.slane %v11_v2, %v3460_v23  ;;  %v153_v25 = vrot.slane %v12_v6, %v3452_v17  ;;  %v167_v29 = vrot.slane %v12_v6, %v3460_v23 }
   0xa   :  { %v160_v30 = vrot.slane %v12_v6, %v3456_v20  ;;  %v181_v35 = vrot.slane %v13_v33, %v3435_v5  ;;  %v174_v36 = vrot.slane %v13_v33, %v3433_v4  ;;  %3281 = vmatpush3.bf16.msra.mxu0 %v3278_v34  ;;  %v3282_v40 = vpack.c.bf16 %v30_v38, %v29_v37 }
   0xb   :  { %v230_v41 = vrot.slane %v14_v39, %v3433_v4  ;;  %v188_v42 = vrot.slane %v13_v33, %v3431_v3  ;;  %v195_v43 = vrot.slane %v13_v33, %v3444_v11  ;;  %v237_v44 = vrot.slane %v14_v39, %v3435_v5 }
   0xc   :  { %120 = vbcast.lane.b32.xlu1 %v118_v9, 256  ;;  %71 = vbcast.lane.b32.xlu0 %v69_v10, 256  ;;  %v202_v45 = vrot.slane %v13_v33, %v3448_v14  ;;  %v244_v46 = vrot.slane %v14_v39, %v3431_v3  ;;  %v209_v47 = vrot.slane %v13_v33, %v3452_v17  ;;  %v3531_v10 = vld [vmem:[%s4959_s0 + $0x30] sm:$0xff] }
   0xd   :  { %3283 = vmatprep.subr.bf16.mxu0 %v3282_v40  ;;  %v251_v48 = vrot.slane %v14_v39, %v3444_v11  ;;  %v286_v50 = vrot.slane %v15_v49, %v3433_v4  ;;  %v258_v51 = vrot.slane %v14_v39, %v3448_v14  ;;  %v3286_v54 = vpack.c.bf16 %v32_v53, %v31_v52 }
   0xe   :  { %3285 = vmatpush3.bf16.msra.mxu0 %v3282_v40  ;;  %v216_v55 = vrot.slane %v13_v33, %v3456_v20  ;;  %v293_v56 = vrot.slane %v15_v49, %v3435_v5  ;;  %v300_v57 = vrot.slane %v15_v49, %v3431_v3  ;;  %v265_v58 = vrot.slane %v14_v39, %v3452_v17 }
   0xf   :  { %3287 = vmatprep.subr.bf16.mxu0 %v3286_v54  ;;  %v349_v60 = vrot.slane %v16_v59, %v3435_v5  ;;  %v342_v61 = vrot.slane %v16_v59, %v3433_v4  ;;  %v272_v62 = vrot.slane %v14_v39, %v3456_v20  ;;  %v223_v63 = vrot.slane %v13_v33, %v3460_v23 }
  0x10   :  { %85 = vbcast.lane.b32.xlu1 %v83_v12, 256  ;;  %127 = vbcast.lane.b32.xlu0 %v125_v13, 256  ;;  %v356_v1 = vrot.slane %v16_v59, %v3431_v3  ;;  %v307_v2 = vrot.slane %v15_v49, %v3444_v11  ;;  %v314_v6 = vrot.slane %v15_v49, %v3448_v14  ;;  %v3571_v33 = vand.u32 127, %v57_v0 }
  0x11   :  { %v279_v7 = vrot.slane %v14_v39, %v3460_v23  ;;  %v321_v8 = vrot.slane %v15_v49, %v3452_v17  ;;  %v363_v9 = vrot.slane %v16_v59, %v3444_v11  ;;  %v398_v12 = vrot.slane %v3531_v10, %v3433_v4 }
  0x12   :  { %3289 = vmatpush3.bf16.msra.mxu0 %v3286_v54  ;;  %v370_v13 = vrot.slane %v16_v59, %v3448_v14  ;;  %v335_v26 = vrot.slane %v15_v49, %v3460_v23  ;;  %v419_v28 = vrot.slane %v3531_v10, %v3444_v11  ;;  %v433_v34 = vrot.slane %v3531_v10, %v3452_v17 }
  0x13   :  { %v440_v38 = vrot.slane %v3531_v10, %v3456_v20  ;;  %v517_v0 = vrot.slane %v3563_v31, %v3435_v5  ;;  %v524_v39 = vrot.slane %v3563_v31, %v3431_v3  ;;  %v587_v52 = vrot.slane %v3568_v32, %v3444_v11 }
  0x14   :  { %92 = vbcast.lane.b32.xlu1 %v90_v15, 256  ;;  %134 = vbcast.lane.b32.xlu0 %v132_v16, 256  ;;  %v328_v15 = vrot.slane %v15_v49, %v3456_v20  ;;  %v405_v16 = vrot.slane %v3531_v10, %v3435_v5  ;;  %v3611_v49 = vld [vmem:[%s4959_s0 + $0x58] sm:$0xff]  ;;  %v594_v54 = vrot.slane %v3568_v32, %v3448_v14 }
  0x18   :  { %99 = vbcast.lane.b32.xlu1 %v97_v18, 256  ;;  %141 = vbcast.lane.b32.xlu0 %v139_v19, 256  ;;  %v412_v18 = vrot.slane %v3531_v10, %v3431_v3  ;;  %v377_v19 = vrot.slane %v16_v59, %v3452_v17 }
  0x1c   :  { %106 = vbcast.lane.b32.xlu1 %v104_v21, 256  ;;  %148 = vbcast.lane.b32.xlu0 %v146_v22, 256  ;;  %v3545_v21 = vld [vmem:[%s4959_s0 + $0x38] sm:$0xff] }
  0x1d   :  { %v461_v22 = vrot.slane %v3545_v21, %v3435_v5  ;;  %v468_v27 = vrot.slane %v3545_v21, %v3431_v3  ;;  %v482_v37 = vrot.slane %v3545_v21, %v3448_v14  ;;  %v489_v40 = vrot.slane %v3545_v21, %v3452_v17 }
  0x20   :  { %113 = vbcast.lane.b32.xlu1 %v111_v24, 256  ;;  %155 = vbcast.lane.b32.xlu0 %v153_v25, 256  ;;  %v454_v24 = vrot.slane %v3545_v21, %v3433_v4  ;;  %v384_v25 = vrot.slane %v16_v59, %v3456_v20 }
  0x24   :  { %169 = vbcast.lane.b32.xlu1 %v167_v29, 256  ;;  %162 = vbcast.lane.b32.xlu0 %v160_v30, 256  ;;  %v426_v29 = vrot.slane %v3531_v10, %v3448_v14  ;;  %v391_v30 = vrot.slane %v16_v59, %v3460_v23 }
  0x28   :  { %183 = vbcast.lane.b32.xlu1 %v181_v35, 256  ;;  %176 = vbcast.lane.b32.xlu0 %v174_v36, 256  ;;  %v475_v35 = vrot.slane %v3545_v21, %v3444_v11  ;;  %v510_v36 = vrot.slane %v3563_v31, %v3433_v4 }
  0x2c   :  { %232 = vbcast.lane.b32.xlu1 %v230_v41, 256  ;;  %190 = vbcast.lane.b32.xlu0 %v188_v42, 256  ;;  %v573_v41 = vrot.slane %v3568_v32, %v3435_v5  ;;  %v566_v42 = vrot.slane %v3568_v32, %v3433_v4 }
  0x30   :  { %197 = vbcast.lane.b32.xlu1 %v195_v43, 256  ;;  %239 = vbcast.lane.b32.xlu0 %v237_v44, 256  ;;  %v496_v43 = vrot.slane %v3545_v21, %v3456_v20  ;;  %v3598_v44 = vld [vmem:[%s4959_s0 + $0x50] sm:$0xff] }
  0x31   :  { %v622_v53 = vrot.slane %v3598_v44, %v3433_v4  ;;  %v636_v59 = vrot.slane %v3598_v44, %v3431_v3 }
  0x34   :  { %204 = vbcast.lane.b32.xlu1 %v202_v45, 256  ;;  %246 = vbcast.lane.b32.xlu0 %v244_v46, 256  ;;  %v447_v45 = vrot.slane %v3531_v10, %v3460_v23  ;;  %v580_v46 = vrot.slane %v3568_v32, %v3431_v3 }
  0x38   :  { %211 = vbcast.lane.b32.xlu1 %v209_v47, 256  ;;  %253 = vbcast.lane.b32.xlu0 %v251_v48, 256  ;;  %v531_v47 = vrot.slane %v3563_v31, %v3444_v11  ;;  %v538_v48 = vrot.slane %v3563_v31, %v3448_v14 }
  0x3c   :  { %288 = vbcast.lane.b32.xlu1 %v286_v50, 256  ;;  %260 = vbcast.lane.b32.xlu0 %v258_v51, 256  ;;  %v503_v50 = vrot.slane %v3545_v21, %v3460_v23  ;;  %v545_v51 = vrot.slane %v3563_v31, %v3452_v17 }
  0x40   :  { %218 = vbcast.lane.b32.xlu1 %v216_v55, 256  ;;  %295 = vbcast.lane.b32.xlu0 %v293_v56, 256  ;;  %v552_v55 = vrot.slane %v3563_v31, %v3456_v20  ;;  %v629_v56 = vrot.slane %v3598_v44, %v3435_v5 }
  0x44   :  { %302 = vbcast.lane.b32.xlu1 %v300_v57, 256  ;;  %267 = vbcast.lane.b32.xlu0 %v265_v58, 256 }
  0x48   :  { %351 = vbcast.lane.b32.xlu1 %v349_v60, 256  ;;  %344 = vbcast.lane.b32.xlu0 %v342_v61, 256  ;;  %v601_v60 = vrot.slane %v3568_v32, %v3452_v17  ;;  %v685_v61 = vrot.slane %v3611_v49, %v3435_v5 }
  0x4c   :  { %274 = vbcast.lane.b32.xlu1 %v272_v62, 256  ;;  %225 = vbcast.lane.b32.xlu0 %v223_v63, 256  ;;  %v678_v62 = vrot.slane %v3611_v49, %v3433_v4  ;;  %v608_v63 = vrot.slane %v3568_v32, %v3456_v20 }
  0x50   :  { %358 = vbcast.lane.b32.xlu1 %v356_v1, 256  ;;  %309 = vbcast.lane.b32.xlu0 %v307_v2, 256  ;;  %v559_v1 = vrot.slane %v3563_v31, %v3460_v23  ;;  %v3408_v2 = vmov 0.0  }
  0x54   :  { %316 = vbcast.lane.b32.xlu1 %v314_v6, 256  ;;  %281 = vbcast.lane.b32.xlu0 %v279_v7, 256 }
  0x58   :  { %323 = vbcast.lane.b32.xlu1 %v321_v8, 256  ;;  %365 = vbcast.lane.b32.xlu0 %v363_v9, 256  ;;  %v692_v8 = vrot.slane %v3611_v49, %v3431_v3 }
  0x5c   :  { %400 = vbcast.lane.b32.xlu1 %v398_v12, 256  ;;  %372 = vbcast.lane.b32.xlu0 %v370_v13, 256  ;;  %v3650_v12 = vld [vmem:[%s4959_s0 + $0x60] sm:$0xff] }
  0x60   :  { %330 = vbcast.lane.b32.xlu1 %v328_v15, 256  ;;  %407 = vbcast.lane.b32.xlu0 %v405_v16, 256 }
  0x64   :  { %414 = vbcast.lane.b32.xlu1 %v412_v18, 256  ;;  %379 = vbcast.lane.b32.xlu0 %v377_v19, 256 }
  0x68   :  { %463 = vbcast.lane.b32.xlu1 %v461_v22, 256  ;;  %456 = vbcast.lane.b32.xlu0 %v454_v24, 256 }
  0x6c   :  { %386 = vbcast.lane.b32.xlu1 %v384_v25, 256  ;;  %337 = vbcast.lane.b32.xlu0 %v335_v26, 256 }
  0x70   :  { %470 = vbcast.lane.b32.xlu1 %v468_v27, 256  ;;  %421 = vbcast.lane.b32.xlu0 %v419_v28, 256 }
  0x74   :  { %428 = vbcast.lane.b32.xlu1 %v426_v29, 256  ;;  %393 = vbcast.lane.b32.xlu0 %v391_v30, 256 }
  0x78   :  { %435 = vbcast.lane.b32.xlu1 %v433_v34, 256  ;;  %477 = vbcast.lane.b32.xlu0 %v475_v35, 256 }
  0x7a   :  { %v79_v57 = vpop.permute.xlu1 %78  ;;  %v65_v58 = vpop.permute.xlu0 %64 }
  0x7b   :  { %vm845_vm1 = vcmp.eq.s32.totalorder %v79_v57, %v3571_v33  ;;  %vm843_vm2 = vcmp.eq.s32.totalorder %v65_v58, %v3571_v33 }
  0x7c   :  { %v2960_v6 = vsel %vm845_vm1, 1.0, %v3408_v2  ;;  %v2958_v7 = vsel %vm843_vm2, 1.0, %v3408_v2  ;;  %512 = vbcast.lane.b32.xlu1 %v510_v36, 256  ;;  %484 = vbcast.lane.b32.xlu0 %v482_v37, 256  ;;  %v3677_v37 = vld [vmem:[%s4959_s0 + $0x68] sm:$0xff] }
  0x7d   :  { %v1194_v13 = vsel %vm1179_vm0, %v2960_v6, 0.0  ;;  %v1180_v15 = vsel %vm1179_vm0, %v2958_v7, 0.0 }
  0x7e   :  { %v1195_v19 = vrot.slane %v1194_v13, 4  ;;  %v1181_v22 = vrot.slane %v1180_v15, 4  ;;  %v121_v24 = vpop.permute.xlu1 %120  ;;  %v72_v25 = vpop.permute.xlu0 %71 }
  0x7f   :  { %vm851_vm3 = vcmp.eq.s32.totalorder %v121_v24, %v3571_v33  ;;  %vm844_vm4 = vcmp.eq.s32.totalorder %v72_v25, %v3571_v33 }
  0x80   :  { %v2966_v30 = vsel %vm851_vm3, 1.0, %v3408_v2  ;;  %v2959_v34 = vsel %vm844_vm4, 1.0, %v3408_v2  ;;  %442 = vbcast.lane.b32.xlu1 %v440_v38, 256  ;;  %519 = vbcast.lane.b32.xlu0 %v517_v0, 256  ;;  %v1196_v0 = vadd.f32 %v1195_v19, %v1194_v13  ;;  %v1182_v7 = vadd.f32 %v1181_v22, %v1180_v15 }
  0x81   :  { %v1236_v57 = vsel %vm1179_vm0, %v2966_v30, 0.0  ;;  %v1187_v58 = vsel %vm1179_vm0, %v2959_v34, 0.0 }
  0x82   :  { %v1237_v24 = vrot.slane %v1236_v57, 4  ;;  %v1188_v25 = vrot.slane %v1187_v58, 4  ;;  %v86_v36 = vpop.permute.xlu1 %85  ;;  %v128_v35 = vpop.permute.xlu0 %127 }
  0x83   :  { %vm846_vm5 = vcmp.eq.s32.totalorder %v86_v36, %v3571_v33  ;;  %vm852_vm6 = vcmp.eq.s32.totalorder %v128_v35, %v3571_v33  ;;  %v1197_v36 = vrot.slane %v1196_v0, 2 }
  0x84   :  { %v1238_v6 = vadd.f32 %v1237_v24, %v1236_v57  ;;  %v1189_v29 = vadd.f32 %v1188_v25, %v1187_v58  ;;  %526 = vbcast.lane.b32.xlu1 %v524_v39, 256  ;;  %v2961_v19 = vsel %vm846_vm5, 1.0, %v3408_v2  ;;  %v2967_v22 = vsel %vm852_vm6, 1.0, %v3408_v2  ;;  %491 = vbcast.lane.b32.xlu0 %v489_v40, 256 }
  0x85   :  { %v1183_v57 = vrot.slane %v1182_v7, 2  ;;  %v1201_v13 = vsel %vm1179_vm0, %v2961_v19, 0.0  ;;  %v1243_v40 = vsel %vm1179_vm0, %v2967_v22, 0.0  ;;  %vm2078_vm5 = vcmask 1042434  }
  0x86   :  { %v93_v58 = vpop.permute.xlu1 %92  ;;  %v135_v24 = vpop.permute.xlu0 %134  ;;  %v1239_v35 = vrot.slane %v1238_v6, 2  ;;  %v1190_v39 = vrot.slane %v1189_v29, 2  ;;  %v1202_v34 = vrot.slane %v1201_v13, 4  ;;  %v1244_v19 = vrot.slane %v1243_v40, 4 }
  0x87   :  { %vm847_vm7 = vcmp.eq.s32.totalorder %v93_v58, %v3571_v33  ;;  %vm853_vm8 = vcmp.eq.s32.totalorder %v135_v24, %v3571_v33  ;;  %v1198_v24 = vadd.f32 %v1197_v36, %v1196_v0  ;;  %v1184_v30 = vadd.f32 %v1183_v57, %v1182_v7 }
  0x88   :  { %575 = vbcast.lane.b32.xlu1 %v573_v41, 256  ;;  %v2962_v22 = vsel %vm847_vm7, 1.0, %v3408_v2  ;;  %v2968_v58 = vsel %vm853_vm8, 1.0, %v3408_v2  ;;  %568 = vbcast.lane.b32.xlu0 %v566_v42, 256  ;;  %v1203_v27 = vadd.f32 %v1202_v34, %v1201_v13  ;;  %v1245_v15 = vadd.f32 %v1244_v19, %v1243_v40 }
  0x89   :  { %v1208_v41 = vsel %vm1179_vm0, %v2962_v22, 0.0  ;;  %v1250_v38 = vsel %vm1179_vm0, %v2968_v58, 0.0  ;;  %v1240_v16 = vadd.f32 %v1239_v35, %v1238_v6  ;;  %v1191_v9 = vadd.f32 %v1190_v39, %v1189_v29 }
  0x8a   :  { %v100_v25 = vpop.permute.xlu1 %99  ;;  %v142_v28 = vpop.permute.xlu0 %141  ;;  %v1209_v26 = vrot.slane %v1208_v41, 4  ;;  %v1251_v18 = vrot.slane %v1250_v38, 4  ;;  %v1204_v42 = vrot.slane %v1203_v27, 2  ;;  %v1246_v0 = vrot.slane %v1245_v15, 2 }
  0x8b   :  { %vm848_vm9 = vcmp.eq.s32.totalorder %v100_v25, %v3571_v33  ;;  %vm854_vm10 = vcmp.eq.s32.totalorder %v142_v28, %v3571_v33  ;;  %v1199_v35 = vrot.slane %v1198_v24, 1  ;;  %v1185_v39 = vrot.slane %v1184_v30, 1 }
  0x8c   :  { %498 = vbcast.lane.b32.xlu1 %v496_v43, 256  ;;  %v1210_v7 = vadd.f32 %v1209_v26, %v1208_v41  ;;  %v1252_v36 = vadd.f32 %v1251_v18, %v1250_v38  ;;  %449 = vbcast.lane.b32.xlu0 %v447_v45, 256  ;;  %v2963_v34 = vsel %vm848_vm9, 1.0, %v3408_v2  ;;  %v2969_v29 = vsel %vm854_vm10, 1.0, %v3408_v2 }
  0x8d   :  { %v1247_v26 = vadd.f32 %v1246_v0, %v1245_v15  ;;  %v1215_v10 = vsel %vm1179_vm0, %v2963_v34, 0.0  ;;  %v1257_v45 = vsel %vm1179_vm0, %v2969_v29, 0.0  ;;  %v1241_v57 = vrot.slane %v1240_v16, 1 }
  0x8e   :  { %v107_v6 = vpop.permute.xlu1 %106  ;;  %v149_v13 = vpop.permute.xlu0 %148  ;;  %v1211_v18 = vrot.slane %v1210_v7, 2  ;;  %v1253_v38 = vrot.slane %v1252_v36, 2  ;;  %v1192_v25 = vrot.slane %v1191_v9, 1  ;;  %v1205_v40 = vadd.f32 %v1204_v42, %v1203_v27 }
  0x8f   :  { %vm849_vm12 = vcmp.eq.s32.totalorder %v107_v6, %v3571_v33  ;;  %vm855_vm13 = vcmp.eq.s32.totalorder %v149_v13, %v3571_v33  ;;  %v1216_v15 = vrot.slane %v1215_v10, 4  ;;  %v1258_v19 = vrot.slane %v1257_v45, 4 }
  0x90   :  { %582 = vbcast.lane.b32.xlu1 %v580_v46, 256  ;;  %533 = vbcast.lane.b32.xlu0 %v531_v47, 256  ;;  %v2964_v22 = vsel %vm849_vm12, 1.0, %v3408_v2  ;;  %v2970_v58 = vsel %vm855_vm13, 1.0, %v3408_v2  ;;  %v1248_v34 = vrot.slane %v1247_v26, 1  ;;  %v1212_v29 = vadd.f32 %v1211_v18, %v1210_v7 }
  0x91   :  { %v783_v46 = vrot.slane %v3650_v12, %v3460_v23  ;;  %v1254_v42 = vadd.f32 %v1253_v38, %v1252_v36  ;;  %v1217_v6 = vadd.f32 %v1216_v15, %v1215_v10  ;;  %v1222_v47 = vsel %vm1179_vm0, %v2964_v22, 0.0 }
  0x92   :  { %v114_v41 = vpop.permute.xlu1 %113  ;;  %v156_v0 = vpop.permute.xlu0 %155  ;;  %v1264_v13 = vsel %vm1179_vm0, %v2970_v58, 0.0  ;;  %v3764_v43 = vadd.f32 %v1199_v35, %v1198_v24  ;;  %v1186_v28 = vadd.f32 %v1185_v39, %v1184_v30  ;;  %v1242_v7 = vadd.f32 %v1241_v57, %v1240_v16 }
  0x93   :  { %v1193_v18 = vadd.f32 %v1192_v25, %v1191_v9  ;;  %v1206_v27 = vrot.slane %v1205_v40, 1  ;;  %v1259_v36 = vadd.f32 %v1258_v19, %v1257_v45  ;;  %v1265_v38 = vrot.slane %v1264_v13, 4 }
  0x94   :  { %540 = vbcast.lane.b32.xlu1 %v538_v48, 256  ;;  %505 = vbcast.lane.b32.xlu0 %v503_v50, 256  ;;  %vm850_vm14 = vcmp.eq.s32.totalorder %v114_v41, %v3571_v33  ;;  %v1249_v22 = vadd.f32 %v1248_v34, %v1247_v26  ;;  %v1223_v58 = vrot.slane %v1222_v47, 4  ;;  %vm856_vm15 = vcmp.eq.s32.totalorder %v156_v0, %v3571_v33 }
  0x95   :  { %v2965_v48 = vsel %vm850_vm14, 1.0, %v3408_v2  ;;  %v1213_v30 = vrot.slane %v1212_v29, 1  ;;  %v1255_v16 = vrot.slane %v1254_v42, 1  ;;  %v1218_v9 = vrot.slane %v1217_v6, 2 }
  0x96   :  { %v170_v10 = vpop.permute.xlu1 %169  ;;  %v163_v15 = vpop.permute.xlu0 %162  ;;  %v1229_v24 = vsel %vm1179_vm0, %v2965_v48, 0.0  ;;  %v1266_v21 = vadd.f32 %v1265_v38, %v1264_v13  ;;  %v2971_v35 = vsel %vm856_vm15, 1.0, %v3408_v2  ;;  %v3782_v26 = vsel %vm2076_vm11, %v1193_v18, %v1186_v28 }
  0x97   :  { %v1230_v50 = vrot.slane %v1229_v24, 4  ;;  %vm858_vm1 = vcmp.eq.s32.totalorder %v170_v10, %v3571_v33  ;;  %v3784_v45 = vadd.f32 %v1206_v27, %v1205_v40  ;;  %v1260_v39 = vrot.slane %v1259_v36, 2 }
  0x98   :  { %547 = vbcast.lane.b32.xlu1 %v545_v51, 256  ;;  %589 = vbcast.lane.b32.xlu0 %v587_v52, 256  ;;  %v1271_v57 = vsel %vm1179_vm0, %v2971_v35, 0.0  ;;  %v3788_v19 = vsel %vm2076_vm11, %v1249_v22, %v1242_v7  ;;  %v1224_v41 = vadd.f32 %v1223_v58, %v1222_v47  ;;  %v2973_v34 = vsel %vm858_vm1, 1.0, %v3408_v2 }
  0x99   :  { %v1272_v0 = vrot.slane %v1271_v57, 4  ;;  %v3791_v13 = vadd.f32 %v1213_v30, %v1212_v29  ;;  %v3793_v52 = vadd.f32 %v1255_v16, %v1254_v42  ;;  %v3795_v28 = vadd.f32 %v1218_v9, %v1217_v6 }
  0x9a   :  { %v184_v25 = vpop.permute.xlu1 %183  ;;  %v177_v51 = vpop.permute.xlu0 %176  ;;  %v1285_v40 = vsel %vm1179_vm0, %v2973_v34, 0.0  ;;  %v1267_v27 = vrot.slane %v1266_v21, 2  ;;  %v1231_v18 = vadd.f32 %v1230_v50, %v1229_v24  ;;  %v3804_v29 = vadd.f32 %v1260_v39, %v1259_v36 }
  0x9b   :  { %v1273_v7 = vadd.f32 %v1272_v0, %v1271_v57  ;;  %v1286_v38 = vrot.slane %v1285_v40, 4  ;;  %vm857_vm2 = vcmp.eq.s32.totalorder %v163_v15, %v3571_v33  ;;  %vm860_vm3 = vcmp.eq.s32.totalorder %v184_v25, %v3571_v33 }
  0x9c   :  { %624 = vbcast.lane.b32.xlu1 %v622_v53, 256  ;;  %596 = vbcast.lane.b32.xlu0 %v594_v54, 256  ;;  %vm859_vm4 = vcmp.eq.s32.totalorder %v177_v51, %v3571_v33  ;;  %v1225_v47 = vrot.slane %v1224_v41, 2  ;;  %v2972_v22 = vsel %vm857_vm2, 1.0, %v3408_v2  ;;  %v1220_v58 = vrot.slane %v3795_v28, 1 }
  0x9d   :  { %v1274_v53 = vrot.slane %v1273_v7, 2  ;;  %v1287_v10 = vadd.f32 %v1286_v38, %v1285_v40  ;;  %v1278_v54 = vsel %vm1179_vm0, %v2972_v22, 0.0  ;;  %v2975_v36 = vsel %vm860_vm3, 1.0, %v3408_v2 }
  0x9e   :  { %v233_v42 = vpop.permute.xlu1 %232  ;;  %v191_v6 = vpop.permute.xlu0 %190  ;;  %v2974_v15 = vsel %vm859_vm4, 1.0, %v3408_v2  ;;  %v1268_v48 = vadd.f32 %v1267_v27, %v1266_v21  ;;  %v1232_v30 = vrot.slane %v1231_v18, 2  ;;  %v1279_v16 = vrot.slane %v1278_v54, 4 }
  0x9f   :  { %v1299_v9 = vsel %vm1179_vm0, %v2975_v36, 0.0  ;;  %v1292_v50 = vsel %vm1179_vm0, %v2974_v15, 0.0  ;;  %vm867_vm6 = vcmp.eq.s32.totalorder %v233_v42, %v3571_v33  ;;  %vm861_vm7 = vcmp.eq.s32.totalorder %v191_v6, %v3571_v33 }
  0xa0   :  { %554 = vbcast.lane.b32.xlu1 %v552_v55, 256  ;;  %631 = vbcast.lane.b32.xlu0 %v629_v56, 256  ;;  %v1300_v24 = vrot.slane %v1299_v9, 4  ;;  %v1275_v57 = vadd.f32 %v1274_v53, %v1273_v7  ;;  %v1288_v55 = vrot.slane %v1287_v10, 2  ;;  %v1280_v21 = vadd.f32 %v1279_v16, %v1278_v54 }
  0xa1   :  { %v1293_v25 = vrot.slane %v1292_v50, 4  ;;  %v2982_v0 = vsel %vm867_vm6, 1.0, %v3408_v2  ;;  %v2976_v34 = vsel %vm861_vm7, 1.0, %v3408_v2  ;;  %v1262_v56 = vrot.slane %v3804_v29, 1 }
  0xa2   :  { %v198_v35 = vpop.permute.xlu1 %197  ;;  %v240_v39 = vpop.permute.xlu0 %239  ;;  %v1301_v51 = vadd.f32 %v1300_v24, %v1299_v9  ;;  %v1226_v40 = vadd.f32 %v1225_v47, %v1224_v41  ;;  %v1281_v27 = vrot.slane %v1280_v21, 2  ;;  %vm2080_vm9 = vcmask 1043459  }
  0xa3   :  { %vm862_vm8 = vcmp.eq.s32.totalorder %v198_v35, %v3571_v33  ;;  %v1294_v38 = vadd.f32 %v1293_v25, %v1292_v50  ;;  %v1269_v7 = vrot.slane %v1268_v48, 1  ;;  %v1348_v6 = vsel %vm1179_vm0, %v2982_v0, 0.0 }
  0xa4   :  { %638 = vbcast.lane.b32.xlu1 %v636_v59, 256  ;;  %603 = vbcast.lane.b32.xlu0 %v601_v60, 256  ;;  %v1302_v42 = vrot.slane %v1301_v51, 2  ;;  %v1306_v53 = vsel %vm1179_vm0, %v2976_v34, 0.0  ;;  %vm2082_vm10 = vcmask 1044484   ;;  %v1349_v36 = vrot.slane %v1348_v6, 4 }
  0xa5   :  { %v1295_v59 = vrot.slane %v1294_v38, 2  ;;  %v1307_v15 = vrot.slane %v1306_v53, 4  ;;  %v2977_v41 = vsel %vm862_vm8, 1.0, %v3408_v2  ;;  %vm2084_vm12 = vcmask 1045509  }
  0xa6   :  { %v205_v22 = vpop.permute.xlu1 %204  ;;  %v247_v54 = vpop.permute.xlu0 %246  ;;  %v1233_v47 = vadd.f32 %v1232_v30, %v1231_v18  ;;  %v1276_v16 = vrot.slane %v1275_v57, 1  ;;  %v3839_v60 = vadd.f32 %v1288_v55, %v1287_v10  ;;  %vm868_vm13 = vcmp.eq.s32.totalorder %v240_v39, %v3571_v33 }
  0xa7   :  { %vm2086_vm14 = vcmask 1046534   ;;  %v3848_v9 = vsel %vm2078_vm5, %v3793_v52, %v3788_v19  ;;  %v1221_v24 = vadd.f32 %v1220_v58, %v3795_v28  ;;  %v1227_v50 = vrot.slane %v1226_v40, 1 }
  0xa8   :  { %687 = vbcast.lane.b32.xlu1 %v685_v61, 256  ;;  %v1282_v35 = vadd.f32 %v1281_v27, %v1280_v21  ;;  %vm2088_vm15 = vcmask 1047559   ;;  %680 = vbcast.lane.b32.xlu0 %v678_v62, 256  ;;  %v1303_v18 = vadd.f32 %v1302_v42, %v1301_v51  ;;  %v1296_v10 = vadd.f32 %v1295_v59, %v1294_v38 }
  0xa9   :  { %v1313_v30 = vsel %vm1179_vm0, %v2977_v41, 0.0  ;;  %v2983_v61 = vsel %vm868_vm13, 1.0, %v3408_v2  ;;  %vm2181_vm1 = vcmask 523264   ;;  %v1263_v19 = vadd.f32 %v1262_v56, %v3804_v29 }
  0xaa   :  { %v212_v39 = vpop.permute.xlu1 %211  ;;  %v3856_v55 = vpop.permute.xlu0 %253  ;;  %v1270_v52 = vadd.f32 %v1269_v7, %v1268_v48  ;;  %v1350_v28 = vadd.f32 %v1349_v36, %v1348_v6  ;;  %v1308_v58 = vadd.f32 %v1307_v15, %v1306_v53  ;;  %v1277_v21 = vadd.f32 %v1276_v16, %v1275_v57 }
  0xab   :  { %v1290_v25 = vrot.slane %v3839_v60, 1  ;;  %v1355_v62 = vsel %vm1179_vm0, %v2983_v61, 0.0  ;;  %v1234_v51 = vrot.slane %v1233_v47, 1  ;;  %v1283_v0 = vrot.slane %v1282_v35, 1 }
  0xac   :  { %610 = vbcast.lane.b32.xlu1 %v608_v63, 256  ;;  %v1314_v34 = vrot.slane %v1313_v30, 4  ;;  %v1356_v27 = vrot.slane %v1355_v62, 4  ;;  %v1228_v38 = vadd.f32 %v1227_v50, %v1226_v40  ;;  %561 = vbcast.lane.b32.xlu0 %v559_v1, 256  ;;  %v1304_v29 = vrot.slane %v1303_v18, 1 }
  0xad   :  { %v1297_v48 = vrot.slane %v1296_v10, 1  ;;  %vm863_vm2 = vcmp.eq.s32.totalorder %v205_v22, %v3571_v33  ;;  %vm869_vm3 = vcmp.eq.s32.totalorder %v247_v54, %v3571_v33  ;;  %v1351_v7 = vrot.slane %v1350_v28, 2 }
  0xae   :  { %v3869_v57 = vpop.permute.xlu1 %288  ;;  %v3871_v56 = vpop.permute.xlu0 %260  ;;  %v1309_v63 = vrot.slane %v1308_v58, 2  ;;  %v1357_v42 = vadd.f32 %v1356_v27, %v1355_v62  ;;  %v2079_v40 = vsel %vm2078_vm5, %v3764_v43, %v3782_v26  ;;  %v1235_v6 = vadd.f32 %v1234_v51, %v1233_v47 }
  0xaf   :  { %v2081_v31 = vsel %vm2080_vm9, %v3784_v45, %v2079_v40  ;;  %v2978_v1 = vsel %vm863_vm2, 1.0, %v3408_v2  ;;  %v2984_v53 = vsel %vm869_vm3, 1.0, %v3408_v2  ;;  %v1284_v22 = vadd.f32 %v1283_v0, %v1282_v35 }
  0xb0   :  { %694 = vbcast.lane.b32.xlu1 %v692_v8, 256  ;;  %v1315_v54 = vadd.f32 %v1314_v34, %v1313_v30  ;;  %v1358_v59 = vrot.slane %v1357_v42, 2  ;;  %v2083_v36 = vsel %vm2082_vm10, %v3791_v13, %v2081_v31  ;;  %v4962_v43 = vrot.slane %v3598_v44, %v3444_v11 }
  0xb1   :  { %v3888_v26 = vadd.f32 %v1304_v29, %v1303_v18  ;;  %v2085_v45 = vsel %vm2084_vm12, %v1221_v24, %v2083_v36  ;;  %v1320_v15 = vsel %vm1179_vm0, %v2978_v1, 0.0  ;;  %v1362_v41 = vsel %vm1179_vm0, %v2984_v53, 0.0 }
  0xb2   :  { %645 = vbcast.lane.b32.xlu0 %v4962_v43, 256  ;;  %v219_v47 = vpop.permute.xlu1 %218  ;;  %v3893_v8 = vpop.permute.xlu0 %295  ;;  %v3895_v16 = vadd.f32 %v1297_v48, %v1296_v10  ;;  %v3897_v50 = vadd.f32 %v1351_v7, %v1350_v28  ;;  %v2087_v13 = vsel %vm2086_vm14, %v1228_v38, %v2085_v45  ;;  %v1321_v35 = vrot.slane %v1320_v15, 4 }
  0xb3   :  { %v1310_v30 = vadd.f32 %v1309_v63, %v1308_v58  ;;  %v1359_v61 = vadd.f32 %v1358_v59, %v1357_v42  ;;  %v2089_v18 = vsel %vm2088_vm15, %v1235_v6, %v2087_v13  ;;  %v1363_v62 = vrot.slane %v1362_v41, 4 }
  0xb4   :  { %v4963_v24 = vrot.slane %v3598_v44, %v3448_v14  ;;  %v1316_v51 = vrot.slane %v1315_v54, 2  ;;  %3181 = vmatprep.mubr.msk.f32.mxu0 %vm2181_vm1, %v2089_v18  ;;  %v1291_v10 = vadd.f32 %v1290_v25, %v3839_v60  ;;  %v2092_v28 = vsel %vm2080_vm9, %v1263_v19, %v3848_v9 }
  0xb5   :  { %vm864_vm4 = vcmp.eq.s32.totalorder %v212_v39, %v3571_v33  ;;  %v4964_v58 = vrot.slane %v3568_v32, %v3460_v23  ;;  %v1364_v0 = vadd.f32 %v1363_v62, %v1362_v41  ;;  %v2093_v34 = vsel %vm2082_vm10, %v1270_v52, %v2092_v28 }
  0xb6   :  { %652 = vbcast.lane.b32.xlu1 %v4963_v24, 256  ;;  %v2979_v27 = vsel %vm864_vm4, 1.0, %v3408_v2  ;;  %vm870_vm6 = vcmp.eq.s32.totalorder %v3856_v55, %v3571_v33  ;;  %v3916_v38 = vpop.permute.xlu1 %302  ;;  %v3918_v60 = vpop.permute.xlu0 %267  ;;  %v1353_v9 = vrot.slane %v3897_v50, 1  ;;  %v1322_v19 = vadd.f32 %v1321_v35, %v1320_v15 }
  0xb7   :  { %617 = vbcast.lane.b32.xlu0 %v4964_v58, 256  ;;  %v2094_v39 = vsel %vm2084_vm12, %v1277_v21, %v2093_v34  ;;  %v1327_v32 = vsel %vm1179_vm0, %v2979_v27, 0.0  ;;  %v1365_v25 = vrot.slane %v1364_v0, 2  ;;  %v2985_v48 = vsel %vm870_vm6, 1.0, %v3408_v2 }
  0xb8   :  { %v2095_v29 = vsel %vm2086_vm14, %v1284_v22, %v2094_v39  ;;  %v1328_v52 = vrot.slane %v1327_v32, 4  ;;  %v4965_v55 = vrot.slane %v3598_v44, %v3452_v17  ;;  %v1311_v7 = vrot.slane %v1310_v30, 1 }
  0xb9   :  { %v1317_v63 = vadd.f32 %v1316_v51, %v1315_v54  ;;  %v2096_v42 = vsel %vm2088_vm15, %v1291_v10, %v2095_v29  ;;  %v1369_v40 = vsel %vm1179_vm0, %v2985_v48, 0.0  ;;  %v4966_v21 = vrot.slane %v3611_v49, %v3444_v11 }
  0xba   :  { %659 = vbcast.lane.b32.xlu1 %v4965_v55, 256  ;;  %v1360_v6 = vrot.slane %v1359_v61, 1  ;;  %3182 = vmatmul.mubr.msk.f32.vlgmr.msra.gmra.mrb[0].mxu0 %vm2181_vm1, %v2096_v42  ;;  %v1329_v31 = vadd.f32 %v1328_v52, %v1327_v32  ;;  %v1370_v1 = vrot.slane %v1369_v40, 4  ;;  %vm875_vm7 = vcmp.eq.s32.totalorder %v3869_v57, %v3571_v33  ;;  %v3936_v53 = vpop.permute.xlu1 %351  ;;  %v3938_v22 = vpop.permute.xlu0 %344 }
  0xbb   :  { %701 = vbcast.lane.b32.xlu0 %v4966_v21, 256  ;;  %v1323_v54 = vrot.slane %v1322_v19, 2  ;;  %v2990_v59 = vsel %vm875_vm7, 1.0, %v3408_v2  ;;  %vm871_vm8 = vcmp.eq.s32.totalorder %v3871_v56, %v3571_v33  ;;  %vm865_vm13 = vcmp.eq.s32.totalorder %v219_v47, %v3571_v33 }
  0xbc   :  { %v1366_v36 = vadd.f32 %v1365_v25, %v1364_v0  ;;  %v1330_v43 = vrot.slane %v1329_v31, 2  ;;  %v1371_v45 = vadd.f32 %v1370_v1, %v1369_v40  ;;  %v1404_v15 = vsel %vm1179_vm0, %v2990_v59, 0.0 }
  0xbd   :  { %v4967_v57 = vrot.slane %v3650_v12, %v3433_v4  ;;  %v1405_v41 = vrot.slane %v1404_v15, 4  ;;  %v2986_v13 = vsel %vm871_vm8, 1.0, %v3408_v2  ;;  %v2980_v35 = vsel %vm865_vm13, 1.0, %v3408_v2 }
  0xbe   :  { %v4968_v18 = vrot.slane %v3611_v49, %v3448_v14  ;;  %v839_v56 = vrot.slane %v3677_v37, %v3460_v23  ;;  %v1312_v47 = vadd.f32 %v1311_v7, %v1310_v30  ;;  %v1318_v62 = vrot.slane %v1317_v63, 1  ;;  %v3956_v10 = vpop.permute.xlu1 %274  ;;  %v3958_v28 = vpop.permute.xlu0 %225 }
  0xbf   :  { %736 = vbcast.lane.b32.xlu1 %v4967_v57, 256  ;;  %v1372_v24 = vrot.slane %v1371_v45, 2  ;;  %v1376_v51 = vsel %vm1179_vm0, %v2986_v13, 0.0  ;;  %v2097_v58 = vsel %vm2076_vm11, %v3888_v26, %v3895_v16  ;;  %v1354_v0 = vadd.f32 %v1353_v9, %v3897_v50 }
  0xc0   :  { %708 = vbcast.lane.b32.xlu0 %v4968_v18, 256  ;;  %v1324_v34 = vadd.f32 %v1323_v54, %v1322_v19  ;;  %vm876_vm2 = vcmp.eq.s32.totalorder %v3893_v8, %v3571_v33  ;;  %v1361_v27 = vadd.f32 %v1360_v6, %v1359_v61  ;;  %v1367_v30 = vrot.slane %v1366_v36, 1 }
  0xc1   :  { %v1331_v39 = vadd.f32 %v1330_v43, %v1329_v31  ;;  %v1334_v32 = vsel %vm1179_vm0, %v2980_v35, 0.0  ;;  %v4969_v25 = vrot.slane %v3598_v44, %v3456_v20  ;;  %v1406_v29 = vadd.f32 %v1405_v41, %v1404_v15 }
  0xc2   :  { %v1377_v52 = vrot.slane %v1376_v51, 4  ;;  %v2991_v48 = vsel %vm876_vm2, 1.0, %v3408_v2  ;;  %vm877_vm3 = vcmp.eq.s32.totalorder %v3916_v38, %v3571_v33  ;;  %v4970_v26 = vrot.slane %v3650_v12, %v3435_v5  ;;  %v359_v9 = vpop.permute.xlu1 %358  ;;  %v3982_v19 = vpop.permute.xlu0 %309 }
  0xc3   :  { %666 = vbcast.lane.b32.xlu1 %v4969_v25, 256  ;;  %v3977_v8 = vsel %vm2078_vm5, %v1312_v47, %v2097_v58  ;;  %v3979_v16 = vadd.f32 %v1318_v62, %v1317_v63  ;;  %v1373_v50 = vadd.f32 %v1372_v24, %v1371_v45  ;;  %v1411_v61 = vsel %vm1179_vm0, %v2991_v48, 0.0 }
  0xc4   :  { %743 = vbcast.lane.b32.xlu0 %v4970_v26, 256  ;;  %v1325_v55 = vrot.slane %v1324_v34, 1  ;;  %v1335_v7 = vrot.slane %v1334_v32, 4  ;;  %v1412_v42 = vrot.slane %v1411_v61, 4  ;;  %v2992_v38 = vsel %vm877_vm3, 1.0, %v3408_v2 }
  0xc5   :  { %v2104_v40 = vsel %vm2076_vm11, %v1361_v27, %v1354_v0  ;;  %v1368_v21 = vadd.f32 %v1367_v30, %v1366_v36  ;;  %v1418_v6 = vsel %vm1179_vm0, %v2992_v38, 0.0  ;;  %vm872_vm4 = vcmp.eq.s32.totalorder %v3918_v60, %v3571_v33 }
  0xc6   :  { %v4971_v63 = vrot.slane %v3650_v12, %v3431_v3  ;;  %v1332_v31 = vrot.slane %v1331_v39, 1  ;;  %v1407_v1 = vrot.slane %v1406_v29, 2  ;;  %v1378_v54 = vadd.f32 %v1377_v52, %v1376_v51  ;;  %v4000_v60 = vpop.permute.xlu1 %316  ;;  %v4002_v15 = vpop.permute.xlu0 %281 }
  0xc7   :  { %v1419_v59 = vrot.slane %v1418_v6, 4  ;;  %v4972_v43 = vrot.slane %v3611_v49, %v3452_v17  ;;  %v1374_v45 = vrot.slane %v1373_v50, 1  ;;  %v2987_v36 = vsel %vm872_vm4, 1.0, %v3408_v2 }
  0xc8   :  { %750 = vbcast.lane.b32.xlu1 %v4971_v63, 256  ;;  %vm884_vm6 = vcmp.eq.s32.totalorder %v3936_v53, %v3571_v33  ;;  %vm883_vm7 = vcmp.eq.s32.totalorder %v3938_v22, %v3571_v33  ;;  %v4004_v57 = vadd.f32 %v1325_v55, %v1324_v34  ;;  %v1336_v41 = vadd.f32 %v1335_v7, %v1334_v32 }
  0xc9   :  { %715 = vbcast.lane.b32.xlu0 %v4972_v43, 256  ;;  %v1413_v13 = vadd.f32 %v1412_v42, %v1411_v61  ;;  %v1420_v35 = vadd.f32 %v1419_v59, %v1418_v6  ;;  %v4007_v18 = vsel %vm2078_vm5, %v1368_v21, %v2104_v40  ;;  %v1383_v47 = vsel %vm1179_vm0, %v2987_v36, 0.0 }
  0xca   :  { %v2999_v62 = vsel %vm884_vm6, 1.0, %v3408_v2  ;;  %v2998_v53 = vsel %vm883_vm7, 1.0, %v3408_v2  ;;  %v4973_v22 = vrot.slane %v3677_v37, %v3435_v5  ;;  %v4015_v24 = vadd.f32 %v1332_v31, %v1331_v39  ;;  %v4026_v5 = vpop.permute.xlu1 %323  ;;  %v4028_v39 = vpop.permute.xlu0 %365 }
  0xcb   :  { %v1408_v51 = vadd.f32 %v1407_v1, %v1406_v29  ;;  %v1379_v58 = vrot.slane %v1378_v54, 2  ;;  %v1384_v0 = vrot.slane %v1383_v47, 4  ;;  %v4974_v34 = vrot.slane %v3677_v37, %v3433_v4 }
  0xcc   :  { %799 = vbcast.lane.b32.xlu1 %v4973_v22, 256  ;;  %v4020_v27 = vadd.f32 %v1374_v45, %v1373_v50  ;;  %v1467_v30 = vsel %vm1179_vm0, %v2999_v62, 0.0  ;;  %v1460_v32 = vsel %vm1179_vm0, %v2998_v53, 0.0  ;;  %vm873_vm8 = vcmp.eq.s32.totalorder %v3956_v10, %v3571_v33 }
  0xcd   :  { %792 = vbcast.lane.b32.xlu0 %v4974_v34, 256  ;;  %v1337_v25 = vrot.slane %v1336_v41, 2  ;;  %v1414_v29 = vrot.slane %v1413_v13, 2  ;;  %v1421_v52 = vrot.slane %v1420_v35, 2  ;;  %v1468_v48 = vrot.slane %v1467_v30, 4 }
  0xce   :  { %v1461_v26 = vrot.slane %v1460_v32, 4  ;;  %v2988_v4 = vsel %vm873_vm8, 1.0, %v3408_v2  ;;  %vm866_vm13 = vcmp.eq.s32.totalorder %v3958_v28, %v3571_v33  ;;  %vm885_vm2 = vcmp.eq.s32.totalorder %v359_v9, %v3571_v33  ;;  %v4043_v9 = vpop.permute.xlu1 %400  ;;  %v4045_v6 = vpop.permute.xlu0 %372 }
  0xcf   :  { %v4975_v50 = vrot.slane %v3611_v49, %v3456_v20  ;;  %v1409_v10 = vrot.slane %v1408_v51, 1  ;;  %v1380_v61 = vadd.f32 %v1379_v58, %v1378_v54  ;;  %v1385_v55 = vadd.f32 %v1384_v0, %v1383_v47 }
  0xd0   :  { %v1469_v7 = vadd.f32 %v1468_v48, %v1467_v30  ;;  %v4976_v42 = vrot.slane %v3598_v44, %v3460_v23  ;;  %v1462_v38 = vadd.f32 %v1461_v26, %v1460_v32  ;;  %v1390_v40 = vsel %vm1179_vm0, %v2988_v4, 0.0 }
  0xd1   :  { %722 = vbcast.lane.b32.xlu1 %v4975_v50, 256  ;;  %v2981_v21 = vsel %vm866_vm13, 1.0, %v3408_v2  ;;  %v3000_v28 = vsel %vm885_vm2, 1.0, %v3408_v2  ;;  %v4047_v63 = vadd.f32 %v1337_v25, %v1336_v41  ;;  %v1415_v31 = vadd.f32 %v1414_v29, %v1413_v13 }
  0xd2   :  { %673 = vbcast.lane.b32.xlu0 %v4976_v42, 256  ;;  %v1422_v1 = vadd.f32 %v1421_v52, %v1420_v35  ;;  %v1470_v54 = vrot.slane %v1469_v7, 2  ;;  %v1463_v59 = vrot.slane %v1462_v38, 2  ;;  %v1391_v43 = vrot.slane %v1390_v40, 4  ;;  %v4061_v0 = vpop.permute.xlu1 %330  ;;  %v4063_v34 = vpop.permute.xlu0 %407 }
  0xd3   :  { %v1341_v44 = vsel %vm1179_vm0, %v2981_v21, 0.0  ;;  %v1474_v45 = vsel %vm1179_vm0, %v3000_v28, 0.0  ;;  %v4977_v36 = vrot.slane %v3677_v37, %v3431_v3  ;;  %v4054_v47 = vadd.f32 %v1409_v10, %v1408_v51 }
  0xd4   :  { %v1386_v62 = vrot.slane %v1385_v55, 2  ;;  %v1471_v53 = vadd.f32 %v1470_v54, %v1469_v7  ;;  %v1342_v22 = vrot.slane %v1341_v44, 4  ;;  %v4978_v41 = vrot.slane %v3650_v12, %v3444_v11 }
  0xd5   :  { %806 = vbcast.lane.b32.xlu1 %v4977_v36, 256  ;;  %v1381_v13 = vrot.slane %v1380_v61, 1  ;;  %v1392_v35 = vadd.f32 %v1391_v43, %v1390_v40  ;;  %v1475_v58 = vrot.slane %v1474_v45, 4  ;;  %vm878_vm3 = vcmp.eq.s32.totalorder %v3982_v19, %v3571_v33 }
  0xd6   :  { %757 = vbcast.lane.b32.xlu0 %v4978_v41, 256  ;;  %v1339_v3 = vrot.slane %v4047_v63, 1  ;;  %v1416_v51 = vrot.slane %v1415_v31, 1  ;;  %v1464_v30 = vadd.f32 %v1463_v59, %v1462_v38  ;;  %v2993_v32 = vsel %vm878_vm3, 1.0, %v3408_v2  ;;  %v4081_v21 = vpop.permute.xlu1 %414  ;;  %v4083_v28 = vpop.permute.xlu0 %379 }
  0xd7   :  { %v1423_v25 = vrot.slane %v1422_v1, 1  ;;  %v1343_v29 = vadd.f32 %v1342_v22, %v1341_v44  ;;  %v1476_v52 = vadd.f32 %v1475_v58, %v1474_v45  ;;  %v1425_v48 = vsel %vm1179_vm0, %v2993_v32, 0.0 }
  0xd8   :  { %v4979_v26 = vrot.slane %v3650_v12, %v3448_v14  ;;  %v4071_v19 = vadd.f32 %v1386_v62, %v1385_v55  ;;  %v1472_v4 = vrot.slane %v1471_v53, 1  ;;  %v1426_v50 = vrot.slane %v1425_v48, 4 }
  0xd9   :  { %vm879_vm4 = vcmp.eq.s32.totalorder %v4000_v60, %v3571_v33  ;;  %v4980_v10 = vrot.slane %v3611_v49, %v3460_v23  ;;  %v4078_v7 = vadd.f32 %v1381_v13, %v1380_v61  ;;  %v1393_v42 = vrot.slane %v1392_v35, 2 }
  0xda   :  { %764 = vbcast.lane.b32.xlu1 %v4979_v26, 256  ;;  %v1477_v38 = vrot.slane %v1476_v52, 2  ;;  %v2994_v40 = vsel %vm879_vm4, 1.0, %v3408_v2  ;;  %v1417_v55 = vadd.f32 %v1416_v51, %v1415_v31  ;;  %v1465_v54 = vrot.slane %v1464_v30, 1  ;;  %v4099_v13 = vpop.permute.xlu1 %463  ;;  %v4101_v58 = vpop.permute.xlu0 %456 }
  0xdb   :  { %729 = vbcast.lane.b32.xlu0 %v4980_v10, 256  ;;  %v1432_v59 = vsel %vm1179_vm0, %v2994_v40, 0.0  ;;  %vm874_vm6 = vcmp.eq.s32.totalorder %v4002_v15, %v3571_v33  ;;  %v1424_v60 = vadd.f32 %v1423_v25, %v1422_v1  ;;  %v1344_v49 = vrot.slane %v1343_v29, 2 }
  0xdc   :  { %v1427_v43 = vadd.f32 %v1426_v50, %v1425_v48  ;;  %v1433_v61 = vrot.slane %v1432_v59, 4  ;;  %v4981_v44 = vrot.slane %v3650_v12, %v3452_v17  ;;  %v1388_v45 = vrot.slane %v4071_v19, 1 }
  0xdd   :  { %v1473_v36 = vadd.f32 %v1472_v4, %v1471_v53  ;;  %v2989_v62 = vsel %vm874_vm6, 1.0, %v3408_v2  ;;  %vm880_vm7 = vcmp.eq.s32.totalorder %v4026_v5, %v3571_v33  ;;  %v4982_v31 = vrot.slane %v3677_v37, %v3444_v11 }
  0xde   :  { %771 = vbcast.lane.b32.xlu1 %v4981_v44, 256  ;;  %v1394_v15 = vadd.f32 %v1393_v42, %v1392_v35  ;;  %v1478_v1 = vadd.f32 %v1477_v38, %v1476_v52  ;;  %v1434_v22 = vadd.f32 %v1433_v61, %v1432_v59  ;;  %v1397_v41 = vsel %vm1179_vm0, %v2989_v62, 0.0  ;;  %v4117_v42 = vpop.permute.xlu1 %386  ;;  %v4119_v38 = vpop.permute.xlu0 %337 }
  0xdf   :  { %813 = vbcast.lane.b32.xlu0 %v4982_v31, 256  ;;  %v1466_v51 = vadd.f32 %v1465_v54, %v1464_v30  ;;  %v1398_v53 = vrot.slane %v1397_v41, 4  ;;  %v2995_v32 = vsel %vm880_vm7, 1.0, %v3408_v2  ;;  %vm886_vm8 = vcmp.eq.s32.totalorder %v4028_v39, %v3571_v33 }
  0xe0   :  { %v1345_v5 = vadd.f32 %v1344_v49, %v1343_v29  ;;  %v1428_v25 = vrot.slane %v1427_v43, 2  ;;  %v1439_v11 = vsel %vm1179_vm0, %v2995_v32, 0.0  ;;  %v3001_v35 = vsel %vm886_vm8, 1.0, %v3408_v2 }
  0xe1   :  { %v4983_v52 = vrot.slane %v3650_v12, %v3456_v20  ;;  %v1435_v48 = vrot.slane %v1434_v22, 2  ;;  %v1399_v26 = vadd.f32 %v1398_v53, %v1397_v41  ;;  %v1440_v4 = vrot.slane %v1439_v11, 4 }
  0xe2   :  { %v1481_v30 = vsel %vm1179_vm0, %v3001_v35, 0.0  ;;  %v4984_v50 = vrot.slane %v3677_v37, %v3448_v14  ;;  %v1395_v39 = vrot.slane %v1394_v15, 1  ;;  %v1479_v29 = vrot.slane %v1478_v1, 1  ;;  %v4141_v32 = vpop.permute.xlu1 %470  ;;  %v4143_v12 = vpop.permute.xlu0 %421 }
  0xe3   :  { %778 = vbcast.lane.b32.xlu1 %v4983_v52, 256  ;;  %v1482_v10 = vrot.slane %v1481_v30, 4  ;;  %vm891_vm13 = vcmp.eq.s32.totalorder %v4043_v9, %v3571_v33  ;;  %v1340_v40 = vadd.f32 %v1339_v3, %v4047_v63  ;;  %v1400_v54 = vrot.slane %v1399_v26, 2 }
  0xe4   :  { %820 = vbcast.lane.b32.xlu0 %v4984_v50, 256  ;;  %v1441_v59 = vadd.f32 %v1440_v4, %v1439_v11  ;;  %v3006_v49 = vsel %vm891_vm13, 1.0, %v3408_v2  ;;  %v2111_v14 = vsel %vm2076_vm11, %v1417_v55, %v4054_v47  ;;  %v1346_v61 = vrot.slane %v1345_v5, 1 }
  0xe5   :  { %v1516_v44 = vsel %vm1179_vm0, %v3006_v49, 0.0  ;;  %vm887_vm2 = vcmp.eq.s32.totalorder %v4045_v6, %v3571_v33  ;;  %v4132_v9 = vsel %vm2078_vm5, %v1424_v60, %v2111_v14  ;;  %v1429_v63 = vadd.f32 %v1428_v25, %v1427_v43 }
  0xe6   :  { %v1436_v3 = vadd.f32 %v1435_v48, %v1434_v22  ;;  %v1483_v62 = vadd.f32 %v1482_v10, %v1481_v30  ;;  %v4985_v31 = vrot.slane %v3677_v37, %v3452_v17  ;;  %v1389_v47 = vadd.f32 %v1388_v45, %v4071_v19 }
  0xe7   :  { %785 = vbcast.lane.b32.xlu1 %v783_v46, 256  ;;  %v2118_v55 = vsel %vm2076_vm11, %v1473_v36, %v1466_v51  ;;  %v4139_v41 = vadd.f32 %v1395_v39, %v1394_v15  ;;  %v1480_v53 = vadd.f32 %v1479_v29, %v1478_v1  ;;  %v1401_v46 = vadd.f32 %v1400_v54, %v1399_v26  ;;  %v4168_v51 = vpop.permute.xlu0 %393 }
  0xe8   :  { %827 = vbcast.lane.b32.xlu0 %v4985_v31, 256  ;;  %v1442_v60 = vrot.slane %v1441_v59, 2  ;;  %v1517_v43 = vrot.slane %v1516_v44, 4  ;;  %v3002_v17 = vsel %vm887_vm2, 1.0, %v3408_v2  ;;  %v1347_v22 = vadd.f32 %v1346_v61, %v1345_v5 }
  0xe9   :  { %v2099_v19 = vsel %vm2080_vm9, %v3979_v16, %v3977_v8  ;;  %vm881_vm3 = vcmp.eq.s32.totalorder %v4061_v0, %v3571_v33  ;;  %vm892_vm4 = vcmp.eq.s32.totalorder %v4063_v34, %v3571_v33  ;;  %v1430_v45 = vrot.slane %v1429_v63, 1  ;;  %v4166_v34 = vpop.permute.xlu1 %428 }
  0xea   :  { %v1437_v36 = vrot.slane %v1436_v3, 1  ;;  %v1484_v15 = vrot.slane %v1483_v62, 2  ;;  %v2100_v6 = vsel %vm2082_vm10, %v4004_v57, %v2099_v19  ;;  %v1488_v1 = vsel %vm1179_vm0, %v3002_v17, 0.0 }
  0xeb   :  { %841 = vbcast.lane.b32.xlu1 %v839_v56, 256  ;;  %v2101_v8 = vsel %vm2084_vm12, %v4015_v24, %v2100_v6  ;;  %v2996_v16 = vsel %vm881_vm3, 1.0, %v3408_v2  ;;  %v3007_v0 = vsel %vm892_vm4, 1.0, %v3408_v2  ;;  %v1402_v23 = vrot.slane %v1401_v46, 1  ;;  %v4188_v39 = vpop.permute.xlu0 %477 }
  0xec   :  { %v1443_v37 = vadd.f32 %v1442_v60, %v1441_v59  ;;  %v1518_v56 = vadd.f32 %v1517_v43, %v1516_v44  ;;  %v2102_v5 = vsel %vm2086_vm14, %v1340_v40, %v2101_v8  ;;  %v4172_v57 = vsel %vm2078_vm5, %v1480_v53, %v2118_v55 }
  0xed   :  { %v2103_v25 = vsel %vm2088_vm15, %v1347_v22, %v2102_v5  ;;  %v1446_v24 = vsel %vm1179_vm0, %v2996_v16, 0.0  ;;  %v1523_v11 = vsel %vm1179_vm0, %v3007_v0, 0.0  ;;  %v4177_v35 = vadd.f32 %v1430_v45, %v1429_v63  ;;  %v4186_v50 = vpop.permute.xlu1 %435 }
  0xee   :  { %v1489_v52 = vrot.slane %v1488_v1, 4  ;;  %3184 = vmatprep.mubr.msk.f32.mxu0 %vm2181_vm1, %v2103_v25  ;;  %v1447_v48 = vrot.slane %v1446_v24, 4  ;;  %v1524_v26 = vrot.slane %v1523_v11, 4  ;;  %v4180_v4 = vadd.f32 %v1437_v36, %v1436_v3 }
  0xef   :  { %v1485_v30 = vadd.f32 %v1484_v15, %v1483_v62  ;;  %vm893_vm6 = vcmp.eq.s32.totalorder %v4081_v21, %v3571_v33  ;;  %vm888_vm7 = vcmp.eq.s32.totalorder %v4083_v28, %v3571_v33  ;;  %v1444_v29 = vrot.slane %v1443_v37, 1 }
  0xf0   :  { %v1519_v10 = vrot.slane %v1518_v56, 2  ;;  %v1525_v40 = vadd.f32 %v1524_v26, %v1523_v11  ;;  %v1403_v54 = vadd.f32 %v1402_v23, %v1401_v46  ;;  %v3008_v59 = vsel %vm893_vm6, 1.0, %v3408_v2 }
  0xf1   :  { %v3003_v49 = vsel %vm888_vm7, 1.0, %v3408_v2  ;;  %v2106_v14 = vsel %vm2080_vm9, %v4020_v27, %v4007_v18  ;;  %vm900_vm8 = vcmp.eq.s32.totalorder %v4099_v13, %v3571_v33  ;;  %v1490_v21 = vadd.f32 %v1489_v52, %v1488_v1  ;;  %v4203_v55 = vpop.permute.xlu1 %512  ;;  %v4205_v18 = vpop.permute.xlu0 %484 }
  0xf2   :  { %v1448_v28 = vadd.f32 %v1447_v48, %v1446_v24  ;;  %v1530_v61 = vsel %vm1179_vm0, %v3008_v59, 0.0  ;;  %v2107_v44 = vsel %vm2082_vm10, %v4078_v7, %v2106_v14  ;;  %v1495_v3 = vsel %vm1179_vm0, %v3003_v49, 0.0 }
  0xf3   :  { %v1531_v63 = vrot.slane %v1530_v61, 4  ;;  %v2108_v62 = vsel %vm2084_vm12, %v1389_v47, %v2107_v44  ;;  %v3015_v31 = vsel %vm900_vm8, 1.0, %v3408_v2  ;;  %v1520_v27 = vadd.f32 %v1519_v10, %v1518_v56 }
  0xf4   :  { %v1526_v13 = vrot.slane %v1525_v40, 2  ;;  %v1496_v53 = vrot.slane %v1495_v3, 4  ;;  %v2109_v46 = vsel %vm2086_vm14, %v4139_v41, %v2108_v62  ;;  %v1579_v43 = vsel %vm1179_vm0, %v3015_v31, 0.0 }
  0xf5   :  { %v1532_v60 = vadd.f32 %v1531_v63, %v1530_v61  ;;  %v2110_v7 = vsel %vm2088_vm15, %v1403_v54, %v2109_v46  ;;  %vm899_vm13 = vcmp.eq.s32.totalorder %v4101_v58, %v3571_v33  ;;  %v1491_v47 = vrot.slane %v1490_v21, 2  ;;  %v4219_v41 = vpop.permute.xlu1 %442  ;;  %v4221_v15 = vpop.permute.xlu0 %519 }
  0xf6   :  { %v1449_v17 = vrot.slane %v1448_v28, 2  ;;  %v1497_v22 = vadd.f32 %v1496_v53, %v1495_v3  ;;  %3185 = vmatmul.mubr.msk.f32.gmra.mrb[2].mxu0 %vm2181_vm1, %v2110_v7  ;;  %v1580_v19 = vrot.slane %v1579_v43, 4  ;;  %v1486_v45 = vrot.slane %v1485_v30, 1 }
  0xf7   :  { %v3014_v36 = vsel %vm899_vm13, 1.0, %v3408_v2  ;;  %vm889_vm2 = vcmp.eq.s32.totalorder %v4117_v42, %v3571_v33  ;;  %vm882_vm3 = vcmp.eq.s32.totalorder %v4119_v38, %v3571_v33  ;;  %v4223_v58 = vadd.f32 %v1444_v29, %v1443_v37 }
  0xf8   :  { %v1521_v6 = vrot.slane %v1520_v27, 1  ;;  %v1527_v1 = vadd.f32 %v1526_v13, %v1525_v40  ;;  %v1533_v8 = vrot.slane %v1532_v60, 2  ;;  %v1498_v16 = vrot.slane %v1497_v22, 2 }
  0xf9   :  { %v1572_v0 = vsel %vm1179_vm0, %v3014_v36, 0.0  ;;  %v3004_v23 = vsel %vm889_vm2, 1.0, %v3408_v2  ;;  %v2997_v56 = vsel %vm882_vm3, 1.0, %v3408_v2  ;;  %v1492_v42 = vadd.f32 %v1491_v47, %v1490_v21  ;;  %v4234_v52 = vpop.permute.xlu1 %526  ;;  %v4236_v40 = vpop.permute.xlu0 %491 }
  0xfa   :  { %v1450_v5 = vadd.f32 %v1449_v17, %v1448_v28  ;;  %v1581_v25 = vadd.f32 %v1580_v19, %v1579_v43  ;;  %v1573_v38 = vrot.slane %v1572_v0, 4  ;;  %v4228_v24 = vadd.f32 %v1486_v45, %v1485_v30 }
  0xfb   :  { %v1502_v11 = vsel %vm1179_vm0, %v3004_v23, 0.0  ;;  %v1453_v37 = vsel %vm1179_vm0, %v2997_v56, 0.0  ;;  %vm901_vm4 = vcmp.eq.s32.totalorder %v4141_v32, %v3571_v33  ;;  %v1528_v48 = vrot.slane %v1527_v1, 1 }
  0xfc   :  { %v1534_v26 = vadd.f32 %v1533_v8, %v1532_v60  ;;  %v1574_v29 = vadd.f32 %v1573_v38, %v1572_v0  ;;  %v1503_v10 = vrot.slane %v1502_v11, 4  ;;  %v1499_v54 = vadd.f32 %v1498_v16, %v1497_v22 }
  0xfd   :  { %v1454_v59 = vrot.slane %v1453_v37, 4  ;;  %v3016_v30 = vsel %vm901_vm4, 1.0, %v3408_v2  ;;  %vm894_vm6 = vcmp.eq.s32.totalorder %v4143_v12, %v3571_v33  ;;  %v1522_v49 = vadd.f32 %v1521_v6, %v1520_v27  ;;  %v4243_v3 = vpop.permute.xlu1 %575  ;;  %v3394_v12 = vld [vmem:[%s4959_s0 + $0x68] sm:$0xff]  ;;  %v4252_v22 = vpop.permute.xlu0 %568 }
  0xfe   :  { %v1493_v14 = vrot.slane %v1492_v42, 1  ;;  %v1451_v21 = vrot.slane %v1450_v5, 1  ;;  %v1582_v28 = vrot.slane %v1581_v25, 2  ;;  %v1575_v32 = vrot.slane %v1574_v29, 2 }
  0xff   :  { %v1455_v61 = vadd.f32 %v1454_v59, %v1453_v37  ;;  %v1586_v44 = vsel %vm1179_vm0, %v3016_v30, 0.0  ;;  %v3009_v63 = vsel %vm894_vm6, 1.0, %v3408_v2  ;;  %v1529_v62 = vadd.f32 %v1528_v48, %v1527_v1 }
 0x100   :  { %v1535_v31 = vrot.slane %v1534_v26, 1  ;;  %v1504_v13 = vadd.f32 %v1503_v10, %v1502_v11  ;;  %v1587_v53 = vrot.slane %v1586_v44, 4  ;;  %v1500_v46 = vrot.slane %v1499_v54, 1 }
 0x101   :  { %v1537_v60 = vsel %vm1179_vm0, %v3009_v63, 0.0  ;;  %v832_v27 = vrot.slane %v3394_v12, %v3456_v20  ;;  %vm895_vm7 = vcmp.eq.s32.totalorder %v4166_v34, %v3571_v33  ;;  %v1583_v7 = vadd.f32 %v1582_v28, %v1581_v25  ;;  %v4266_v23 = vpop.permute.xlu1 %498  ;;  %v4273_v10 = vpop.permute.xlu0 %449 }
 0x102   :  { %v1456_v43 = vrot.slane %v1455_v61, 2  ;;  %v1588_v47 = vadd.f32 %v1587_v53, %v1586_v44  ;;  %v1538_v17 = vrot.slane %v1537_v60, 4  ;;  %v1576_v19 = vadd.f32 %v1575_v32, %v1574_v29 }
 0x103   :  { %834 = vbcast.lane.b32.xlu0 %v832_v27, 256  ;;  %v3010_v45 = vsel %vm895_vm7, 1.0, %v3408_v2  ;;  %vm890_vm8 = vcmp.eq.s32.totalorder %v4168_v51, %v3571_v33  ;;  %vm896_vm13 = vcmp.eq.s32.totalorder %v4186_v50, %v3571_v33  ;;  %v4259_v20 = vadd.f32 %v1493_v14, %v1492_v42 }
 0x104   :  { %v4261_v36 = vadd.f32 %v1451_v21, %v1450_v5  ;;  %v1505_v34 = vrot.slane %v1504_v13, 2  ;;  %v1539_v6 = vadd.f32 %v1538_v17, %v1537_v60  ;;  %v1536_v1 = vadd.f32 %v1535_v31, %v1534_v26 }
 0x105   :  { %v1544_v8 = vsel %vm1179_vm0, %v3010_v45, 0.0  ;;  %v3005_v16 = vsel %vm890_vm8, 1.0, %v3408_v2  ;;  %v3011_v0 = vsel %vm896_vm13, 1.0, %v3408_v2  ;;  %v2125_v51 = vsel %vm2076_vm11, %v1529_v62, %v1522_v49  ;;  %v4287_v44 = vpop.permute.xlu1 %582 }
 0x106   :  { %v1457_v56 = vadd.f32 %v1456_v43, %v1455_v61  ;;  %v1589_v25 = vrot.slane %v1588_v47, 2  ;;  %v1540_v50 = vrot.slane %v1539_v6, 2  ;;  %v4269_v42 = vadd.f32 %v1500_v46, %v1499_v54  ;;  %v4292_v43 = vpop.permute.xlu0 %533 }
 0x107   :  { %v1584_v5 = vrot.slane %v1583_v7, 1  ;;  %v1577_v38 = vrot.slane %v1576_v19, 1  ;;  %v1509_v11 = vsel %vm1179_vm0, %v3005_v16, 0.0  ;;  %v1506_v37 = vadd.f32 %v1505_v34, %v1504_v13 }
 0x108   :  { %v1545_v48 = vrot.slane %v1544_v8, 4  ;;  %v1510_v26 = vrot.slane %v1509_v11, 4  ;;  %v1551_v29 = vsel %vm1179_vm0, %v3011_v0, 0.0  ;;  %v4276_v59 = vsel %vm2078_vm5, %v1536_v1, %v2125_v51 }
 0x109   :  { %vm902_vm2 = vcmp.eq.s32.totalorder %v4188_v39, %v3571_v33  ;;  %vm907_vm3 = vcmp.eq.s32.totalorder %v4203_v55, %v3571_v33  ;;  %vm903_vm4 = vcmp.eq.s32.totalorder %v4205_v18, %v3571_v33  ;;  %v1458_v54 = vrot.slane %v1457_v56, 1 }
 0x10a   :  { %v1590_v30 = vadd.f32 %v1589_v25, %v1588_v47  ;;  %v1541_v49 = vadd.f32 %v1540_v50, %v1539_v6  ;;  %v1511_v14 = vadd.f32 %v1510_v26, %v1509_v11  ;;  %v1552_v21 = vrot.slane %v1551_v29, 4 }
 0x10b   :  { %v3017_v28 = vsel %vm902_vm2, 1.0, %v3408_v2  ;;  %v3022_v32 = vsel %vm907_vm3, 1.0, %v3408_v2  ;;  %v3018_v61 = vsel %vm903_vm4, 1.0, %v3408_v2  ;;  %v1585_v39 = vadd.f32 %v1584_v5, %v1583_v7 }
 0x10c   :  { %v1578_v63 = vadd.f32 %v1577_v38, %v1576_v19  ;;  %v1507_v62 = vrot.slane %v1506_v37, 1  ;;  %v1546_v55 = vadd.f32 %v1545_v48, %v1544_v8  ;;  %v1512_v31 = vrot.slane %v1511_v14, 2 }
 0x10d   :  { %v1593_v18 = vsel %vm1179_vm0, %v3017_v28, 0.0  ;;  %v1628_v13 = vsel %vm1179_vm0, %v3022_v32, 0.0  ;;  %v1600_v53 = vsel %vm1179_vm0, %v3018_v61, 0.0  ;;  %v1459_v46 = vadd.f32 %v1458_v54, %v1457_v56  ;;  %v4302_v56 = vpop.permute.xlu1 %540 }
 0x10e   :  { %v1591_v60 = vrot.slane %v1590_v30, 1  ;;  %v1542_v12 = vrot.slane %v1541_v49, 1  ;;  %v1594_v27 = vrot.slane %v1593_v18, 4  ;;  %v1553_v47 = vadd.f32 %v1552_v21, %v1551_v29 }
 0x10f   :  { %v1629_v17 = vrot.slane %v1628_v13, 4  ;;  %v1601_v45 = vrot.slane %v1600_v53, 4  ;;  %v2113_v7 = vsel %vm2080_vm9, %v4177_v35, %v4132_v9  ;;  %v2132_v19 = vsel %vm2076_vm11, %v1585_v39, %v1578_v63 }
 0x110   :  { %v1547_v34 = vrot.slane %v1546_v55, 2  ;;  %v1595_v6 = vadd.f32 %v1594_v27, %v1593_v18  ;;  %v2114_v1 = vsel %vm2082_vm10, %v4180_v4, %v2113_v7  ;;  %v1508_v8 = vadd.f32 %v1507_v62, %v1506_v37  ;;  %v4315_v37 = vpop.permute.xlu0 %505 }
 0x111   :  { %v1513_v16 = vadd.f32 %v1512_v31, %v1511_v14  ;;  %v1630_v0 = vadd.f32 %v1629_v17, %v1628_v13  ;;  %v2115_v51 = vsel %vm2084_vm12, %v4223_v58, %v2114_v1  ;;  %v1592_v25 = vadd.f32 %v1591_v60, %v1590_v30  ;;  %v4323_v28 = vpop.permute.xlu1 %547 }
 0x112   :  { %v1543_v50 = vadd.f32 %v1542_v12, %v1541_v49  ;;  %v1602_v5 = vadd.f32 %v1601_v45, %v1600_v53  ;;  %v2116_v9 = vsel %vm2086_vm14, %v4261_v36, %v2115_v51  ;;  %v1554_v35 = vrot.slane %v1553_v47, 2 }
 0x113   :  { %v1596_v38 = vrot.slane %v1595_v6, 2  ;;  %v2117_v11 = vsel %vm2088_vm15, %v1459_v46, %v2116_v9  ;;  %vm897_vm6 = vcmp.eq.s32.totalorder %v4219_v41, %v3571_v33  ;;  %v1548_v4 = vadd.f32 %v1547_v34, %v1546_v55 }
 0x114   :  { %3187 = vmatprep.mubr.msk.f32.mxu0 %vm2181_vm1, %v2117_v11  ;;  %v3012_v58 = vsel %vm897_vm6, 1.0, %v3408_v2  ;;  %vm908_vm7 = vcmp.eq.s32.totalorder %v4221_v15, %v3571_v33  ;;  %vm909_vm8 = vcmp.eq.s32.totalorder %v4234_v52, %v3571_v33  ;;  %v1514_v36 = vrot.slane %v1513_v16, 1  ;;  %v4333_v60 = vpop.permute.xlu0 %589 }
 0x115   :  { %v1631_v48 = vrot.slane %v1630_v0, 2  ;;  %v1558_v26 = vsel %vm1179_vm0, %v3012_v58, 0.0  ;;  %v3023_v29 = vsel %vm908_vm7, 1.0, %v3408_v2  ;;  %v1603_v41 = vrot.slane %v1602_v5, 2  ;;  %v4346_v1 = vpop.permute.xlu1 %624 }
 0x116   :  { %v1559_v54 = vrot.slane %v1558_v26, 4  ;;  %v1635_v30 = vsel %vm1179_vm0, %v3023_v29, 0.0  ;;  %v3024_v49 = vsel %vm909_vm8, 1.0, %v3408_v2  ;;  %v2133_v14 = vsel %vm2078_vm5, %v1592_v25, %v2132_v19 }
 0x117   :  { %v1597_v15 = vadd.f32 %v1596_v38, %v1595_v6  ;;  %v1636_v21 = vrot.slane %v1635_v30, 4  ;;  %v1642_v52 = vsel %vm1179_vm0, %v3024_v49, 0.0  ;;  %v4327_v32 = vsel %vm2080_vm9, %v1543_v50, %v4276_v59 }
 0x118   :  { %v1555_v61 = vadd.f32 %v1554_v35, %v1553_v47  ;;  %v1643_v39 = vrot.slane %v1642_v52, 4  ;;  %vm904_vm13 = vcmp.eq.s32.totalorder %v4236_v40, %v3571_v33  ;;  %v1549_v63 = vrot.slane %v1548_v4, 1  ;;  %v4356_v9 = vpop.permute.xlu0 %596 }
 0x119   :  { %v1560_v62 = vadd.f32 %v1559_v54, %v1558_v26  ;;  %v1637_v55 = vadd.f32 %v1636_v21, %v1635_v30  ;;  %v3019_v31 = vsel %vm904_vm13, 1.0, %v3408_v2  ;;  %v1515_v18 = vadd.f32 %v1514_v36, %v1513_v16  ;;  %v4372_v29 = vpop.permute.xlu1 %554 }
 0x11a   :  { %v1632_v13 = vadd.f32 %v1631_v48, %v1630_v0  ;;  %v1604_v53 = vadd.f32 %v1603_v41, %v1602_v5  ;;  %v1607_v46 = vsel %vm1179_vm0, %v3019_v31, 0.0  ;;  %v1598_v12 = vrot.slane %v1597_v15, 1 }
 0x11b   :  { %v1644_v59 = vadd.f32 %v1643_v39, %v1642_v52  ;;  %v2120_v27 = vsel %vm2080_vm9, %v4228_v24, %v4172_v57  ;;  %vm916_vm2 = vcmp.eq.s32.totalorder %v4243_v3, %v3571_v33  ;;  %v1638_v40 = vrot.slane %v1637_v55, 2 }
 0x11c   :  { %v1608_v47 = vrot.slane %v1607_v46, 4  ;;  %v2121_v17 = vsel %vm2082_vm10, %v4259_v20, %v2120_v27  ;;  %v3031_v45 = vsel %vm916_vm2, 1.0, %v3408_v2  ;;  %v1556_v7 = vrot.slane %v1555_v61, 1 }
 0x11d   :  { %v1561_v19 = vrot.slane %v1560_v62, 2  ;;  %v2122_v34 = vsel %vm2084_vm12, %v4269_v42, %v2121_v17  ;;  %v1691_v6 = vsel %vm1179_vm0, %v3031_v45, 0.0  ;;  %v4348_v57 = vadd.f32 %v1549_v63, %v1548_v4 }
 0x11e   :  { %v1633_v24 = vrot.slane %v1632_v13, 1  ;;  %v2123_v3 = vsel %vm2086_vm14, %v1508_v8, %v2122_v34  ;;  %v1692_v16 = vrot.slane %v1691_v6, 4  ;;  %v1599_v0 = vadd.f32 %v1598_v12, %v1597_v15 }
 0x11f   :  { %v1605_v51 = vrot.slane %v1604_v53, 1  ;;  %v2124_v20 = vsel %vm2088_vm15, %v1515_v18, %v2123_v3  ;;  %vm915_vm3 = vcmp.eq.s32.totalorder %v4252_v22, %v3571_v33  ;;  %v1639_v25 = vadd.f32 %v1638_v40, %v1637_v55  ;;  %v3395_v55 = vld [vmem:[%s4959_s0 + $0x8] sm:$0xff] }
 0x120   :  { %v1645_v50 = vrot.slane %v1644_v59, 2  ;;  %v1609_v42 = vadd.f32 %v1608_v47, %v1607_v46  ;;  %3188 = vmatmul.mubr.msk.f32.gmra.mrb[4].mxu0 %vm2181_vm1, %v2124_v20  ;;  %v3030_v5 = vsel %vm915_vm3, 1.0, %v3408_v2  ;;  %v4358_v35 = vadd.f32 %v1556_v7, %v1555_v61  ;;  %v4380_v61 = vpop.permute.xlu0 %631 }
 0x121   :  { %v1562_v8 = vadd.f32 %v1561_v19, %v1560_v62  ;;  %v1684_v38 = vsel %vm1179_vm0, %v3030_v5, 0.0  ;;  %vm905_vm4 = vcmp.eq.s32.totalorder %v4266_v23, %v3571_v33  ;;  %v1634_v11 = vadd.f32 %v1633_v24, %v1632_v13 }
 0x122   :  { %v1693_v4 = vadd.f32 %v1692_v16, %v1691_v6  ;;  %v1685_v22 = vrot.slane %v1684_v38, 4  ;;  %v3020_v58 = vsel %vm905_vm4, 1.0, %v3408_v2  ;;  %v4365_v36 = vsel %vm2080_vm9, %v1599_v0, %v2133_v14 }
 0x123   :  { %v4367_v48 = vadd.f32 %v1605_v51, %v1604_v53  ;;  %v1614_v26 = vsel %vm1179_vm0, %v3020_v58, 0.0  ;;  %vm898_vm6 = vcmp.eq.s32.totalorder %v4273_v10, %v3571_v33  ;;  %v1640_v41 = vrot.slane %v1639_v25, 1 }
 0x124   :  { %v1646_v54 = vadd.f32 %v1645_v50, %v1644_v59  ;;  %v1610_v23 = vrot.slane %v1609_v42, 2  ;;  %v1686_v30 = vadd.f32 %v1685_v22, %v1684_v38  ;;  %v1563_v49 = vrot.slane %v1562_v8, 1  ;;  %v4390_v59 = vpop.permute.xlu1 %638  ;;  %v4398_v3 = vpop.permute.xlu0 %603 }
 0x125   :  { %v3013_v15 = vsel %vm898_vm6, 1.0, %v3408_v2  ;;  %vm917_vm7 = vcmp.eq.s32.totalorder %v4287_v44, %v3571_v33  ;;  %vm910_vm8 = vcmp.eq.s32.totalorder %v4292_v43, %v3571_v33  ;;  %v1694_v14 = vrot.slane %v1693_v4, 2 }
 0x126   :  { %v1687_v21 = vrot.slane %v1686_v30, 2  ;;  %v1615_v52 = vrot.slane %v1614_v26, 4  ;;  %v1565_v10 = vsel %vm1179_vm0, %v3013_v15, 0.0  ;;  %v3032_v63 = vsel %vm917_vm7, 1.0, %v3408_v2 }
 0x127   :  { %v1566_v39 = vrot.slane %v1565_v10, 4  ;;  %v3025_v62 = vsel %vm910_vm8, 1.0, %v3408_v2  ;;  %vm2342_vm13 = vcmp.ne.s32.totalorder %v3395_v55, 0  ;;  %v1641_v44 = vadd.f32 %v1640_v41, %v1639_v25 }
 0x128   :  { %v1647_v31 = vrot.slane %v1646_v54, 1  ;;  %v1611_v43 = vadd.f32 %v1610_v23, %v1609_v42  ;;  %v1698_v18 = vsel %vm1179_vm0, %v3032_v63, 0.0  ;;  %v1649_v46 = vsel %vm1179_vm0, %v3025_v62, 0.0  ;;  %v4407_v38 = vpop.permute.xlu1 %687 }
 0x129   :  { %v1567_v13 = vadd.f32 %v1566_v39, %v1565_v10  ;;  %v1699_v53 = vrot.slane %v1698_v18, 4  ;;  %v3084_v12 = vsel %vm2342_vm13, 1.0, %v3408_v2  ;;  %v1695_v27 = vadd.f32 %v1694_v14, %v1693_v4 }
 0x12a   :  { %v1616_v40 = vadd.f32 %v1615_v52, %v1614_v26  ;;  %v1650_v47 = vrot.slane %v1649_v46, 4  ;;  %vm2381_vm2 = vcmask 48128   ;;  %v1688_v17 = vadd.f32 %v1687_v21, %v1686_v30 }
 0x12b   :  { %v1700_v45 = vadd.f32 %v1699_v53, %v1698_v18  ;;  %v2382_v7 = vsel %vm2381_vm2, %v3084_v12, 0.0  ;;  %vm911_vm3 = vcmp.eq.s32.totalorder %v4302_v56, %v3571_v33  ;;  %v4395_v19 = vadd.f32 %v1563_v49, %v1562_v8 }
 0x12c   :  { %v1568_v34 = vrot.slane %v1567_v13, 2  ;;  %v1651_v6 = vadd.f32 %v1650_v47, %v1649_v46  ;;  %2383 = vadd.xlane.f32.xlu0 %v2382_v7  ;;  %v3026_v24 = vsel %vm911_vm3, 1.0, %v3408_v2  ;;  %v2139_v16 = vsel %vm2076_vm11, %v1641_v44, %v1634_v11 }
 0x12d   :  { %v1648_v0 = vadd.f32 %v1647_v31, %v1646_v54  ;;  %v1656_v51 = vsel %vm1179_vm0, %v3026_v24, 0.0  ;;  %vm906_vm4 = vcmp.eq.s32.totalorder %v4315_v37, %v3571_v33  ;;  %v1612_v20 = vrot.slane %v1611_v43, 1 }
 0x12e   :  { %v1696_v25 = vrot.slane %v1695_v27, 1  ;;  %v1617_v56 = vrot.slane %v1616_v40, 2  ;;  %v1657_v50 = vrot.slane %v1656_v51, 4  ;;  %v1689_v42 = vrot.slane %v1688_v17, 1 }
 0x12f   :  { %v1701_v5 = vrot.slane %v1700_v45, 2  ;;  %v3021_v8 = vsel %vm906_vm4, 1.0, %v3408_v2  ;;  %vm912_vm6 = vcmp.eq.s32.totalorder %v4323_v28, %v3571_v33  ;;  %v1569_v11 = vadd.f32 %v1568_v34, %v1567_v13  ;;  %v4417_v28 = vpop.permute.xlu0 %680 }
 0x130   :  { %v1652_v4 = vrot.slane %v1651_v6, 2  ;;  %v1621_v22 = vsel %vm1179_vm0, %v3021_v8, 0.0  ;;  %v3027_v58 = vsel %vm912_vm6, 1.0, %v3408_v2  ;;  %v4412_v37 = vsel %vm2078_vm5, %v1648_v0, %v2139_v16 }
 0x131   :  { %v1658_v26 = vadd.f32 %v1657_v50, %v1656_v51  ;;  %v1622_v41 = vrot.slane %v1621_v22, 4  ;;  %v1663_v54 = vsel %vm1179_vm0, %v3027_v58, 0.0  ;;  %v1697_v23 = vadd.f32 %v1696_v25, %v1695_v27 }
 0x132   :  { %v1618_v30 = vadd.f32 %v1617_v56, %v1616_v40  ;;  %v1664_v49 = vrot.slane %v1663_v54, 4  ;;  %vm918_vm7 = vcmp.eq.s32.totalorder %v4333_v60, %v3571_v33  ;;  %v1702_v15 = vadd.f32 %v1701_v5, %v1700_v45  ;;  %v4424_v60 = vpop.permute.xlu1 %610 }
 0x133   :  { %v1623_v14 = vadd.f32 %v1622_v41, %v1621_v22  ;;  %v3033_v21 = vsel %vm918_vm7, 1.0, %v3408_v2  ;;  %vm923_vm8 = vcmp.eq.s32.totalorder %v4346_v1, %v3571_v33  ;;  %v1690_v52 = vadd.f32 %v1689_v42, %v1688_v17  ;;  %v4433_v7 = vpop.permute.xlu0 %561 }
 0x134   :  { %v1570_v10 = vrot.slane %v1569_v11, 1  ;;  %v1653_v39 = vadd.f32 %v1652_v4, %v1651_v6  ;;  %v1705_v63 = vsel %vm1179_vm0, %v3033_v21, 0.0  ;;  %v1659_v62 = vrot.slane %v1658_v26, 2 }
 0x135   :  { %v1665_v55 = vadd.f32 %v1664_v49, %v1663_v54  ;;  %v1706_v44 = vrot.slane %v1705_v63, 4  ;;  %v3038_v31 = vsel %vm923_vm8, 1.0, %v3408_v2  ;;  %v4426_v18 = vadd.f32 %v1612_v20, %v1611_v43 }
 0x136   :  { %v1619_v13 = vrot.slane %v1618_v30, 1  ;;  %v1624_v53 = vrot.slane %v1623_v14, 2  ;;  %v1740_v46 = vsel %vm1179_vm0, %v3038_v31, 0.0  ;;  %v1703_v12 = vrot.slane %v1702_v15, 1  ;;  %v4445_v50 = vpop.permute.xlu1 %694 }
 0x137   :  { %v1707_v1 = vadd.f32 %v1706_v44, %v1705_v63  ;;  %v1741_v27 = vrot.slane %v1740_v46, 4  ;;  %vm919_vm13 = vcmp.eq.s32.totalorder %v4356_v9, %v3571_v33  ;;  %v2146_v40 = vsel %vm2076_vm11, %v1697_v23, %v1690_v52  ;;  %v4456_v22 = vpop.permute.xlu0 %645 }
 0x138   :  { %v1571_v47 = vadd.f32 %v1570_v10, %v1569_v11  ;;  %v1654_v17 = vrot.slane %v1653_v39, 1  ;;  %v3034_v45 = vsel %vm919_vm13, 1.0, %v3408_v2  ;;  %v1660_v43 = vadd.f32 %v1659_v62, %v1658_v26 }
 0x139   :  { %v1666_v34 = vrot.slane %v1665_v55, 2  ;;  %v1712_v6 = vsel %vm1179_vm0, %v3034_v45, 0.0  ;;  %v2128_v24 = vsel %vm2082_vm10, %v4348_v57, %v4327_v32  ;;  %v1620_v16 = vadd.f32 %v1619_v13, %v1618_v30 }
 0x13a   :  { %v1625_v0 = vadd.f32 %v1624_v53, %v1623_v14  ;;  %v2129_v9 = vsel %vm2084_vm12, %v4358_v35, %v2128_v24  ;;  %vm913_vm3 = vcmp.eq.s32.totalorder %v4372_v29, %v3571_v33  ;;  %v1704_v51 = vadd.f32 %v1703_v12, %v1702_v15  ;;  %v4468_v21 = vpop.permute.xlu1 %652 }
 0x13b   :  { %v1708_v20 = vrot.slane %v1707_v1, 2  ;;  %v1742_v25 = vadd.f32 %v1741_v27, %v1740_v46  ;;  %v2130_v56 = vsel %vm2086_vm14, %v4395_v19, %v2129_v9  ;;  %v1655_v42 = vadd.f32 %v1654_v17, %v1653_v39  ;;  %v4481_v53 = vpop.permute.xlu0 %617 }
 0x13c   :  { %v1713_v5 = vrot.slane %v1712_v6, 4  ;;  %v2131_v32 = vsel %vm2088_vm15, %v1571_v47, %v2130_v56  ;;  %v3028_v57 = vsel %vm913_vm3, 1.0, %v3408_v2  ;;  %v1661_v8 = vrot.slane %v1660_v43, 1 }
 0x13d   :  { %v1667_v11 = vadd.f32 %v1666_v34, %v1665_v55  ;;  %3190 = vmatprep.mubr.msk.f32.mxu0 %vm2181_vm1, %v2131_v32  ;;  %v1670_v35 = vsel %vm1179_vm0, %v3028_v57, 0.0  ;;  %vm924_vm4 = vcmp.eq.s32.totalorder %v4380_v61, %v3571_v33  ;;  %v1626_v29 = vrot.slane %v1625_v0, 1 }
 0x13e   :  { %v1671_v4 = vrot.slane %v1670_v35, 4  ;;  %v3039_v19 = vsel %vm924_vm4, 1.0, %v3408_v2  ;;  %vm925_vm6 = vcmp.eq.s32.totalorder %v4390_v59, %v3571_v33  ;;  %v1709_v58 = vadd.f32 %v1708_v20, %v1707_v1 }
 0x13f   :  { %v1743_v26 = vrot.slane %v1742_v25, 2  ;;  %v1747_v41 = vsel %vm1179_vm0, %v3039_v19, 0.0  ;;  %v3040_v54 = vsel %vm925_vm6, 1.0, %v3408_v2  ;;  %v1714_v23 = vadd.f32 %v1713_v5, %v1712_v6 }
 0x140   :  { %v1672_v30 = vadd.f32 %v1671_v4, %v1670_v35  ;;  %v1748_v49 = vrot.slane %v1747_v41, 4  ;;  %v1754_v61 = vsel %vm1179_vm0, %v3040_v54, 0.0  ;;  %v2147_v15 = vsel %vm2078_vm5, %v1704_v51, %v2146_v40 }
 0x141   :  { %v4464_v14 = vsel %vm2080_vm9, %v1655_v42, %v4412_v37  ;;  %v1755_v59 = vrot.slane %v1754_v61, 4  ;;  %vm920_vm7 = vcmp.eq.s32.totalorder %v4398_v3, %v3571_v33  ;;  %v4470_v52 = vadd.f32 %v1661_v8, %v1660_v43  ;;  %v4494_v43 = vpop.permute.xlu1 %659 }
 0x142   :  { %v1668_v10 = vrot.slane %v1667_v11, 1  ;;  %v1749_v39 = vadd.f32 %v1748_v49, %v1747_v41  ;;  %v3035_v63 = vsel %vm920_vm7, 1.0, %v3408_v2  ;;  %v1627_v62 = vadd.f32 %v1626_v29, %v1625_v0 }
 0x143   :  { %v1710_v55 = vrot.slane %v1709_v58, 1  ;;  %v1719_v44 = vsel %vm1179_vm0, %v3035_v63, 0.0  ;;  %vm932_vm8 = vcmp.eq.s32.totalorder %v4407_v38, %v3571_v33  ;;  %v4476_v37 = vadd.f32 %v1743_v26, %v1742_v25  ;;  %v4505_v25 = vpop.permute.xlu0 %701 }
 0x144   :  { %v1715_v31 = vrot.slane %v1714_v23, 2  ;;  %v1673_v13 = vrot.slane %v1672_v30, 2  ;;  %v2135_v3 = vsel %vm2082_vm10, %v4367_v48, %v4365_v36  ;;  %v1756_v46 = vadd.f32 %v1755_v59, %v1754_v61 }
 0x145   :  { %v2136_v12 = vsel %vm2084_vm12, %v4426_v18, %v2135_v3  ;;  %v3047_v1 = vsel %vm932_vm8, 1.0, %v3408_v2  ;;  %vm931_vm13 = vcmp.eq.s32.totalorder %v4417_v28, %v3571_v33  ;;  %v4488_v38 = vadd.f32 %v1668_v10, %v1667_v11  ;;  %v4518_v4 = vpop.permute.xlu1 %736 }
 0x146   :  { %v1750_v27 = vrot.slane %v1749_v39, 2  ;;  %v1720_v40 = vrot.slane %v1719_v44, 4  ;;  %v2137_v47 = vsel %vm2086_vm14, %v1620_v16, %v2136_v12  ;;  %v1711_v17 = vadd.f32 %v1710_v55, %v1709_v58 }
 0x147   :  { %v2138_v36 = vsel %vm2088_vm15, %v1627_v62, %v2137_v47  ;;  %v1803_v48 = vsel %vm1179_vm0, %v3047_v1, 0.0  ;;  %v3046_v45 = vsel %vm931_vm13, 1.0, %v3408_v2  ;;  %v1745_v18 = vrot.slane %v4476_v37, 1 }
 0x148   :  { %v1716_v34 = vadd.f32 %v1715_v31, %v1714_v23  ;;  %v4497_v6 = vadd.f32 %v1673_v13, %v1672_v30  ;;  %3191 = vmatmul.mubr.msk.f32.gmra.mrb[6].mxu0 %vm2181_vm1, %v2138_v36  ;;  %v1804_v28 = vrot.slane %v1803_v48, 4  ;;  %v1757_v24 = vrot.slane %v1756_v46, 2 }
 0x149   :  { %v1796_v16 = vsel %vm1179_vm0, %v3046_v45, 0.0  ;;  %vm921_vm3 = vcmp.eq.s32.totalorder %v4424_v60, %v3571_v33  ;;  %vm914_vm4 = vcmp.eq.s32.totalorder %v4433_v7, %v3571_v33  ;;  %v1751_v0 = vadd.f32 %v1750_v27, %v1749_v39  ;;  %v4534_v3 = vpop.permute.xlu1 %666 }
 0x14a   :  { %v1721_v9 = vadd.f32 %v1720_v40, %v1719_v44  ;;  %v1805_v51 = vadd.f32 %v1804_v28, %v1803_v48  ;;  %v1797_v20 = vrot.slane %v1796_v16, 4  ;;  %v4508_v56 = vsel %vm2080_vm9, %v1711_v17, %v2147_v15  ;;  %v4525_v15 = vpop.permute.xlu0 %708 }
 0x14b   :  { %v3036_v42 = vsel %vm921_vm3, 1.0, %v3408_v2  ;;  %v3029_v5 = vsel %vm914_vm4, 1.0, %v3408_v2  ;;  %vm933_vm6 = vcmp.eq.s32.totalorder %v4445_v50, %v3571_v33  ;;  %v1717_v60 = vrot.slane %v1716_v34, 1 }
 0x14c   :  { %v1675_v32 = vrot.slane %v4497_v6, 1  ;;  %v1806_v7 = vrot.slane %v1805_v51, 2  ;;  %v1798_v57 = vadd.f32 %v1797_v20, %v1796_v16  ;;  %v1758_v8 = vadd.f32 %v1757_v24, %v1756_v46 }
 0x14d   :  { %v1726_v11 = vsel %vm1179_vm0, %v3036_v42, 0.0  ;;  %v1677_v35 = vsel %vm1179_vm0, %v3029_v5, 0.0  ;;  %v3048_v29 = vsel %vm933_vm6, 1.0, %v3408_v2  ;;  %v1752_v19 = vrot.slane %v1751_v0, 1 }
 0x14e   :  { %v1722_v58 = vrot.slane %v1721_v9, 2  ;;  %v1799_v26 = vrot.slane %v1798_v57, 2  ;;  %v1727_v41 = vrot.slane %v1726_v11, 4  ;;  %v1678_v54 = vrot.slane %v1677_v35, 4  ;;  %v4542_v28 = vpop.permute.xlu0 %743 }
 0x14f   :  { %v1810_v50 = vsel %vm1179_vm0, %v3048_v29, 0.0  ;;  %vm926_vm7 = vcmp.eq.s32.totalorder %v4456_v22, %v3571_v33  ;;  %vm927_vm8 = vcmp.eq.s32.totalorder %v4468_v21, %v3571_v33  ;;  %v1807_v23 = vadd.f32 %v1806_v7, %v1805_v51 }
 0x150   :  { %v1800_v30 = vadd.f32 %v1799_v26, %v1798_v57  ;;  %v1728_v49 = vadd.f32 %v1727_v41, %v1726_v11  ;;  %v1811_v61 = vrot.slane %v1810_v50, 4  ;;  %v1679_v59 = vadd.f32 %v1678_v54, %v1677_v35 }
 0x151   :  { %v3041_v10 = vsel %vm926_vm7, 1.0, %v3408_v2  ;;  %v3042_v39 = vsel %vm927_vm8, 1.0, %v3408_v2  ;;  %vm922_vm13 = vcmp.eq.s32.totalorder %v4481_v53, %v3571_v33  ;;  %v1753_v63 = vadd.f32 %v1752_v19, %v1751_v0 }
 0x152   :  { %v1759_v62 = vrot.slane %v1758_v8, 1  ;;  %v1729_v22 = vrot.slane %v1728_v49, 2  ;;  %v1812_v55 = vadd.f32 %v1811_v61, %v1810_v50  ;;  %v1680_v44 = vrot.slane %v1679_v59, 2  ;;  %v716_v26 = vpop.permute.xlu0 %715 }
 0x153   :  { %v1761_v21 = vsel %vm1179_vm0, %v3041_v10, 0.0  ;;  %v1768_v31 = vsel %vm1179_vm0, %v3042_v39, 0.0  ;;  %v3037_v13 = vsel %vm922_vm13, 1.0, %v3408_v2  ;;  %v1723_v46 = vadd.f32 %v1722_v58, %v1721_v9 }
 0x154   :  { %v1808_v12 = vrot.slane %v1807_v23, 1  ;;  %v1813_v1 = vrot.slane %v1812_v55, 2  ;;  %v1762_v27 = vrot.slane %v1761_v21, 4  ;;  %v1801_v40 = vrot.slane %v1800_v30, 1 }
 0x155   :  { %v1769_v47 = vrot.slane %v1768_v31, 4  ;;  %v1733_v53 = vsel %vm1179_vm0, %v3037_v13, 0.0  ;;  %vm928_vm3 = vcmp.eq.s32.totalorder %v4494_v43, %v3571_v33  ;;  %v1746_v17 = vadd.f32 %v1745_v18, %v4476_v37 }
 0x156   :  { %v4540_v36 = vadd.f32 %v1717_v60, %v1716_v34  ;;  %v1730_v48 = vadd.f32 %v1729_v22, %v1728_v49  ;;  %v1681_v45 = vadd.f32 %v1680_v44, %v1679_v59  ;;  %v1814_v24 = vadd.f32 %v1813_v1, %v1812_v55  ;;  %v751_v34 = vpop.permute.xlu1 %750  ;;  %v793_v1 = vpop.permute.xlu0 %792 }
 0x157   :  { %v1763_v16 = vadd.f32 %v1762_v27, %v1761_v21  ;;  %v1734_v0 = vrot.slane %v1733_v53, 4  ;;  %v3043_v9 = vsel %vm928_vm3, 1.0, %v3408_v2  ;;  %v1676_v51 = vadd.f32 %v1675_v32, %v4497_v6 }
 0x158   :  { %v2153_v20 = vsel %vm2076_vm11, %v1753_v63, %v1746_v17  ;;  %v1760_v42 = vadd.f32 %v1759_v62, %v1758_v8  ;;  %v1724_v5 = vrot.slane %v1723_v46, 1  ;;  %v1809_v43 = vadd.f32 %v1808_v12, %v1807_v23 }
 0x159   :  { %v1802_v7 = vadd.f32 %v1801_v40, %v1800_v30  ;;  %v1770_v37 = vadd.f32 %v1769_v47, %v1768_v31  ;;  %v1775_v18 = vsel %vm1179_vm0, %v3043_v9, 0.0  ;;  %v1731_v60 = vrot.slane %v1730_v48, 1 }
 0x15a   :  { %v1735_v57 = vadd.f32 %v1734_v0, %v1733_v53  ;;  %vm934_vm4 = vcmp.eq.s32.totalorder %v4505_v25, %v3571_v33  ;;  %vm939_vm6 = vcmp.eq.s32.totalorder %v4518_v4, %v3571_v33  ;;  %v1682_v11 = vrot.slane %v1681_v45, 1  ;;  %v4566_v39 = vpop.permute.xlu1 %799 }
 0x15b   :  { %v1815_v6 = vrot.slane %v1814_v24, 1  ;;  %v1764_v32 = vrot.slane %v1763_v16, 2  ;;  %v3049_v8 = vsel %vm934_vm4, 1.0, %v3408_v2  ;;  %v4554_v35 = vsel %vm2078_vm5, %v1760_v42, %v2153_v20 }
 0x15c   :  { %v1776_v29 = vrot.slane %v1775_v18, 4  ;;  %v1817_v19 = vsel %vm1179_vm0, %v3049_v8, 0.0  ;;  %v3054_v58 = vsel %vm939_vm6, 1.0, %v3408_v2  ;;  %v4558_v41 = vadd.f32 %v1724_v5, %v1723_v46 }
 0x15d   :  { %v2160_v25 = vsel %vm2076_vm11, %v1809_v43, %v1802_v7  ;;  %v1771_v54 = vrot.slane %v1770_v37, 2  ;;  %v1818_v4 = vrot.slane %v1817_v19, 4  ;;  %v4561_v50 = vadd.f32 %v1731_v60, %v1730_v48 }
 0x15e   :  { %v1736_v23 = vrot.slane %v1735_v57, 2  ;;  %v1852_v30 = vsel %vm1179_vm0, %v3054_v58, 0.0  ;;  %vm935_vm7 = vcmp.eq.s32.totalorder %v4525_v15, %v3571_v33  ;;  %v1683_v49 = vadd.f32 %v1682_v11, %v1681_v45  ;;  %v723_v45 = vpop.permute.xlu1 %722 }
 0x15f   :  { %v1816_v61 = vadd.f32 %v1815_v6, %v1814_v24  ;;  %v1765_v59 = vadd.f32 %v1764_v32, %v1763_v16  ;;  %v1819_v10 = vadd.f32 %v1818_v4, %v1817_v19  ;;  %v1777_v63 = vadd.f32 %v1776_v29, %v1775_v18 }
 0x160   :  { %v1853_v62 = vrot.slane %v1852_v30, 4  ;;  %v3050_v22 = vsel %vm935_vm7, 1.0, %v3408_v2  ;;  %v2142_v55 = vsel %vm2082_vm10, %v4470_v52, %v4464_v14  ;;  %v1772_v44 = vadd.f32 %v1771_v54, %v1770_v37  ;;  %v674_v37 = vpop.permute.xlu0 %673 }
 0x161   :  { %v1820_v21 = vrot.slane %v1819_v10, 2  ;;  %v1824_v31 = vsel %vm1179_vm0, %v3050_v22, 0.0  ;;  %v2143_v15 = vsel %vm2084_vm12, %v4488_v38, %v2142_v55  ;;  %v1737_v13 = vadd.f32 %v1736_v23, %v1735_v57 }
 0x162   :  { %v1825_v46 = vrot.slane %v1824_v31, 4  ;;  %v2144_v12 = vsel %vm2086_vm14, %v1676_v51, %v2143_v15  ;;  %vm929_vm8 = vcmp.eq.s32.totalorder %v4534_v3, %v3571_v33  ;;  %v4579_v27 = vsel %vm2078_vm5, %v1816_v61, %v2160_v25 }
 0x163   :  { %v1854_v40 = vadd.f32 %v1853_v62, %v1852_v30  ;;  %v2145_v14 = vsel %vm2088_vm15, %v1683_v49, %v2144_v12  ;;  %v3044_v52 = vsel %vm929_vm8, 1.0, %v3408_v2  ;;  %v1778_v47 = vrot.slane %v1777_v63, 2 }
 0x164   :  { %v1826_v53 = vadd.f32 %v1825_v46, %v1824_v31  ;;  %3193 = vmatprep.mubr.msk.f32.mxu0 %vm2181_vm1, %v2145_v14  ;;  %v1782_v38 = vsel %vm1179_vm0, %v3044_v52, 0.0  ;;  %vm940_vm13 = vcmp.eq.s32.totalorder %v4542_v28, %v3571_v33  ;;  %v1821_v17 = vadd.f32 %v1820_v21, %v1819_v10 }
 0x165   :  { %v1783_v3 = vrot.slane %v1782_v38, 4  ;;  %v3055_v48 = vsel %vm940_vm13, 1.0, %v3408_v2  ;;  %vm941_vm3 = vcmp.eq.s32.totalorder %v751_v34, %v3571_v33  ;;  %v1766_v24 = vrot.slane %v1765_v59, 1 }
 0x166   :  { %v1738_v16 = vrot.slane %v1737_v13, 1  ;;  %v1859_v0 = vsel %vm1179_vm0, %v3055_v48, 0.0  ;;  %v3056_v9 = vsel %vm941_vm3, 1.0, %v3408_v2  ;;  %v1773_v51 = vrot.slane %v1772_v44, 1 }
 0x167   :  { %v1855_v20 = vrot.slane %v1854_v40, 2  ;;  %v1860_v42 = vrot.slane %v1859_v0, 4  ;;  %v1866_v5 = vsel %vm1179_vm0, %v3056_v9, 0.0  ;;  %v1779_v43 = vadd.f32 %v1778_v47, %v1777_v63 }
 0x168   :  { %v1827_v28 = vrot.slane %v1826_v53, 2  ;;  %v1867_v7 = vrot.slane %v1866_v5, 4  ;;  %vm936_vm4 = vcmp.eq.s32.totalorder %v716_v26, %v3571_v33  ;;  %v1822_v18 = vrot.slane %v1821_v17, 1  ;;  %v807_v26 = vpop.permute.xlu1 %806 }
 0x169   :  { %v1784_v34 = vadd.f32 %v1783_v3, %v1782_v38  ;;  %v1861_v60 = vadd.f32 %v1860_v42, %v1859_v0  ;;  %v3051_v57 = vsel %vm936_vm4, 1.0, %v3408_v2  ;;  %v1767_v11 = vadd.f32 %v1766_v24, %v1765_v59 }
 0x16a   :  { %v1739_v6 = vadd.f32 %v1738_v16, %v1737_v13  ;;  %v1868_v32 = vadd.f32 %v1867_v7, %v1866_v5  ;;  %v1831_v8 = vsel %vm1179_vm0, %v3051_v57, 0.0  ;;  %v4595_v29 = vadd.f32 %v1773_v51, %v1772_v44 }
 0x16b   :  { %v1856_v19 = vadd.f32 %v1855_v20, %v1854_v40  ;;  %v1862_v58 = vrot.slane %v1861_v60, 2  ;;  %v2149_v25 = vsel %vm2082_vm10, %v4540_v36, %v4508_v56  ;;  %v1780_v54 = vrot.slane %v1779_v43, 1  ;;  %v758_v36 = vpop.permute.xlu0 %757 }
 0x16c   :  { %v1828_v4 = vadd.f32 %v1827_v28, %v1826_v53  ;;  %v2150_v23 = vsel %vm2084_vm12, %v4558_v41, %v2149_v25  ;;  %vm948_vm6 = vcmp.eq.s32.totalorder %v4566_v39, %v3571_v33  ;;  %v1823_v30 = vadd.f32 %v1822_v18, %v1821_v17 }
 0x16d   :  { %v1785_v49 = vrot.slane %v1784_v34, 2  ;;  %v1832_v61 = vrot.slane %v1831_v8, 4  ;;  %v2151_v59 = vsel %vm2086_vm14, %v4561_v50, %v2150_v23  ;;  %v1869_v10 = vrot.slane %v1868_v32, 2 }
 0x16e   :  { %v2152_v63 = vsel %vm2088_vm15, %v1739_v6, %v2151_v59  ;;  %v3063_v56 = vsel %vm948_vm6, 1.0, %v3408_v2  ;;  %vm947_vm7 = vcmp.eq.s32.totalorder %v793_v1, %v3571_v33  ;;  %v4611_v41 = vsel %vm2080_vm9, %v1767_v11, %v4554_v35  ;;  %v765_v35 = vpop.permute.xlu1 %764 }
 0x16f   :  { %v1857_v62 = vrot.slane %v1856_v19, 1  ;;  %v1863_v39 = vadd.f32 %v1862_v58, %v1861_v60  ;;  %3194 = vmatmul.mubr.msk.f32.gmra.mrb[8].mxu0 %vm2181_vm1, %v2152_v63  ;;  %v1915_v22 = vsel %vm1179_vm0, %v3063_v56, 0.0  ;;  %v1829_v55 = vrot.slane %v1828_v4, 1  ;;  %v730_v48 = vpop.permute.xlu0 %729 }
 0x170   :  { %v1916_v50 = vrot.slane %v1915_v22, 4  ;;  %v3062_v44 = vsel %vm947_vm7, 1.0, %v3408_v2  ;;  %vm937_vm8 = vcmp.eq.s32.totalorder %v723_v45, %v3571_v33  ;;  %v1786_v21 = vadd.f32 %v1785_v49, %v1784_v34 }
 0x171   :  { %v1833_v31 = vadd.f32 %v1832_v61, %v1831_v8  ;;  %v1908_v15 = vsel %vm1179_vm0, %v3062_v44, 0.0  ;;  %v3052_v13 = vsel %vm937_vm8, 1.0, %v3408_v2  ;;  %v4619_v46 = vadd.f32 %v1780_v54, %v1779_v43 }
 0x172   :  { %v4623_v12 = vsel %vm2080_vm9, %v1823_v30, %v4579_v27  ;;  %v1870_v1 = vadd.f32 %v1869_v10, %v1868_v32  ;;  %v1838_v40 = vsel %vm1179_vm0, %v3052_v13, 0.0  ;;  %v1858_v14 = vadd.f32 %v1857_v62, %v1856_v19  ;;  %v772_v5 = vpop.permute.xlu1 %771 }
 0x173   :  { %v1864_v52 = vrot.slane %v1863_v39, 1  ;;  %v1839_v47 = vrot.slane %v1838_v40, 4  ;;  %vm930_vm13 = vcmp.eq.s32.totalorder %v674_v37, %v3571_v33  ;;  %v4627_v53 = vadd.f32 %v1829_v55, %v1828_v4  ;;  %v814_v8 = vpop.permute.xlu0 %813 }
 0x174   :  { %v1917_v38 = vadd.f32 %v1916_v50, %v1915_v22  ;;  %v1909_v17 = vrot.slane %v1908_v15, 4  ;;  %v3045_v3 = vsel %vm930_vm13, 1.0, %v3408_v2  ;;  %v1787_v45 = vrot.slane %v1786_v21, 1 }
 0x175   :  { %v1834_v24 = vrot.slane %v1833_v31, 2  ;;  %v1789_v27 = vsel %vm1179_vm0, %v3045_v3, 0.0  ;;  %vm949_vm3 = vcmp.eq.s32.totalorder %v807_v26, %v3571_v33  ;;  %v1871_v16 = vrot.slane %v1870_v1, 1 }
 0x176   :  { %v1840_v0 = vadd.f32 %v1839_v47, %v1838_v40  ;;  %v1790_v9 = vrot.slane %v1789_v27, 4  ;;  %v3064_v51 = vsel %vm949_vm3, 1.0, %v3408_v2  ;;  %v1865_v20 = vadd.f32 %v1864_v52, %v1863_v39  ;;  %v779_v10 = vpop.permute.xlu1 %778 }
 0x177   :  { %v1922_v42 = vsel %vm1179_vm0, %v3064_v51, 0.0  ;;  %vm942_vm4 = vcmp.eq.s32.totalorder %v758_v36, %v3571_v33  ;;  %vm943_vm6 = vcmp.eq.s32.totalorder %v765_v35, %v3571_v33  ;;  %v1918_v43 = vrot.slane %v1917_v38, 2 }
 0x178   :  { %v1910_v28 = vadd.f32 %v1909_v17, %v1908_v15  ;;  %v1791_v7 = vadd.f32 %v1790_v9, %v1789_v27  ;;  %v1923_v37 = vrot.slane %v1922_v42, 4  ;;  %v1835_v18 = vadd.f32 %v1834_v24, %v1833_v31  ;;  %v821_v15 = vpop.permute.xlu0 %820 }
 0x179   :  { %v3057_v34 = vsel %vm942_vm4, 1.0, %v3408_v2  ;;  %v3058_v60 = vsel %vm943_vm6, 1.0, %v3408_v2  ;;  %vm938_vm7 = vcmp.eq.s32.totalorder %v730_v48, %v3571_v33  ;;  %v4639_v57 = vadd.f32 %v1787_v45, %v1786_v21 }
 0x17a   :  { %v1841_v11 = vrot.slane %v1840_v0, 2  ;;  %v1792_v6 = vrot.slane %v1791_v7, 2  ;;  %v1924_v32 = vadd.f32 %v1923_v37, %v1922_v42  ;;  %v1872_v19 = vadd.f32 %v1871_v16, %v1870_v1  ;;  %v786_v45 = vpop.permute.xlu1 %785 }
 0x17b   :  { %v1873_v58 = vsel %vm1179_vm0, %v3057_v34, 0.0  ;;  %v1880_v25 = vsel %vm1179_vm0, %v3058_v60, 0.0  ;;  %v3053_v26 = vsel %vm938_vm7, 1.0, %v3408_v2  ;;  %v2167_v54 = vsel %vm2076_vm11, %v1865_v20, %v1858_v14 }
 0x17c   :  { %v1919_v4 = vadd.f32 %v1918_v43, %v1917_v38  ;;  %v1911_v23 = vrot.slane %v1910_v28, 2  ;;  %v1874_v30 = vrot.slane %v1873_v58, 4  ;;  %v1836_v49 = vrot.slane %v1835_v18, 1 }
 0x17d   :  { %v1881_v61 = vrot.slane %v1880_v25, 4  ;;  %v1845_v59 = vsel %vm1179_vm0, %v3053_v26, 0.0  ;;  %vm944_vm8 = vcmp.eq.s32.totalorder %v772_v5, %v3571_v33  ;;  %v1842_v63 = vadd.f32 %v1841_v11, %v1840_v0 }
 0x17e   :  { %v1793_v56 = vadd.f32 %v1792_v6, %v1791_v7  ;;  %v1925_v36 = vrot.slane %v1924_v32, 2  ;;  %v1875_v62 = vadd.f32 %v1874_v30, %v1873_v58  ;;  %v1846_v22 = vrot.slane %v1845_v59, 4  ;;  %v828_v7 = vpop.permute.xlu0 %827 }
 0x17f   :  { %v1882_v39 = vadd.f32 %v1881_v61, %v1880_v25  ;;  %v3059_v55 = vsel %vm944_vm8, 1.0, %v3408_v2  ;;  %vm950_vm13 = vcmp.eq.s32.totalorder %v814_v8, %v3571_v33  ;;  %v1920_v50 = vrot.slane %v1919_v4, 1 }
 0x180   :  { %v4649_v44 = vadd.f32 %v1911_v23, %v1910_v28  ;;  %v1876_v21 = vrot.slane %v1875_v62, 2  ;;  %v1887_v31 = vsel %vm1179_vm0, %v3059_v55, 0.0  ;;  %v1847_v35 = vadd.f32 %v1846_v22, %v1845_v59 }
 0x181   :  { %v1883_v13 = vrot.slane %v1882_v39, 2  ;;  %v1888_v1 = vrot.slane %v1887_v31, 4  ;;  %v3065_v40 = vsel %vm950_vm13, 1.0, %v3408_v2  ;;  %v1843_v14 = vrot.slane %v1842_v63, 1 }
 0x182   :  { %v1877_v52 = vadd.f32 %v1876_v21, %v1875_v62  ;;  %v1929_v47 = vsel %vm1179_vm0, %v3065_v40, 0.0  ;;  %vm945_vm3 = vcmp.eq.s32.totalorder %v779_v10, %v3571_v33  ;;  %v1794_v38 = vrot.slane %v1793_v56, 1  ;;  %v835_v10 = vpop.permute.xlu0 %834 }
 0x183   :  { %v4655_v17 = vadd.f32 %v1925_v36, %v1924_v32  ;;  %v1889_v3 = vadd.f32 %v1888_v1, %v1887_v31  ;;  %v1930_v48 = vrot.slane %v1929_v47, 4  ;;  %v2168_v24 = vsel %vm2078_vm5, %v1872_v19, %v2167_v54  ;;  %v842_v54 = vpop.permute.xlu1 %841 }
 0x184   :  { %v1884_v27 = vadd.f32 %v1883_v13, %v1882_v39  ;;  %v3060_v16 = vsel %vm945_vm3, 1.0, %v3408_v2  ;;  %vm951_vm4 = vcmp.eq.s32.totalorder %v821_v15, %v3571_v33  ;;  %v4660_v0 = vadd.f32 %v1836_v49, %v1835_v18 }
 0x185   :  { %v4662_v9 = vadd.f32 %v1920_v50, %v1919_v4  ;;  %v1878_v51 = vrot.slane %v1877_v52, 1  ;;  %v1848_v20 = vrot.slane %v1847_v35, 2  ;;  %v1913_v42 = vrot.slane %v4649_v44, 1 }
 0x186   :  { %v4665_v5 = vadd.f32 %v1843_v14, %v1842_v63  ;;  %v1894_v43 = vsel %vm1179_vm0, %v3060_v16, 0.0  ;;  %v3066_v28 = vsel %vm951_vm4, 1.0, %v3408_v2  ;;  %v1795_v37 = vadd.f32 %v1794_v38, %v1793_v56 }
 0x187   :  { %v1927_v34 = vrot.slane %v4655_v17, 1  ;;  %v1890_v60 = vrot.slane %v1889_v3, 2  ;;  %v1931_v11 = vadd.f32 %v1930_v48, %v1929_v47  ;;  %v1885_v18 = vrot.slane %v1884_v27, 1 }
 0x188   :  { %v1895_v6 = vrot.slane %v1894_v43, 4  ;;  %v1936_v32 = vsel %vm1179_vm0, %v3066_v28, 0.0  ;;  %v2156_v8 = vsel %vm2082_vm10, %v4595_v29, %v4611_v41  ;;  %v1879_v19 = vadd.f32 %v1878_v51, %v1877_v52 }
 0x189   :  { %v1849_v58 = vadd.f32 %v1848_v20, %v1847_v35  ;;  %v1937_v25 = vrot.slane %v1936_v32, 4  ;;  %v2157_v26 = vsel %vm2084_vm12, %v4619_v46, %v2156_v8  ;;  %vm946_vm6 = vcmp.eq.s32.totalorder %v786_v45, %v3571_v33 }
 0x18a   :  { %v1896_v4 = vadd.f32 %v1895_v6, %v1894_v43  ;;  %v2158_v23 = vsel %vm2086_vm14, %v4639_v57, %v2157_v26  ;;  %vm952_vm7 = vcmp.eq.s32.totalorder %v828_v7, %v3571_v33  ;;  %v1891_v30 = vadd.f32 %v1890_v60, %v1889_v3 }
 0x18b   :  { %v1932_v49 = vrot.slane %v1931_v11, 2  ;;  %v1938_v61 = vadd.f32 %v1937_v25, %v1936_v32  ;;  %v2159_v29 = vsel %vm2088_vm15, %v1795_v37, %v2158_v23  ;;  %v3061_v59 = vsel %vm946_vm6, 1.0, %v3408_v2 }
 0x18c   :  { %v1897_v41 = vrot.slane %v1896_v4, 2  ;;  %3196 = vmatprep.mubr.msk.f32.mxu0 %vm2181_vm1, %v2159_v29  ;;  %v3067_v46 = vsel %vm952_vm7, 1.0, %v3408_v2  ;;  %vm954_vm8 = vcmp.eq.s32.totalorder %v842_v54, %v3571_v33  ;;  %v1850_v57 = vrot.slane %v1849_v58, 1 }
 0x18d   :  { %v1939_v63 = vrot.slane %v1938_v61, 2  ;;  %v1901_v56 = vsel %vm1179_vm0, %v3061_v59, 0.0  ;;  %v1943_v36 = vsel %vm1179_vm0, %v3067_v46, 0.0  ;;  %v3069_v55 = vsel %vm954_vm8, 1.0, %v3408_v2  ;;  %v4692_v16 = vpop.f32.mrb[0].mxu0  ;;  %v33_v59 = vld [vmem:[%s4960_s1 + $0x40] sm:$0xff] }
 0x18e   :  { %v1898_v62 = vadd.f32 %v1897_v41, %v1896_v4  ;;  %v1902_v39 = vrot.slane %v1901_v56, 4  ;;  %v1944_v22 = vrot.slane %v1943_v36, 4  ;;  %v1892_v50 = vrot.slane %v1891_v30, 1  ;;  %v4698_v43 = vpop.f32.mrb[1].mxu0  ;;  %v34_v46 = vld [vmem:[%s4960_s1 + $0x48] sm:$0xff] }
 0x18f   :  { %v1933_v21 = vadd.f32 %v1932_v49, %v1931_v11  ;;  %v1957_v31 = vsel %vm1179_vm0, %v3069_v55, 0.0  ;;  %vm953_vm13 = vcmp.eq.s32.totalorder %v835_v10, %v3571_v33  ;;  %v1886_v15 = vadd.f32 %v1885_v18, %v1884_v27 }
 0x190   :  { %v1903_v13 = vadd.f32 %v1902_v39, %v1901_v56  ;;  %v1945_v35 = vadd.f32 %v1944_v22, %v1943_v36  ;;  %v1958_v1 = vrot.slane %v1957_v31, 4  ;;  %v2169_v40 = vsel %vm2080_vm9, %v1879_v19, %v2168_v24 }
 0x191   :  { %v1899_v14 = vrot.slane %v1898_v62, 1  ;;  %v1940_v52 = vadd.f32 %v1939_v63, %v1938_v61  ;;  %v3068_v47 = vsel %vm953_vm13, 1.0, %v3408_v2  ;;  %v1851_v38 = vadd.f32 %v1850_v57, %v1849_v58 }
 0x192   :  { %v1904_v3 = vrot.slane %v1903_v13, 2  ;;  %v1946_v48 = vrot.slane %v1945_v35, 2  ;;  %v1959_v45 = vadd.f32 %v1958_v1, %v1957_v31  ;;  %v1893_v51 = vadd.f32 %v1892_v50, %v1891_v30  ;;  %v36_v31 = vld [vmem:[%s4960_s1 + $0x58] sm:$0xff] }
 0x193   :  { %v1934_v20 = vrot.slane %v1933_v21, 1  ;;  %v1950_v33 = vsel %vm1179_vm0, %v3068_v47, 0.0  ;;  %v2163_v27 = vsel %vm2082_vm10, %v4627_v53, %v4623_v12  ;;  %v1900_v60 = vadd.f32 %v1899_v14, %v1898_v62  ;;  %v39_v14 = vld [vmem:[%s4960_s1 + $0x70] sm:$0xff]  ;;  %v53_v47 = vld [vmem:[%s4960_s1 + $0xe0] sm:$0xff] }
 0x194   :  { %v1905_v24 = vadd.f32 %v1904_v3, %v1903_v13  ;;  %v1947_v28 = vadd.f32 %v1946_v48, %v1945_v35  ;;  %v1960_v7 = vrot.slane %v1959_v45, 2  ;;  %v1951_v37 = vrot.slane %v1950_v33, 4  ;;  %v37_v13 = vld [vmem:[%s4960_s1 + $0x60] sm:$0xff]  ;;  %v38_v35 = vld [vmem:[%s4960_s1 + $0x68] sm:$0xff] }
 0x195   :  { %v1941_v11 = vrot.slane %v1940_v52, 1  ;;  %v2164_v18 = vsel %vm2084_vm12, %v4660_v0, %v2163_v27  ;;  %v2428_v6 = vmul.f32 %v4692_v16, %v4698_v43  ;;  %v1914_v53 = vadd.f32 %v1913_v42, %v4649_v44 }
 0x196   :  { %v1906_v32 = vrot.slane %v1905_v24, 1  ;;  %v1961_v8 = vadd.f32 %v1960_v7, %v1959_v45  ;;  %v1952_v19 = vadd.f32 %v1951_v37, %v1950_v33  ;;  %v2165_v12 = vsel %vm2086_vm14, %v4665_v5, %v2164_v18  ;;  %v3396_v37 = vld [vmem:[%s4959_s0 + $0x58] sm:$0xff] }
 0x197   :  { %v1948_v58 = vrot.slane %v1947_v28, 1  ;;  %v2166_v25 = vsel %vm2088_vm15, %v1851_v38, %v2165_v12  ;;  %v2170_v26 = vsel %vm2082_vm10, %v1886_v15, %v2169_v40  ;;  %v1928_v0 = vadd.f32 %v1927_v34, %v4655_v17  ;;  %v54_v38 = vld [vmem:[%s4960_s1 + $0xe8] sm:$0xff]  ;;  %v3400_v12 = vld [vmem:[%s4959_s0 + $0x60] sm:$0xff] }
 0x198   :  { %v1907_v54 = vadd.f32 %v1906_v32, %v1905_v24  ;;  %v1953_v4 = vrot.slane %v1952_v19, 2  ;;  %3197 = vmatmul.mubr.msk.f32.gmra.mrb[10].mxu0 %vm2181_vm1, %v2166_v25  ;;  %v2171_v23 = vsel %vm2084_vm12, %v1893_v51, %v2170_v26  ;;  %v1935_v5 = vadd.f32 %v1934_v20, %v1933_v21  ;;  %v35_v21 = vld [vmem:[%s4960_s1 + $0x50] sm:$0xff]  ;;  %v3401_v26 = vld [vmem:[%s4959_s0 + $0x68] sm:$0xff] }
 0x199   :  { %v1962_v30 = vrot.slane %v1961_v8, 1  ;;  %v2172_v49 = vsel %vm2086_vm14, %v1900_v60, %v2171_v23  ;;  %v1942_v44 = vadd.f32 %v1941_v11, %v1940_v52  ;;  %v2174_v29 = vsel %vm2076_vm11, %v4662_v9, %v1914_v53  ;;  %v40_v52 = vld [vmem:[%s4960_s1 + $0x78] sm:$0xff]  ;;  %v3398_v60 = vld [vmem:[%s4959_s0 + $0x40] sm:$0xff] }
 0x19a   :  { %v1954_v42 = vadd.f32 %v1953_v4, %v1952_v19  ;;  %v2173_v61 = vsel %vm2088_vm15, %v1907_v54, %v2172_v49  ;;  %v1949_v41 = vadd.f32 %v1948_v58, %v1947_v28  ;;  %v2175_v17 = vsel %vm2078_vm5, %v1928_v0, %v2174_v29  ;;  %v56_v49 = vld [vmem:[%s4960_s1 + $0xf8] sm:$0xff] }
 0x19b   :  { %3199 = vmatprep.mubr.msk.f32.mxu0 %vm2181_vm1, %v2173_v61  ;;  %v2176_v10 = vsel %vm2080_vm9, %v1935_v5, %v2175_v17  ;;  %v1963_v57 = vadd.f32 %v1962_v30, %v1961_v8  ;;  %v3409_v63 = vmov 0.0|0.0   ;;  %v3291_v9 = vpack.c.bf16 %v34_v46, %v33_v59  ;;  %v55_v30 = vld [vmem:[%s4960_s1 + $0xf0] sm:$0xff] }
 0x19c   :  { %v1955_v34 = vrot.slane %v1954_v42, 1  ;;  %3290 = vmatprep.subr.bf16.mxu1 %v3409_v63  ;;  %3322 = vmatprep.subr.bf16.mxu0 %v3409_v63  ;;  %v2177_v36 = vsel %vm2082_vm10, %v1942_v44, %v2176_v10  ;;  %v3294_v15 = vpack.c.bf16 %v36_v31, %v35_v21  ;;  %vm3410_vm0 = vmmov 0   ;;  %v3402_v10 = vld [vmem:[%s4959_s0 + $0x28] sm:$0xff] }
 0x19d   :  { %v2178_v62 = vsel %vm2084_vm12, %v1949_v41, %v2177_v36  ;;  %3292 = vmatpush3.bf16.msra.mxu1 %v3291_v9  ;;  %3218 = vmatprep.mubr.msk.f32.mxu1 %vm3410_vm0, %v3408_v2  ;;  %v3297_v1 = vpack.c.bf16 %v38_v35, %v37_v13  ;;  %v3300_v51 = vpack.c.bf16 %v40_v52, %v39_v14  ;;  %vm2352_vm5 = vcmp.ne.s32.totalorder %v3396_v37, 0 }
 0x19e   :  { %v1956_v56 = vadd.f32 %v1955_v34, %v1954_v42  ;;  %3293 = vmatprep.subr.bf16.mxu1 %v3409_v63  ;;  %v3302_v27 = vpack.c.bf16 %v54_v38, %v53_v47  ;;  %vm2349_vm10 = vcmp.ne.s32.totalorder %v3398_v60, 0  ;;  %v3094_v11 = vsel %vm2352_vm5, 1.0, %v3408_v2 }
 0x19f   :  { %v2412_v8 = vsel %vm2381_vm2, %v3094_v11, 0.0  ;;  %vm2434_vm3 = vcmask 261120   ;;  %v3306_v42 = vpack.c.bf16 %v56_v49, %v55_v30  ;;  %vm2346_vm4 = vcmp.ne.s32.totalorder %v3402_v10, 0 }
 0x1a0   :  { %v2179_v39 = vsel %vm2086_vm14, %v1956_v56, %v2178_v62  ;;  %2413 = vadd.xlane.f32.xlu0 %v2412_v8  ;;  %vm2353_vm14 = vcmp.ne.s32.totalorder %v3400_v12, 0 }
 0x1a1   :  { %v2180_v22 = vsel %vm2088_vm15, %v1963_v57, %v2179_v39  ;;  %3295 = vmatpush3.bf16.msra.mxu1 %v3294_v15  ;;  %v3095_v25 = vsel %vm2353_vm14, 1.0, %v3408_v2  ;;  %vm2354_vm15 = vcmp.ne.s32.totalorder %v3401_v26, 0  ;;  %v3088_v57 = vsel %vm2346_vm4, 1.0, %v3408_v2 }
 0x1a2   :  { %3200 = vmatmul.mubr.msk.f32.gmra.mrb[12].mxu0 %vm2181_vm1, %v2180_v22  ;;  %3296 = vmatprep.subr.bf16.mxu1 %v3409_v63  ;;  %v2415_v0 = vsel %vm2381_vm2, %v3095_v25, 0.0  ;;  %v3096_v54 = vsel %vm2354_vm15, 1.0, %v3408_v2  ;;  %v2394_v9 = vsel %vm2381_vm2, %v3088_v57, 0.0 }
 0x1a3   :  { %3271 = vmatprep.mubr.msk.f32.mxu0 %vm3410_vm0, %v3408_v2  ;;  %v2418_v4 = vsel %vm2381_vm2, %v3096_v54, 0.0 }
 0x1a5   :  { %3298 = vmatpush3.bf16.msra.mxu1 %v3297_v1 }
 0x1a6   :  { %3299 = vmatprep.subr.bf16.mxu1 %v3409_v63 }
 0x1a9   :  { %3301 = vmatpush3.bf16.msra.mxu1 %v3300_v51 }
 0x1aa   :  { %3303 = vmatprep.subr.bf16.mxu1 %v3302_v27 }
 0x1b9   :  { %v2384_v55 = vpop.xlane.xlu0 %2383 }
 0x1ba   :  { %v2421_v50 = vadd.f32 1e-08, %v2384_v55 }
 0x1bc   :  { %3332 = vrcp.f32 %v2421_v50 }
 0x1c6   :  { %v3333_v40 = vpop.eup %3332 }
 0x1c7   :  { %vm2424_vm11 = vcmp.ge.f32.partialorder %v3333_v40, 1e+08 }
 0x1c8   :  { %v2425_v3 = vsel %vm2424_vm11, 0.0, %v3333_v40 }
 0x1c9   :  { %v2429_v48 = vmul.f32 %v2428_v6, %v2425_v3  ;;  %v4766_v45 = vpop.f32.mrb[2].mxu0  ;;  %v2426_v20 = vmul.f32 %v4692_v16, %v2425_v3  ;;  %v3397_v16 = vld [vmem:[%s4959_s0 + $0x48] sm:$0xff]  ;;  %v3091_v6 = vsel %vm2349_vm10, 1.0, %v3408_v2 }
 0x1ca   :  { %v4769_v33 = vpop.f32.mrb[3].mxu0  ;;  %vm2350_vm9 = vcmp.ne.s32.totalorder %v3397_v16, 0  ;;  %v2403_v19 = vsel %vm2381_vm2, %v3091_v6, 0.0 }
 0x1cb   :  { %2431 = vrot.lane.b32.xlu1 %v2429_v48, %s3411_s21  ;;  %v2427_v24 = vadd.f32 %v2426_v20, %v4698_v43  ;;  %v3399_v43 = vld [vmem:[%s4959_s0 + $0x50] sm:$0xff]  ;;  %v3092_v18 = vsel %vm2350_vm9, 1.0, %v3408_v2 }
 0x1cc   :  { %vm2351_vm12 = vcmp.ne.s32.totalorder %v3399_v43, 0  ;;  %v2406_v53 = vsel %vm2381_vm2, %v3092_v18, 0.0 }
 0x1cd   :  { %v3093_v32 = vsel %vm2351_vm12, 1.0, %v3408_v2  ;;  %2407 = vadd.xlane.f32.xlu0 %v2406_v53 }
 0x1ce   :  { %v2409_v58 = vsel %vm2381_vm2, %v3093_v32, 0.0 }
 0x1d1   :  { %2416 = vadd.xlane.f32.xlu0 %v2415_v0 }
 0x1d5   :  { %2419 = vadd.xlane.f32.xlu0 %v2418_v4 }
 0x1ef   :  { %2404 = vadd.xlane.f32.xlu1 %v2403_v19 }
 0x1f3   :  { %v3189_v28 = vpop.f32.mrb[4].mxu0  ;;  %2410 = vadd.xlane.f32.xlu1 %v2409_v58 }
 0x1f4   :  { %v4774_v7 = vpop.f32.mrb[5].mxu0 }
 0x1f7   :  { %2395 = vadd.xlane.f32.xlu1 %v2394_v9  ;;  %v3404_v9 = vld [vmem:[%s4959_s0 + $0x38] sm:$0xff] }
 0x1f8   :  { %vm2348_vm10 = vcmp.ne.s32.totalorder %v3404_v9, 0 }
 0x21b   :  { %v3192_v23 = vpop.f32.mrb[6].mxu0 }
 0x21c   :  { %v2305_v5 = vpop.f32.mrb[7].mxu0 }
 0x21d   :  { %v3403_v5 = vld [vmem:[%s4959_s0 + $0x30] sm:$0xff] }
 0x21e   :  { %vm2347_vm9 = vcmp.ne.s32.totalorder %v3403_v5, 0 }
 0x22d   :  { %v2414_v56 = vpop.xlane.xlu0 %2413 }
 0x22e   :  { %v2513_v51 = vadd.f32 1e-08, %v2414_v56  ;;  %v3090_v56 = vsel %vm2348_vm10, 1.0, %v3408_v2 }
 0x23d   :  { %v2432_v44 = vpop.permute.xlu1 %2431 }
 0x23e   :  { %v2435_v61 = vsel %vm2434_vm3, %v2427_v24, %v2432_v44  ;;  %v3089_v44 = vsel %vm2347_vm9, 1.0, %v3408_v2 }
 0x23f   :  { %3219 = vmatmul.mubr.msk.f32.vlgmr.msra.gmra.mrb[0].mxu1 %vm2181_vm1, %v2435_v61  ;;  %v2397_v61 = vsel %vm2381_vm2, %v3089_v44, 0.0 }
 0x240   :  { %3305 = vmatpush3.bf16.msra.mxu1 %v3302_v27 }
 0x241   :  { %3307 = vmatprep.subr.bf16.mxu1 %v3306_v42 }
 0x242   :  { %v3195_v29 = vpop.f32.mrb[8].mxu0 }
 0x243   :  { %v2313_v41 = vpop.f32.mrb[9].mxu0 }
 0x244   :  { %3229 = vmatprep.mubr.msk.f32.mxu1 %vm2434_vm3, %v2313_v41  ;;  %3309 = vmatpush3.bf16.msra.mxu1 %v3306_v42 }
 0x245   :  { %3310 = vmatprep.subr.bf16.mxu1 %v3409_v63 }
 0x247   :  { %3230 = vmatmul.mubr.msk.f32.vlgmr.msra.gmra.mrb[2].mxu1 %vm2434_vm3, %v3195_v29 }
 0x25a   :  { %v2408_v36 = vpop.xlane.xlu0 %2407 }
 0x25b   :  { %v2511_v39 = vadd.f32 1e-08, %v2408_v36 }
 0x25d   :  { %3334 = vrcp.f32 %v2511_v39  ;;  %v41_v39 = vld [vmem:[%s4960_s1 + $0x80] sm:$0xff] }
 0x25e   :  { %v2417_v27 = vpop.xlane.xlu0 %2416 }
 0x25f   :  { %v2514_v60 = vadd.f32 1e-08, %v2417_v27 }
 0x262   :  { %v2420_v37 = vpop.xlane.xlu0 %2419 }
 0x263   :  { %v2515_v16 = vadd.f32 1e-08, %v2420_v37 }
 0x267   :  { %v3335_v55 = vpop.eup %3334 }
 0x268   :  { %vm2529_vm6 = vcmp.ge.f32.partialorder %v3335_v55, 1e+08 }
 0x269   :  { %v2535_v15 = vsel %vm2529_vm6, 0.0, %v3335_v55  ;;  %v43_v55 = vld [vmem:[%s4960_s1 + $0x90] sm:$0xff] }
 0x26b   :  { %v3198_v17 = vpop.f32.mrb[10].mxu0 }
 0x26c   :  { %v2323_v34 = vpop.f32.mrb[11].mxu0 }
 0x26d   :  { %3232 = vmatprep.mubr.msk.f32.mxu1 %vm2434_vm3, %v2323_v34 }
 0x26e   :  { %3233 = vmatmul.mubr.msk.f32.gmra.mrb[4].mxu1 %vm2434_vm3, %v3198_v17 }
 0x275   :  { %v3201_v59 = vpop.f32.mrb[12].mxu0 }
 0x276   :  { %v2333_v46 = vpop.f32.mrb[13].mxu0 }
 0x277   :  { %3235 = vmatprep.mubr.msk.f32.mxu1 %vm2434_vm3, %v2333_v46 }
 0x278   :  { %3236 = vmatmul.mubr.msk.f32.gmra.mrb[6].mxu1 %vm2434_vm3, %v3201_v59 }
 0x279   :  { %3254 = vmatprep.mubr.msk.f32.mxu1 %vm3410_vm0, %v3408_v2 }
 0x27c   :  { %v2405_v62 = vpop.xlane.xlu1 %2404 }
 0x27d   :  { %v2510_v22 = vadd.f32 1e-08, %v2405_v62  ;;  %v2400_v62 = vsel %vm2381_vm2, %v3090_v56, 0.0 }
 0x27f   :  { %3336 = vrcp.f32 %v2510_v22  ;;  %v42_v22 = vld [vmem:[%s4960_s1 + $0x88] sm:$0xff] }
 0x280   :  { %v2411_v24 = vpop.xlane.xlu1 %2410 }
 0x281   :  { %v2512_v28 = vadd.f32 1e-08, %v2411_v24 }
 0x289   :  { %v3337_v21 = vpop.eup %3336 }
 0x28a   :  { %vm2528_vm7 = vcmp.ge.f32.partialorder %v3337_v21, 1e+08 }
 0x28b   :  { %v2534_v13 = vsel %vm2528_vm7, 0.0, %v3337_v21  ;;  %v3311_v21 = vpack.c.bf16 %v42_v22, %v41_v39 }
 0x28d   :  { %3312 = vmatpush3.bf16.msra.mxu1 %v3311_v21 }
 0x28e   :  { %3313 = vmatprep.subr.bf16.mxu1 %v3409_v63 }
 0x312   :  { %v4828_v50 = vpop.f32.mrb[0].mxu1 }
 0x313   :  { %v3220_v31 = vpop.f32.mrb[1].mxu1 }
 0x314   :  { %v44_v31 = vld [vmem:[%s4960_s1 + $0x98] sm:$0xff] }
 0x31a   :  { %v3231_v35 = vpop.f32.mrb[2].mxu1 }
 0x31b   :  { %v2654_v1 = vmul.f32 %v3231_v35, %v2535_v15  ;;  %v2624_v40 = vpop.f32.mrb[3].mxu1  ;;  %v3314_v15 = vpack.c.bf16 %v44_v31, %v43_v55  ;;  %v46_v35 = vld [vmem:[%s4960_s1 + $0xa8] sm:$0xff] }
 0x31c   :  { %v2653_v14 = vmul.f32 %v2624_v40, %v2534_v13  ;;  %v45_v13 = vld [vmem:[%s4960_s1 + $0xa0] sm:$0xff]  ;;  %v47_v40 = vld [vmem:[%s4960_s1 + $0xb0] sm:$0xff] }
 0x31d   :  { %3338 = vtanh.f32 %v2654_v1  ;;  %3315 = vmatpush3.bf16.msra.mxu1 %v3314_v15  ;;  %v3317_v1 = vpack.c.bf16 %v46_v35, %v45_v13 }
 0x31e   :  { %3340 = vtanh.f32 %v2653_v14  ;;  %3316 = vmatprep.subr.bf16.mxu1 %v3409_v63  ;;  %v48_v14 = vld [vmem:[%s4960_s1 + $0xb8] sm:$0xff] }
 0x31f   :  { %3342 = vrcp.f32 %v2513_v51 }
 0x320   :  { %3344 = vrcp.f32 %v2512_v28 }
 0x321   :  { %3346 = vrcp.f32 %v2515_v16  ;;  %3318 = vmatpush3.bf16.msra.mxu1 %v3317_v1 }
 0x322   :  { %3348 = vrcp.f32 %v2514_v60  ;;  %3319 = vmatprep.subr.bf16.mxu1 %v3409_v63 }
 0x327   :  { %v4830_v52 = vpop.eup %3338 }
 0x328   :  { %v4832_v47 = vpop.eup %3340  ;;  %v2666_v38 = vmul.f32 %v4830_v52, %v4830_v52 }
 0x329   :  { %v2665_v3 = vmul.f32 %v4832_v47, %v4832_v47  ;;  %v3343_v43 = vpop.eup %3342 }
 0x32a   :  { %v2674_v48 = vsel %vm2434_vm3, %v2666_v38, 0.0  ;;  %vm2531_vm8 = vcmp.ge.f32.partialorder %v3343_v43, 1e+08  ;;  %v3345_v18 = vpop.eup %3344  ;;  %v3320_v38 = vpack.c.bf16 %v48_v14, %v47_v40 }
 0x32b   :  { %2675 = vadd.xlane.f32.xlu0 %v2674_v48  ;;  %v2671_v20 = vsel %vm2434_vm3, %v2665_v3, 0.0  ;;  %v2537_v11 = vsel %vm2531_vm8, 0.0, %v3343_v43  ;;  %v3347_v19 = vpop.eup %3346  ;;  %vm2530_vm13 = vcmp.ge.f32.partialorder %v3345_v18, 1e+08  ;;  %v2396_v3 = vpop.xlane.xlu1 %2395 }
 0x32c   :  { %2672 = vadd.xlane.f32.xlu1 %v2671_v20  ;;  %v3349_v12 = vpop.eup %3348  ;;  %v2536_v53 = vsel %vm2530_vm13, 0.0, %v3345_v18  ;;  %vm2533_vm11 = vcmp.ge.f32.partialorder %v3347_v19, 1e+08  ;;  %3321 = vmatpush3.bf16.msra.mxu1 %v3320_v38  ;;  %v2710_v51 = vadd.f32 1e-08, %v2396_v3 }
 0x32d   :  { %vm2532_vm5 = vcmp.ge.f32.partialorder %v3349_v12, 1e+08  ;;  %v2539_v25 = vsel %vm2533_vm11, 0.0, %v3347_v19 }
 0x32e   :  { %v2538_v26 = vsel %vm2532_vm5, 0.0, %v3349_v12 }
 0x341   :  { %v3234_v6 = vpop.f32.mrb[4].mxu1 }
 0x342   :  { %v2656_v32 = vmul.f32 %v3234_v6, %v2537_v11  ;;  %v2634_v8 = vpop.f32.mrb[5].mxu1 }
 0x343   :  { %v2655_v58 = vmul.f32 %v2634_v8, %v2536_v53 }
 0x344   :  { %3350 = vtanh.f32 %v2656_v32 }
 0x345   :  { %3352 = vtanh.f32 %v2655_v58 }
 0x34b   :  { %v3237_v0 = vpop.f32.mrb[6].mxu1 }
 0x34c   :  { %v2658_v54 = vmul.f32 %v3237_v0, %v2539_v25  ;;  %v2644_v4 = vpop.f32.mrb[7].mxu1 }
 0x34d   :  { %v2657_v23 = vmul.f32 %v2644_v4, %v2538_v26 }
 0x34e   :  { %v4843_v30 = vpop.eup %3350  ;;  %3354 = vtanh.f32 %v2658_v54 }
 0x34f   :  { %v2668_v49 = vmul.f32 %v4843_v30, %v4843_v30  ;;  %3356 = vtanh.f32 %v2657_v23  ;;  %v4850_v29 = vpop.eup %3352 }
 0x350   :  { %v2667_v57 = vmul.f32 %v4850_v29, %v4850_v29  ;;  %3358 = vrcp.f32 %v2710_v51 }
 0x351   :  { %v2680_v42 = vsel %vm2434_vm3, %v2668_v49, 0.0 }
 0x352   :  { %2681 = vadd.xlane.f32.xlu0 %v2680_v42  ;;  %v2677_v36 = vsel %vm2434_vm3, %v2667_v57, 0.0 }
 0x356   :  { %2398 = vadd.xlane.f32.xlu0 %v2397_v61 }
 0x358   :  { %v4852_v41 = vpop.eup %3354 }
 0x359   :  { %v4854_v17 = vpop.eup %3356  ;;  %v2670_v34 = vmul.f32 %v4852_v41, %v4852_v41 }
 0x35a   :  { %v2669_v59 = vmul.f32 %v4854_v17, %v4854_v17  ;;  %v3359_v43 = vpop.eup %3358 }
 0x35b   :  { %v2686_v46 = vsel %vm2434_vm3, %v2670_v34, 0.0  ;;  %vm2719_vm12 = vcmp.ge.f32.partialorder %v3359_v43, 1e+08 }
 0x35c   :  { %2687 = vadd.xlane.f32.xlu0 %v2686_v46  ;;  %v2683_v10 = vsel %vm2434_vm3, %v2669_v59, 0.0  ;;  %v2722_v25 = vsel %vm2719_vm12, 0.0, %v3359_v43 }
 0x35d   :  { %2684 = vadd.xlane.f32.xlu1 %v2683_v10 }
 0x361   :  { %2678 = vadd.xlane.f32.xlu1 %v2677_v36 }
 0x365   :  { %2401 = vadd.xlane.f32.xlu1 %v2400_v62 }
 0x3b8   :  { %v2676_v20 = vpop.xlane.xlu0 %2675 }
 0x3b9   :  { %v2673_v48 = vpop.xlane.xlu1 %2672  ;;  %v2690_v16 = vmax.f32 %v2676_v20, 1e-24 }
 0x3ba   :  { %v2689_v27 = vmax.f32 %v2673_v48, 1e-24 }
 0x3bc   :  { %3360 = vrsqrt.f32 %v2689_v27 }
 0x3c6   :  { %v3361_v18 = vpop.eup %3360 }
 0x3c7   :  { %v2701_v12 = vmul.f32 %v3361_v18, %v4832_v47  ;;  %v50_v18 = vld [vmem:[%s4960_s1 + $0xc8] sm:$0xff] }
 0x3df   :  { %v2682_v24 = vpop.xlane.xlu0 %2681 }
 0x3e0   :  { %v2692_v28 = vmax.f32 %v2682_v24, 1e-24 }
 0x3e2   :  { %3362 = vrsqrt.f32 %v2692_v28 }
 0x3e3   :  { %v2399_v37 = vpop.xlane.xlu0 %2398  ;;  %3364 = vrsqrt.f32 %v2690_v16 }
 0x3e4   :  { %v2711_v60 = vadd.f32 1e-08, %v2399_v37 }
 0x3e6   :  { %3366 = vrcp.f32 %v2711_v60 }
 0x3e9   :  { %v2688_v11 = vpop.xlane.xlu0 %2687 }
 0x3ea   :  { %v2685_v6 = vpop.xlane.xlu1 %2684  ;;  %v2694_v32 = vmax.f32 %v2688_v11, 1e-24  ;;  %v49_v11 = vld [vmem:[%s4960_s1 + $0xc0] sm:$0xff] }
 0x3eb   :  { %v2693_v8 = vmax.f32 %v2685_v6, 1e-24  ;;  %v3323_v6 = vpack.c.bf16 %v50_v18, %v49_v11 }
 0x3ec   :  { %v3363_v19 = vpop.eup %3362 }
 0x3ed   :  { %v2704_v53 = vmul.f32 %v3363_v19, %v4843_v30  ;;  %3368 = vrsqrt.f32 %v2693_v8  ;;  %v3365_v42 = vpop.eup %3364  ;;  %3324 = vmatpush3.bf16.msra.mxu0 %v3323_v6  ;;  %v52_v8 = vld [vmem:[%s4960_s1 + $0xd8] sm:$0xff] }
 0x3ee   :  { %v2679_v58 = vpop.xlane.xlu1 %2678  ;;  %3370 = vrsqrt.f32 %v2694_v32  ;;  %v2702_v30 = vmul.f32 %v3365_v42, %v4830_v52  ;;  %3325 = vmatprep.subr.bf16.mxu0 %v3409_v63  ;;  %v51_v32 = vld [vmem:[%s4960_s1 + $0xd0] sm:$0xff]  ;;  %v3407_v63 = vld [vmem:[%s4959_s0 + $0x20] sm:$0xff] }
 0x3ef   :  { %v2691_v26 = vmax.f32 %v2679_v58, 1e-24  ;;  %v2707_v0 = vadd.f32 %v2704_v53, %v2701_v12  ;;  %v3326_v19 = vpack.c.bf16 %v52_v8, %v51_v32  ;;  %v3405_v12 = vld [vmem:[%s4959_s0 + $0x10] sm:$0xff]  ;;  %v3406_v53 = vld [vmem:[%s4959_s0 + $0x18] sm:$0xff]  ;;  %vm2345_vm4 = vcmp.ne.s32.totalorder %v3407_v63, 0 }
 0x3f0   :  { %v3367_v61 = vpop.eup %3366 }
 0x3f1   :  { %3372 = vrsqrt.f32 %v2691_v26  ;;  %v2731_v54 = vmul.f32 %v2707_v0, %v4769_v33  ;;  %v2725_v4 = vmul.f32 %v2722_v25, %v2707_v0  ;;  %vm2720_vm14 = vcmp.ge.f32.partialorder %v3367_v61, 1e+08  ;;  %3327 = vmatpush3.bf16.msra.mxu0 %v3326_v19 }
 0x3f2   :  { %v2402_v23 = vpop.xlane.xlu1 %2401  ;;  %v2723_v57 = vsel %vm2720_vm14, 0.0, %v3367_v61  ;;  %v3087_v26 = vsel %vm2345_vm4, 1.0, %v3408_v2 }
 0x3f3   :  { %v2734_v5 = vmul.f32 %v2731_v54, %v2722_v25  ;;  %v2712_v49 = vadd.f32 1e-08, %v2402_v23  ;;  %v2728_v44 = vadd.f32 %v2725_v4, %v4769_v33  ;;  %v2391_v4 = vsel %vm2381_vm2, %v3087_v26, 0.0 }
 0x3f5   :  { %2740 = vrot.lane.b32.xlu0 %v2734_v5, %s3411_s21  ;;  %3374 = vrcp.f32 %v2712_v49 }
 0x3f7   :  { %v3369_v47 = vpop.eup %3368 }
 0x3f8   :  { %v2705_v34 = vmul.f32 %v3369_v47, %v4854_v17  ;;  %v3371_v59 = vpop.eup %3370 }
 0x3f9   :  { %v2706_v9 = vmul.f32 %v3371_v59, %v4852_v41 }
 0x3fa   :  { %v2708_v46 = vadd.f32 %v2705_v34, %v2702_v30 }
 0x3fb   :  { %v3373_v10 = vpop.eup %3372 }
 0x3fc   :  { %v2703_v56 = vmul.f32 %v3373_v10, %v4850_v29  ;;  %v2732_v33 = vmul.f32 %v4766_v45, %v2708_v46  ;;  %v2726_v36 = vmul.f32 %v2723_v57, %v2708_v46 }
 0x3fe   :  { %v2735_v62 = vmul.f32 %v2732_v33, %v2723_v57  ;;  %v2709_v39 = vadd.f32 %v2706_v9, %v2703_v56  ;;  %v2729_v22 = vadd.f32 %v4766_v45, %v2726_v36 }
 0x3ff   :  { %v3375_v55 = vpop.eup %3374 }
 0x400   :  { %2742 = vrot.lane.b32.xlu1 %v2735_v62, %s3411_s21  ;;  %vm2721_vm15 = vcmp.ge.f32.partialorder %v3375_v55, 1e+08  ;;  %v2733_v52 = vmul.f32 %v2709_v39, %v4774_v7 }
 0x401   :  { %v2724_v17 = vsel %vm2721_vm15, 0.0, %v3375_v55 }
 0x402   :  { %v2736_v21 = vmul.f32 %v2733_v52, %v2724_v17  ;;  %v2727_v31 = vmul.f32 %v2724_v17, %v2709_v39 }
 0x404   :  { %2744 = vrot.lane.b32.xlu1 %v2736_v21, %s3411_s21  ;;  %v2730_v29 = vadd.f32 %v2727_v31, %v4774_v7 }
 0x467   :  { %v2741_v41 = vpop.permute.xlu0 %2740 }
 0x468   :  { %v2749_v15 = vsel %vm2434_vm3, %v2728_v44, %v2741_v41 }
 0x469   :  { %3255 = vmatmul.mubr.msk.f32.vlgmr.msra.gmra.mrb[8].mxu1 %vm2181_vm1, %v2749_v15 }
 0x46a   :  { %3257 = vmatprep.mubr.msk.f32.mxu1 %vm3410_vm0, %v3408_v2 }
 0x472   :  { %v2743_v45 = vpop.permute.xlu1 %2742 }
 0x473   :  { %v2750_v13 = vsel %vm2434_vm3, %v2729_v22, %v2743_v45 }
 0x474   :  { %3258 = vmatmul.mubr.msk.f32.gmra.mrb[10].mxu1 %vm2181_vm1, %v2750_v13 }
 0x475   :  { %3260 = vmatprep.mubr.msk.f32.mxu1 %vm3410_vm0, %v3408_v2  ;;  %vm2344_vm0 = vcmp.ne.s32.totalorder %v3406_v53, 0 }
 0x476   :  { %v2745_v35 = vpop.permute.xlu1 %2744  ;;  %v3086_v25 = vsel %vm2344_vm0, 1.0, %v3408_v2 }
 0x477   :  { %v2751_v1 = vsel %vm2434_vm3, %v2730_v29, %v2745_v35  ;;  %v2388_v54 = vsel %vm2381_vm2, %v3086_v25, 0.0 }
 0x478   :  { %3261 = vmatmul.mubr.msk.f32.gmra.mrb[12].mxu1 %vm2181_vm1, %v2751_v1  ;;  %vm2343_vm1 = vcmp.ne.s32.totalorder %v3405_v12, 0 }
 0x479   :  { %v3085_v58 = vsel %vm2343_vm1, 1.0, %v3408_v2 }
 0x47a   :  { %v2385_v0 = vsel %vm2381_vm2, %v3085_v58, 0.0 }
 0x53c   :  { %v2827_v7 = vpop.f32.mrb[8].mxu1 }
 0x53d   :  { %3376 = vtanh.f32 %v2827_v7  ;;  %v3256_v40 = vpop.f32.mrb[9].mxu1 }
 0x547   :  { %v3377_v14 = vpop.eup %3376  ;;  %v2832_v38 = vpop.f32.mrb[10].mxu1 }
 0x548   :  { %v2844_v3 = vmul.f32 %v3377_v14, %v3377_v14  ;;  %3378 = vtanh.f32 %v2832_v38  ;;  %v3259_v48 = vpop.f32.mrb[11].mxu1 }
 0x54a   :  { %v2847_v51 = vsel %vm2434_vm3, %v2844_v3, 0.0 }
 0x54b   :  { %2848 = vadd.xlane.f32.xlu0 %v2847_v51  ;;  %v2837_v20 = vpop.f32.mrb[12].mxu1 }
 0x54c   :  { %3380 = vtanh.f32 %v2837_v20  ;;  %v3262_v27 = vpop.f32.mrb[13].mxu1 }
 0x552   :  { %v3379_v24 = vpop.eup %3378 }
 0x553   :  { %v2845_v28 = vmul.f32 %v3379_v24, %v3379_v24 }
 0x555   :  { %v2850_v37 = vsel %vm2434_vm3, %v2845_v28, 0.0 }
 0x556   :  { %v3381_v16 = vpop.eup %3380  ;;  %2851 = vadd.xlane.f32.xlu1 %v2850_v37 }
 0x557   :  { %v2846_v60 = vmul.f32 %v3381_v16, %v3381_v16 }
 0x559   :  { %v2853_v43 = vsel %vm2434_vm3, %v2846_v60, 0.0 }
 0x55a   :  { %2854 = vadd.xlane.f32.xlu0 %v2853_v43  ;;  %2389 = vadd.xlane.f32.xlu1 %v2388_v54 }
 0x55e   :  { %2386 = vadd.xlane.f32.xlu0 %v2385_v0 }
 0x562   :  { %2392 = vadd.xlane.f32.xlu0 %v2391_v4 }
 0x5d8   :  { %v2849_v23 = vpop.xlane.xlu0 %2848 }
 0x5d9   :  { %v2856_v5 = vmax.f32 %v2849_v23, 1e-24 }
 0x5db   :  { %3382 = vrsqrt.f32 %v2856_v5 }
 0x5e3   :  { %v2852_v49 = vpop.xlane.xlu1 %2851 }
 0x5e4   :  { %v2857_v44 = vmax.f32 %v2852_v49, 1e-24 }
 0x5e5   :  { %v3383_v47 = vpop.eup %3382 }
 0x5e6   :  { %3384 = vrsqrt.f32 %v2857_v44  ;;  %v2862_v34 = vmul.f32 %v3383_v47, %v3377_v14 }
 0x5e7   :  { %v2855_v42 = vpop.xlane.xlu0 %2854  ;;  %v2390_v56 = vpop.xlane.xlu1 %2389 }
 0x5e8   :  { %v2858_v61 = vmax.f32 %v2855_v42, 1e-24 }
 0x5ea   :  { %3386 = vrsqrt.f32 %v2858_v61 }
 0x5eb   :  { %v2387_v9 = vpop.xlane.xlu0 %2386 }
 0x5ec   :  { %v2866_v33 = vadd.f32 %v2390_v56, %v2387_v9 }
 0x5ef   :  { %v2393_v36 = vpop.xlane.xlu0 %2392 }
 0x5f0   :  { %v3385_v2 = vpop.eup %3384  ;;  %v2868_v62 = vadd.f32 %v2866_v33, %v2393_v36 }
 0x5f1   :  { %v2863_v30 = vmul.f32 %v3385_v2, %v3379_v24 }
 0x5f2   :  { %v2869_v39 = vadd.f32 1e-08, %v2868_v62 }
 0x5f3   :  { %v2865_v46 = vadd.f32 %v2863_v30, %v2862_v34 }
 0x5f4   :  { %v3387_v59 = vpop.eup %3386  ;;  %3388 = vrcp.f32 %v2869_v39 }
 0x5f5   :  { %v2864_v10 = vmul.f32 %v3387_v59, %v3381_v16  ;;  %3390 = vtanh.f32 %v4828_v50 }
 0x5f7   :  { %v2867_v57 = vadd.f32 %v2865_v46, %v2864_v10 }
 0x5f9   :  { %3272 = vmatmul.mubr.msk.f32.vlgmr.msra.gmra.mrb[14].mxu0 %vm2434_vm3, %v2867_v57 }
 0x5fe   :  { %v3389_v22 = vpop.eup %3388 }
 0x5ff   :  { %vm2872_vm2 = vcmp.ge.f32.partialorder %v3389_v22, 1e+08  ;;  %v3391_v31 = vpop.eup %3390 }
 0x600   :  { %v2873_v55 = vsel %vm2872_vm2, 0.0, %v3389_v22 }
 0x6cc   :  { %v2943_v52 = vpop.f32.mrb[14].mxu0 }
 0x6cd   :  { %v2947_v17 = vmul.f32 %v2943_v52, %v2873_v55  ;;  %v3273_v21 = vpop.f32.mrb[15].mxu0 }
 0x6cf   :  { %3392 = vtanh.f32 %v2947_v17 }
 0x6d9   :  { %v3393_v29 = vpop.eup %3392 }
 0x6da   :  { %v2949_v41 = vmul.f32 %v3393_v29, %v3391_v31 }
 0x6dc   :  { %v2950_v15 = vsel %vm2434_vm3, %v2949_v41, 0.0 }
 0x6dd   :  { %2951 = vadd.xlane.f32.xlu1 %v2950_v15 }
 0x76a   :  { %v2952_v45 = vpop.xlane.xlu1 %2951 }
 0x76b   :  { %2953 = vst [vmem:[%s4961_s2] sm:$0xff] %v2952_v45 }

</bundles_post_ra>
